<compile_context>
chip_gen: v7x
topology: tpu7x:2x2x1
jax: 0.10.0
libtpu: 0.0.40
codegen_flags: <defaults>
</compile_context>

<pallas_src>
import numpy as np
import jax
import jax.numpy as jnp
from jax.experimental import pallas as pl
from jax.experimental.pallas import tpu as pltpu


def _round_up(x, m):
    return ((x + m - 1) // m) * m


def _make_kernel(in_channels):
    C = in_channels

    def kernel(xyz_ref, enc_c_ref, mlp_c_ref, w1_ref, w2_ref, o_ref):
        xyz = xyz_ref[...]                           # (tm, C)   f32
        encc = enc_c_ref[...]                        # (8, Kpad) f32 -- load slab once
        mlpc = mlp_c_ref[...]                        # (8, F)    f32

        # Hoisted constant rows (used several times below).
        bias = encc[C:C + 1, :]                      # folded -(center/2) @ freqs
        idm = encc[C + 1:C + 2, :]                   # identity-column mask
        trg = encc[C + 2:C + 3, :]                   # sin/cos-column mask
        phs = encc[C + 3:C + 4, :]                   # +pi/2 phase in cos columns
        b1 = mlpc[0:1, :]
        gamma = mlpc[1:2, :]
        beta = mlpc[2:3, :]
        b2 = mlpc[3:4, :]

        # ---- fused NeRF frequency encoding (VPU only; center & 1/2 folded in) ----
        # arg[:, j] = bias[j] + sum_c xyz[:, c] * (0.5 * freq_matrix[c, j])
        arg = bias + xyz[:, 0:1] * encc[0:1, :]
        for c in range(1, C):
            arg = arg + xyz[:, c:c + 1] * encc[c:c + 1, :]
        # enc = [x, sin(2^k x), cos(2^k x), ...];  cos(x) == sin(x + pi/2) -> one EUP op
        enc = idm * arg + trg * jnp.sin(arg + phs)

        # ---- Linear(freq_out -> F): bf16 MXU inputs, f32 accumulation ----
        h = jnp.dot(enc.astype(jnp.bfloat16), w1_ref[...],
                    preferred_element_type=jnp.float32) + b1

        # ---- LayerNorm(F), eps = 1e-5 (torch default), one-pass stats ----
        mean = jnp.mean(h, axis=-1, keepdims=True)
        var = jnp.mean(h * h, axis=-1, keepdims=True) - mean * mean
        h = (h - mean) * jax.lax.rsqrt(var + 1e-5) * gamma + beta

        # ---- ReLU ----
        h = jnp.maximum(h, 0.0)

        # ---- Linear(F -> F) ----
        # TODO(synk): emit a bf16 output (halves the dominant HBM stream on v6e/v7x)
        # if the consumer accepts it; kept f32 to match the PyTorch module dtype.
        o_ref[...] = jnp.dot(h.astype(jnp.bfloat16), w2_ref[...],
                             preferred_element_type=jnp.float32) + b2

    return kernel


def make_params(key, in_channels=3, num_pos_feats=256, n_freqs=8, kpad=128, logscale=True):
    per = 2 * n_freqs + 1
    freq_out = in_channels * per
    assert freq_out <= kpad
    if logscale:
        freq_bands = 2.0 ** np.arange(n_freqs, dtype=np.float32)
    else:
        freq_bands = np.linspace(1.0, 2.0 ** (n_freqs - 1), n_freqs, dtype=np.float32)
    center = np.tile(np.array([0.0, 0.0, 2.0], np.float32), in_channels // 3)      # (C,)

    # Per-channel column layout (matches PyTorch concat+reshape):
    #   [x, sin(2^0 x)..sin(2^{n-1} x), cos(2^0 x)..cos(2^{n-1} x)] per coordinate.
    fm = np.zeros((in_channels, kpad), np.float32)       # multipliers (coord -> column)
    idm = np.zeros((kpad,), np.float32)                  # identity-column mask
    trg = np.zeros((kpad,), np.float32)                  # sin/cos-column mask
    phs = np.zeros((kpad,), np.float32)                  # +pi/2 phase in cos columns
    for c in range(in_channels):
        base = c * per
        fm[c, base] = 1.0
        idm[base] = 1.0
        for k in range(n_freqs):
            fm[c, base + 1 + k] = freq_bands[k]
            trg[base + 1 + k] = 1.0
            fm[c, base + 1 + n_freqs + k] = freq_bands[k]
            trg[base + 1 + n_freqs + k] = 1.0
            phs[base + 1 + n_freqs + k] = np.pi / 2.0

    fm_scaled = 0.5 * fm                                 # folds the "/ 2.0"
    bias = -(0.5 * center) @ fm                          # folds the "- center", (kpad,)

    crows = max(8, ((in_channels + 4 + 7) // 8) * 8)
    enc_const = np.zeros((crows, kpad), np.float32)
    enc_const[:in_channels] = fm_scaled
    enc_const[in_channels] = bias
    enc_const[in_channels + 1] = idm
    enc_const[in_channels + 2] = trg
    enc_const[in_channels + 3] = phs

    k1, k2, k3, k4 = jax.random.split(key, 4)

    def xavier(k, fan_in, fan_out):   # xavier_uniform with gain=0.01 (as in _reset_parameters)
        limit = 0.01 * np.sqrt(6.0 / (fan_in + fan_out))
        return jax.random.uniform(k, (fan_in, fan_out), jnp.float32, -limit, limit)

    w1 = jnp.zeros((kpad, num_pos_feats), jnp.float32).at[:freq_out].set(
        xavier(k1, freq_out, num_pos_feats))
    b1 = jax.random.uniform(k2, (num_pos_feats,), jnp.float32, -0.01, 0.01)
    w2 = xavier(k3, num_pos_feats, num_pos_feats)
    b2 = jax.random.uniform(k4, (num_pos_feats,), jnp.float32, -0.01, 0.01)
    gamma = jnp.ones((num_pos_feats,), jnp.float32)      # LayerNorm weight (1-D => not xavier'd)
    beta = jnp.zeros((num_pos_feats,), jnp.float32)      # LayerNorm bias

    mlp_const = jnp.zeros((8, num_pos_feats), jnp.float32)
    mlp_const = mlp_const.at[0].set(b1).at[1].set(gamma).at[2].set(beta).at[3].set(b2)

    return dict(
        # kernel-ready fused constants; weights stored bf16 (halved VMEM/DMA, bf16 MXU)
        enc_const=jnp.asarray(enc_const), mlp_const=mlp_const,
        w1=w1.astype(jnp.bfloat16), w2=w2.astype(jnp.bfloat16),
        # raw pieces for the pure-JAX reference
        center=jnp.asarray(center), freq_bands=jnp.asarray(freq_bands),
        b1=b1, gamma=gamma, beta=beta, b2=b2,
        n_freqs=n_freqs, freq_out=freq_out, in_channels=in_channels)


def _pick_tm(M, max_tm=1024):
    """Row-tile size: always a multiple of 128 (full MXU pass on v5e); for larger M use
    256-multiples and ensure >= 2 grid tiles so v7x's two TensorCores both get work;
    cap at 1024 (VMEM has huge headroom, bigger tiles just add padding for small M)."""
    if M <= 256:
        return _round_up(max(M, 1), 128)
    return min(max_tm, _round_up(-(-M // 2), 256))


def ego3d_position_embedding(xyz, params, *, max_tm=1024):
    """xyz: (B, N, C) -> (B, N, num_pos_feats), float32."""
    B, N, C = xyz.shape
    M = B * N
    F_out = params["w2"].shape[1]
    tm = _pick_tm(M, max_tm)
    Mpad = _round_up(M, tm)                               # pad instead of asserting divisibility
    x2 = xyz.reshape(M, C).astype(jnp.float32)
    if Mpad != M:
        # Padded rows flow through LayerNorm with degenerate stats (eps keeps them finite)
        # and are sliced off below -- do not remove the [:M] slice.
        x2 = jnp.pad(x2, ((0, Mpad - M), (0, 0)))

    full = lambda i: (0, 0)
    single = pl.Buffered(1)            # grid-invariant operands: no double-buffering
    out = pl.pallas_call(
        _make_kernel(C),
        out_shape=jax.ShapeDtypeStruct((Mpad, F_out), jnp.float32),
        grid_spec=pltpu.PrefetchScalarGridSpec(
            num_scalar_prefetch=0,
            grid=(Mpad // tm,),
            in_specs=[
                # TODO(synk): a (C, Mpad) transposed xyz layout would avoid the (tm, 128)
                # lane-padded VMEM tile; kept (tm, C) since it is <= 1 MiB at tm <= 1024.
                pl.BlockSpec((tm, C), lambda i: (i, 0)),                               # xyz rows
                pl.BlockSpec(params["enc_const"].shape, full, pipeline_mode=single),   # enc consts
                pl.BlockSpec(params["mlp_const"].shape, full, pipeline_mode=single),   # b1/g/b/b2
                pl.BlockSpec(params["w1"].shape, full, pipeline_mode=single),          # (Kpad, F)
                pl.BlockSpec(params["w2"].shape, full, pipeline_mode=single),          # (F, F)
            ],
            out_specs=pl.BlockSpec((tm, F_out), lambda i: (i, 0)),
        ),
        compiler_params=pltpu.CompilerParams(dimension_semantics=("parallel",)),
    )(x2, params["enc_const"], params["mlp_const"], params["w1"], params["w2"])

    return out[:M].reshape(B, N, F_out)


def reference(xyz, params):
    """Pure-JAX (f32) mirror of the PyTorch forward (concat/reshape encoding + MLP head).
    Uses the same (bf16-stored) weights the kernel sees, upcast to f32."""
    freq_bands = params["freq_bands"]
    center = params["center"]
    xyz_n = (xyz.astype(jnp.float32) - center) / 2.0
    xf = xyz_n[..., None] * freq_bands
    enc = jnp.concatenate([xyz_n[..., None], jnp.sin(xf), jnp.cos(xf)], axis=-1)
    enc = enc.reshape(*xyz.shape[:2], -1)
    w1 = params["w1"][:params["freq_out"]].astype(jnp.float32)
    w2 = params["w2"].astype(jnp.float32)
    h = enc @ w1 + params["b1"]
    mean = h.mean(-1, keepdims=True)
    var = ((h - mean) ** 2).mean(-1, keepdims=True)
    h = (h - mean) / jnp.sqrt(var + 1e-5) * params["gamma"] + params["beta"]
    h = jnp.maximum(h, 0.0)
    return h @ w2 + params["b2"]


if __name__ == "__main__":
    B, N = 2, 8                      # small seq
    num_pos_feats = 256              # small hidden (module default is 768)
    key = jax.random.PRNGKey(0)
    kp, kx, ky, kz = jax.random.split(key, 4)
    params = make_params(kp, in_channels=3, num_pos_feats=num_pos_feats, n_freqs=8)

    # x in [-2, 2], y in [-2, 2], z in [0, 4]  (as documented in frequency_encoding)
    x = jax.random.uniform(kx, (B, N, 1), jnp.float32, -2.0, 2.0)
    y = jax.random.uniform(ky, (B, N, 1), jnp.float32, -2.0, 2.0)
    z = jax.random.uniform(kz, (B, N, 1), jnp.float32, 0.0, 4.0)
    xyz = jnp.concatenate([x, y, z], axis=-1)          # (B, N, 3)

    out = ego3d_position_embedding(xyz, params)
    out = jax.block_until_ready(out)

    ref = jax.block_until_ready(reference(xyz, params))
    assert out.shape == (B, N, num_pos_feats)
    # bf16 MXU inputs => widened tolerance vs the f32 reference (abs err ~1e-4 on
    # ~6e-3-scale outputs); a structurally wrong result would miss by ~1e-2.
    assert bool(jnp.allclose(out, ref, atol=2e-3, rtol=2e-2)), "mismatch vs pure-JAX reference"

    print("KERNEL_OK")
</pallas_src>

<mosaic_0001>
module attributes {stable_mosaic.version = 11 : i64} {
  func.func @kernel(%arg0: i32, %arg1: memref<128x3xf32, #tpu.memory_space<vmem>>, %arg2: memref<8x128xf32, #tpu.memory_space<vmem>>, %arg3: memref<8x256xf32, #tpu.memory_space<vmem>>, %arg4: memref<128x256xbf16, #tpu.memory_space<vmem>>, %arg5: memref<256x256xbf16, #tpu.memory_space<vmem>>, %arg6: memref<128x256xf32, #tpu.memory_space<vmem>>) attributes {dimension_semantics = [#tpu.dimension_semantics<parallel>], iteration_bounds = array<i64: 1>, scalar_prefetch = 0 : i64, scratch_operands = 0 : i64, tpu.core_type = #tpu.core_type<tc>, window_params = [{transform_indices = @transform_0, window_bounds = array<i64: 128, 3>}, {pipeline_mode = #tpu.pipeline_mode<synchronous>, transform_indices = @transform_1, window_bounds = array<i64: 8, 128>}, {pipeline_mode = #tpu.pipeline_mode<synchronous>, transform_indices = @transform_2, window_bounds = array<i64: 8, 256>}, {pipeline_mode = #tpu.pipeline_mode<synchronous>, transform_indices = @transform_3, window_bounds = array<i64: 128, 256>}, {pipeline_mode = #tpu.pipeline_mode<synchronous>, transform_indices = @transform_4, window_bounds = array<i64: 256, 256>}, {transform_indices = @transform_5, window_bounds = array<i64: 128, 256>}]} {
    %c0 = arith.constant 0 : index
    %c0_0 = arith.constant 0 : index
    %0 = vector.load %arg1[%c0, %c0_0] : memref<128x3xf32, #tpu.memory_space<vmem>>, vector<128x3xf32>
    %c0_1 = arith.constant 0 : index
    %c0_2 = arith.constant 0 : index
    %1 = vector.load %arg2[%c0_1, %c0_2] : memref<8x128xf32, #tpu.memory_space<vmem>>, vector<8x128xf32>
    %c0_3 = arith.constant 0 : index
    %c0_4 = arith.constant 0 : index
    %2 = vector.load %arg3[%c0_3, %c0_4] : memref<8x256xf32, #tpu.memory_space<vmem>>, vector<8x256xf32>
    %3 = vector.extract_strided_slice %1 {offsets = [3, 0], sizes = [1, 128], strides = [1, 1]} : vector<8x128xf32> to vector<1x128xf32>
    %4 = vector.extract_strided_slice %1 {offsets = [4, 0], sizes = [1, 128], strides = [1, 1]} : vector<8x128xf32> to vector<1x128xf32>
    %5 = vector.extract_strided_slice %1 {offsets = [5, 0], sizes = [1, 128], strides = [1, 1]} : vector<8x128xf32> to vector<1x128xf32>
    %6 = vector.extract_strided_slice %1 {offsets = [6, 0], sizes = [1, 128], strides = [1, 1]} : vector<8x128xf32> to vector<1x128xf32>
    %7 = vector.extract_strided_slice %2 {offsets = [0, 0], sizes = [1, 256], strides = [1, 1]} : vector<8x256xf32> to vector<1x256xf32>
    %8 = vector.extract_strided_slice %2 {offsets = [1, 0], sizes = [1, 256], strides = [1, 1]} : vector<8x256xf32> to vector<1x256xf32>
    %9 = vector.extract_strided_slice %2 {offsets = [2, 0], sizes = [1, 256], strides = [1, 1]} : vector<8x256xf32> to vector<1x256xf32>
    %10 = vector.extract_strided_slice %2 {offsets = [3, 0], sizes = [1, 256], strides = [1, 1]} : vector<8x256xf32> to vector<1x256xf32>
    %11 = vector.extract_strided_slice %0 {offsets = [0, 0], sizes = [128, 1], strides = [1, 1]} : vector<128x3xf32> to vector<128x1xf32>
    %12 = vector.extract_strided_slice %1 {offsets = [0, 0], sizes = [1, 128], strides = [1, 1]} : vector<8x128xf32> to vector<1x128xf32>
    %13 = vector.broadcast %11 : vector<128x1xf32> to vector<128x128xf32>
    %14 = vector.broadcast %12 : vector<1x128xf32> to vector<128x128xf32>
    %15 = arith.mulf %13, %14 : vector<128x128xf32>
    %16 = vector.broadcast %3 : vector<1x128xf32> to vector<128x128xf32>
    %17 = arith.addf %16, %15 : vector<128x128xf32>
    %18 = vector.extract_strided_slice %0 {offsets = [0, 1], sizes = [128, 1], strides = [1, 1]} : vector<128x3xf32> to vector<128x1xf32>
    %19 = vector.extract_strided_slice %1 {offsets = [1, 0], sizes = [1, 128], strides = [1, 1]} : vector<8x128xf32> to vector<1x128xf32>
    %20 = vector.broadcast %18 : vector<128x1xf32> to vector<128x128xf32>
    %21 = vector.broadcast %19 : vector<1x128xf32> to vector<128x128xf32>
    %22 = arith.mulf %20, %21 : vector<128x128xf32>
    %23 = arith.addf %17, %22 : vector<128x128xf32>
    %24 = vector.extract_strided_slice %0 {offsets = [0, 2], sizes = [128, 1], strides = [1, 1]} : vector<128x3xf32> to vector<128x1xf32>
    %25 = vector.extract_strided_slice %1 {offsets = [2, 0], sizes = [1, 128], strides = [1, 1]} : vector<8x128xf32> to vector<1x128xf32>
    %26 = vector.broadcast %24 : vector<128x1xf32> to vector<128x128xf32>
    %27 = vector.broadcast %25 : vector<1x128xf32> to vector<128x128xf32>
    %28 = arith.mulf %26, %27 : vector<128x128xf32>
    %29 = arith.addf %23, %28 : vector<128x128xf32>
    %30 = vector.broadcast %4 : vector<1x128xf32> to vector<128x128xf32>
    %31 = arith.mulf %30, %29 : vector<128x128xf32>
    %32 = vector.broadcast %6 : vector<1x128xf32> to vector<128x128xf32>
    %33 = arith.addf %29, %32 : vector<128x128xf32>
    %34 = math.sin %33 : vector<128x128xf32>
    %35 = vector.broadcast %5 : vector<1x128xf32> to vector<128x128xf32>
    %36 = arith.mulf %35, %34 : vector<128x128xf32>
    %37 = arith.addf %31, %36 : vector<128x128xf32>
    %38 = arith.truncf %37 : vector<128x128xf32> to vector<128x128xbf16>
    %c0_5 = arith.constant 0 : index
    %c0_6 = arith.constant 0 : index
    %39 = vector.load %arg4[%c0_5, %c0_6] : memref<128x256xbf16, #tpu.memory_space<vmem>>, vector<128x256xbf16>
    %cst = arith.constant dense<0.000000e+00> : vector<128x256xf32>
    %40 = tpu.matmul %38, %39, %cst {dimension_numbers = #tpu.dot_dimension_numbers<[1], [0], [0], [1], [0, 0, 1, 1], [], []>} : vector<128x128xbf16>, vector<128x256xbf16>, vector<128x256xf32> -> vector<128x256xf32>
    %41 = vector.broadcast %7 : vector<1x256xf32> to vector<128x256xf32>
    %42 = arith.addf %40, %41 : vector<128x256xf32>
    %cst_7 = arith.constant dense<0.000000e+00> : vector<128xf32>
    %43 = vector.multi_reduction <add>, %42, %cst_7 [1] : vector<128x256xf32> to vector<128xf32>
    %44 = vector.shape_cast %43 : vector<128xf32> to vector<128x1xf32>
    %cst_8 = arith.constant 2.560000e+02 : f32
    %45 = vector.broadcast %cst_8 : f32 to vector<128x1xf32>
    %46 = arith.divf %44, %45 : vector<128x1xf32>
    %47 = arith.mulf %42, %42 : vector<128x256xf32>
    %cst_9 = arith.constant dense<0.000000e+00> : vector<128xf32>
    %48 = vector.multi_reduction <add>, %47, %cst_9 [1] : vector<128x256xf32> to vector<128xf32>
    %49 = vector.shape_cast %48 : vector<128xf32> to vector<128x1xf32>
    %cst_10 = arith.constant 2.560000e+02 : f32
    %50 = vector.broadcast %cst_10 : f32 to vector<128x1xf32>
    %51 = arith.divf %49, %50 : vector<128x1xf32>
    %52 = arith.mulf %46, %46 : vector<128x1xf32>
    %53 = arith.subf %51, %52 : vector<128x1xf32>
    %54 = vector.broadcast %46 : vector<128x1xf32> to vector<128x256xf32>
    %55 = arith.subf %42, %54 : vector<128x256xf32>
    %cst_11 = arith.constant 9.99999974E-6 : f32
    %56 = vector.broadcast %cst_11 : f32 to vector<128x1xf32>
    %57 = arith.addf %53, %56 : vector<128x1xf32>
    %58 = math.rsqrt %57 : vector<128x1xf32>
    %59 = vector.broadcast %58 : vector<128x1xf32> to vector<128x256xf32>
    %60 = arith.mulf %55, %59 : vector<128x256xf32>
    %61 = vector.broadcast %8 : vector<1x256xf32> to vector<128x256xf32>
    %62 = arith.mulf %60, %61 : vector<128x256xf32>
    %63 = vector.broadcast %9 : vector<1x256xf32> to vector<128x256xf32>
    %64 = arith.addf %62, %63 : vector<128x256xf32>
    %cst_12 = arith.constant 0.000000e+00 : f32
    %65 = vector.broadcast %cst_12 : f32 to vector<128x256xf32>
    %66 = arith.maximumf %64, %65 : vector<128x256xf32>
    %67 = arith.truncf %66 : vector<128x256xf32> to vector<128x256xbf16>
    %c0_13 = arith.constant 0 : index
    %c0_14 = arith.constant 0 : index
    %68 = vector.load %arg5[%c0_13, %c0_14] : memref<256x256xbf16, #tpu.memory_space<vmem>>, vector<256x256xbf16>
    %cst_15 = arith.constant dense<0.000000e+00> : vector<128x256xf32>
    %69 = tpu.matmul %67, %68, %cst_15 {dimension_numbers = #tpu.dot_dimension_numbers<[1], [0], [0], [1], [0, 0, 1, 1], [], []>} : vector<128x256xbf16>, vector<256x256xbf16>, vector<128x256xf32> -> vector<128x256xf32>
    %70 = vector.broadcast %10 : vector<1x256xf32> to vector<128x256xf32>
    %71 = arith.addf %69, %70 : vector<128x256xf32>
    %c0_16 = arith.constant 0 : index
    %c0_17 = arith.constant 0 : index
    %72 = vector.load %arg6[%c0_16, %c0_17] : memref<128x256xf32, #tpu.memory_space<vmem>>, vector<128x256xf32>
    tpu.vector_store %arg6[%c0_16, %c0_17], %71 {strides = array<i32>} : memref<128x256xf32, #tpu.memory_space<vmem>>, vector<128x256xf32>,
    return
  }
  func.func @transform_0(%arg0: i32) -> (i32, i32) {
    %c0_i32 = arith.constant 0 : i32
    %c0_i32_0 = arith.constant 0 : i32
    return %arg0, %c0_i32 : i32, i32
  }
  func.func @transform_1(%arg0: i32) -> (i32, i32) {
    %c0_i32 = arith.constant 0 : i32
    %c0_i32_0 = arith.constant 0 : i32
    %c0_i32_1 = arith.constant 0 : i32
    return %c0_i32, %c0_i32_0 : i32, i32
  }
  func.func @transform_2(%arg0: i32) -> (i32, i32) {
    %c0_i32 = arith.constant 0 : i32
    %c0_i32_0 = arith.constant 0 : i32
    %c0_i32_1 = arith.constant 0 : i32
    return %c0_i32, %c0_i32_0 : i32, i32
  }
  func.func @transform_3(%arg0: i32) -> (i32, i32) {
    %c0_i32 = arith.constant 0 : i32
    %c0_i32_0 = arith.constant 0 : i32
    %c0_i32_1 = arith.constant 0 : i32
    return %c0_i32, %c0_i32_0 : i32, i32
  }
  func.func @transform_4(%arg0: i32) -> (i32, i32) {
    %c0_i32 = arith.constant 0 : i32
    %c0_i32_0 = arith.constant 0 : i32
    %c0_i32_1 = arith.constant 0 : i32
    return %c0_i32, %c0_i32_0 : i32, i32
  }
  func.func @transform_5(%arg0: i32) -> (i32, i32) {
    %c0_i32 = arith.constant 0 : i32
    %c0_i32_0 = arith.constant 0 : i32
    return %arg0, %c0_i32 : i32, i32
  }
}

</mosaic_0001>

<bundles_post_ra>
// kernel: tpu_custom_call.1
= control target key start
LH: loop header
LB: loop body
LE: loop exit
PB: predicated region body
PF: predicated region fallthrough
CT: control target
= control target key end

     0   :  { %10 = vsyncpa [#allocation3], 0  ;;  %s6073_s0 = inlined_call_operand.vmem [shape: f32[128,3], index: 0, kind: input, shape index: {}]   ;;  %s6074_s1 = inlined_call_operand.vmem [shape: f32[8,128], index: 1, kind: input, shape index: {}]   ;;  %s6075_s2 = inlined_call_operand.hbm [shape: f32[8,256], index: 2, kind: input, shape index: {}]   ;;  %s6076_s3 = inlined_call_operand.vmem [shape: bf16[128,256], index: 3, kind: input, shape index: {}]   ;;  %s6077_s4 = inlined_call_operand.hbm [shape: bf16[256,256], index: 4, kind: input, shape index: {}]   ;;  %s6078_s5 = inlined_call_operand.hbm [shape: f32[128,256], index: 5, kind: output, shape index: {}]  }
   0x1   :  { %11 = vsyncpa [#allocation6], 0 }
   0x2   :  { %12 = vsyncpa [#allocation4], 0  ;;  %s3627_s18 = smov [#allocation2]   ;;  %s3628_s20 = smov [#allocation5]  }
   0x3   :  { %s23_s19 = sshll.u32 %s3627_s18, 4  ;;  %s34_s21 = sshll.u32 %s3628_s20, 4  ;;  %s24_s19 = int_to_ptr.vmem [resolvable:$true] %s23_s19  ;;  %s3673_s21 = int_to_ptr.vmem [resolvable:$true] %s34_s21 }
   0x4   :  { %s3555_s24 = scalar_lea.hbm %s6075_s2, 256 }
   0x5   :  { %p3556_p0 = scmp.ne.s32.totalorder %s6075_s2, %s3555_s24  ;;  %p3559_p1 = scmp.lt.u32.totalorder %s3555_s24, %s6075_s2 }
   0x7   :  { %p3561_p2 = pnand %p3559_p1, %p3556_p0 }
   0x9   :  { %3564 = shalt.err (!%p3561_p2)
}
   0xa   :  { %s3565_s29 = scalar_lea.vmem %s24_s19, 256  ;;  %p3570_p4 = scmp.lt.s32.totalorder %s24_s19, %s24_s19 }
   0xb   :  { %p3566_p3 = scmp.ne.s32.totalorder %s24_s19, %s3565_s29  ;;  %p3571_p5 = scmp.lt.s32.totalorder %s3565_s29, %s3565_s29 }
   0xd   :  { %p3572_p6 = por %p3571_p5, %p3570_p4 }
   0xf   :  { %p3573_p7 = pnand %p3572_p6, %p3566_p3 }
  0x11   :  { %3576 = shalt.err (!%p3573_p7)
}
  0x12   :  { %26 = dma.hbm_to_vmem [thread:$0]  %s6075_s2, 256, %s24_s19, [#allocation3]  }
  0x13   :  { %s3577_s9 = scalar_lea.hbm %s6077_s4, 4096 }
  0x14   :  { %p3578_p8 = scmp.ne.s32.totalorder %s6077_s4, %s3577_s9  ;;  %p3581_p9 = scmp.lt.u32.totalorder %s3577_s9, %s6077_s4 }
  0x16   :  { %p3583_p10 = pnand %p3581_p9, %p3578_p8 }
  0x18   :  { %3586 = shalt.err (!%p3583_p10)
}
  0x19   :  { %s3587_s14 = scalar_lea.vmem %s3673_s21, 4096  ;;  %p3592_p12 = scmp.lt.s32.totalorder %s3673_s21, %s3673_s21 }
  0x1a   :  { %p3588_p11 = scmp.ne.s32.totalorder %s3673_s21, %s3587_s14  ;;  %p3593_p13 = scmp.lt.s32.totalorder %s3587_s14, %s3587_s14 }
  0x1c   :  { %p3594_p0 = por %p3593_p13, %p3592_p12 }
  0x1e   :  { %p3595_p1 = pnand %p3594_p0, %p3588_p11 }
  0x20   :  { %3598 = shalt.err (!%p3595_p1)
}
  0x21   :  { %s3629_s2 = smov 128   ;;  %s3630_s15 = smov 8  }
  0x22   :  { %40 = dma.hbm_to_vmem [thread:$0]  %s6077_s4, 4096, %s3673_s21, [#allocation6], %s3629_s2, %s3629_s2, %s3630_s15  }
  0x23   :  { %3621 = dma.done.wait [#allocation3], 256  }
  0x24   :  { %3622 = vsyncadd [#allocation3], 4294967040 }
  0x25   :  { %3623 = dma.done.wait [#allocation6], 4096  }
  0x26   :  { %3624 = vsyncadd [#allocation6], 4294963200  ;;  %v3631_v0 = vmov 2   ;;  %v3632_v1 = vmov 1   ;;  %v6079_v2 = vmov 0   ;;  %v48_v3 = vld [vmem:[%s6073_s0] sm:$0xff]  ;;  %v147_v19 = vlaneseq }
  0x27   :  { %3357 = vset.pattern.permute.xlu0 %v3631_v0  ;;  %3356 = vset.pattern.permute.xlu1 %v3632_v1  ;;  %v50_v4 = vld [vmem:[%s6073_s0 + $0x10] sm:$0xff]  ;;  %v49_v5 = vld [vmem:[%s6073_s0 + $0x8] sm:$0xff]  ;;  %v52_v6 = vld [vmem:[%s6073_s0 + $0x20] sm:$0xff] }
  0x28   :  { %2271 = vmatprep.mubr.bf16.mxu0 %v6079_v2  ;;  %288 = vperm.xlu0 %3357, %v48_v3   ;;  %v51_v7 = vld [vmem:[%s6073_s0 + $0x18] sm:$0xff]  ;;  %v53_v8 = vld [vmem:[%s6073_s0 + $0x28] sm:$0xff]  ;;  %v54_v12 = vld [vmem:[%s6073_s0 + $0x30] sm:$0xff]  ;;  %v3779_v22 = vshrl.u32 %v147_v19, 7 }
  0x29   :  { %188 = vperm.xlu1 %3356, %v48_v3   ;;  %v55_v9 = vld [vmem:[%s6073_s0 + $0x38] sm:$0xff]  ;;  %v57_v10 = vld [vmem:[%s6073_s0 + $0x48] sm:$0xff]  ;;  %v56_v13 = vld [vmem:[%s6073_s0 + $0x40] sm:$0xff] }
  0x2a   :  { %v59_v11 = vld [vmem:[%s6073_s0 + $0x58] sm:$0xff]  ;;  %v58_v14 = vld [vmem:[%s6073_s0 + $0x50] sm:$0xff]  ;;  %v60_v15 = vld [vmem:[%s6073_s0 + $0x60] sm:$0xff]  ;;  %6194 = vst [vmem:[#allocation11_spill] sm:$0xff] %v3779_v22  ;;  %v3783_v25 = vsub.s32 0, %v3779_v22  ;;  %v3786_v26 = vsub.s32 1, %v3779_v22 }
  0x2b   :  { %v61_v16 = vld [vmem:[%s6073_s0 + $0x68] sm:$0xff]  ;;  %v63_v17 = vld [vmem:[%s6073_s0 + $0x78] sm:$0xff]  ;;  %v62_v18 = vld [vmem:[%s6073_s0 + $0x70] sm:$0xff]  ;;  %v3791_v28 = vsub.s32 3, %v3779_v22  ;;  %v3799_v31 = vsub.s32 2, %v3779_v22  ;;  %v409_v37 = vsub.s32 6, %v3779_v22 }
  0x2c   :  { %296 = vperm.xlu0 %3357, %v50_v4   ;;  %6195 = vst [vmem:[#allocation12_spill] sm:$0xff] %v3783_v25  ;;  %6196 = vst [vmem:[#allocation13_spill] sm:$0xff] %v3786_v26  ;;  %v3796_v29 = vld [vmem:[%s6074_s1] sm:$0xff] }
  0x2d   :  { %192 = vperm.xlu1 %3356, %v49_v5   ;;  %6197 = vst [vmem:[#allocation14_spill] sm:$0xff] %v3791_v28  ;;  %6198 = vst [vmem:[#allocation15_spill] sm:$0xff] %v3799_v31  ;;  %v3803_v32 = vrot.slane %v3796_v29, %v3783_v25  ;;  %v3807_v33 = vrot.slane %v3796_v29, %v3786_v26  ;;  %v3811_v34 = vrot.slane %v3796_v29, %v3791_v28 }
  0x2e   :  { %v3815_v36 = vrot.slane %v3796_v29, %v3799_v31  ;;  %v3825_v45 = vrot.slane %v3796_v29, %v409_v37 }
  0x30   :  { %304 = vperm.xlu0 %3357, %v52_v6  }
  0x31   :  { %3358 = vset.pattern.permute.xlu1 %v3631_v0 }
  0x32   :  { %292 = vperm.xlu1 %3358, %v49_v5  }
  0x34   :  { %3364 = vset.pattern.permute.xlu0 %v6079_v2 }
  0x35   :  { %69 = vperm.xlu0 %3364, %v48_v3  }
  0x36   :  { %3359 = vset.pattern.permute.xlu1 %v6079_v2 }
  0x37   :  { %79 = vperm.xlu1 %3359, %v50_v4  }
  0x39   :  { %74 = vperm.xlu0 %3364, %v49_v5  }
  0x3b   :  { %3360 = vset.pattern.permute.xlu1 %v3632_v1 }
  0x3c   :  { %196 = vperm.xlu1 %3360, %v50_v4  }
  0x3d   :  { %84 = vperm.xlu0 %3364, %v51_v7  }
  0x40   :  { %200 = vperm.xlu1 %3360, %v51_v7  }
  0x41   :  { %94 = vperm.xlu0 %3364, %v53_v8  }
  0x44   :  { %3361 = vset.pattern.permute.xlu1 %v3631_v0 }
  0x45   :  { %300 = vperm.xlu1 %3361, %v51_v7   ;;  %104 = vperm.xlu0 %3364, %v55_v9  }
  0x49   :  { %3362 = vset.pattern.permute.xlu1 %v6079_v2  ;;  %114 = vperm.xlu0 %3364, %v57_v10  }
  0x4a   :  { %89 = vperm.xlu1 %3362, %v52_v6  }
  0x4d   :  { %124 = vperm.xlu0 %3364, %v59_v11  }
  0x4e   :  { %3363 = vset.pattern.permute.xlu1 %v3632_v1 }
  0x4f   :  { %204 = vperm.xlu1 %3363, %v52_v6  }
  0x51   :  { %3373 = vset.pattern.permute.xlu0 %v3631_v0 }
  0x52   :  { %312 = vperm.xlu0 %3373, %v54_v12  }
  0x53   :  { %208 = vperm.xlu1 %3363, %v53_v8  }
  0x56   :  { %320 = vperm.xlu0 %3373, %v56_v13  }
  0x57   :  { %3365 = vset.pattern.permute.xlu1 %v3631_v0 }
  0x58   :  { %308 = vperm.xlu1 %3365, %v53_v8  }
  0x5a   :  { %328 = vperm.xlu0 %3373, %v58_v14  }
  0x5c   :  { %3366 = vset.pattern.permute.xlu1 %v6079_v2 }
  0x5d   :  { %99 = vperm.xlu1 %3366, %v54_v12  }
  0x5e   :  { %336 = vperm.xlu0 %3373, %v60_v15  }
  0x61   :  { %3367 = vset.pattern.permute.xlu1 %v3632_v1 }
  0x62   :  { %212 = vperm.xlu1 %3367, %v54_v12   ;;  %3378 = vset.pattern.permute.xlu0 %v6079_v2 }
  0x63   :  { %134 = vperm.xlu0 %3378, %v61_v16  }
  0x66   :  { %216 = vperm.xlu1 %3367, %v55_v9  }
  0x67   :  { %144 = vperm.xlu0 %3378, %v63_v17  }
  0x6a   :  { %3368 = vset.pattern.permute.xlu1 %v3631_v0 }
  0x6b   :  { %316 = vperm.xlu1 %3368, %v55_v9   ;;  %3382 = vset.pattern.permute.xlu0 %v3631_v0 }
  0x6c   :  { %344 = vperm.xlu0 %3382, %v62_v18  }
  0x6f   :  { %3369 = vset.pattern.permute.xlu1 %v6079_v2 }
  0x70   :  { %109 = vperm.xlu1 %3369, %v56_v13  }
  0x74   :  { %3370 = vset.pattern.permute.xlu1 %v3632_v1 }
  0x75   :  { %220 = vperm.xlu1 %3370, %v56_v13  }
  0x79   :  { %224 = vperm.xlu1 %3370, %v57_v10  }
  0x7d   :  { %3371 = vset.pattern.permute.xlu1 %v3631_v0 }
  0x7e   :  { %324 = vperm.xlu1 %3371, %v57_v10  }
  0x82   :  { %3372 = vset.pattern.permute.xlu1 %v6079_v2 }
  0x83   :  { %119 = vperm.xlu1 %3372, %v58_v14  }
  0x87   :  { %3374 = vset.pattern.permute.xlu1 %v3632_v1 }
  0x88   :  { %228 = vperm.xlu1 %3374, %v58_v14   ;;  %v3384_v14 = vld [vmem:[%s6076_s3 + $0x4] ss:$8 sps:$4 sm:$0xff]  }
  0x89   :  { %2239 = vmatprep.subr.bf16.mxu0 %v3384_v14 }
  0x8c   :  { %232 = vperm.xlu1 %3374, %v59_v11  }
  0x90   :  { %3375 = vset.pattern.permute.xlu1 %v3631_v0 }
  0x91   :  { %332 = vperm.xlu1 %3375, %v59_v11  }
  0x95   :  { %3376 = vset.pattern.permute.xlu1 %v6079_v2 }
  0x96   :  { %129 = vperm.xlu1 %3376, %v60_v15  }
  0x9a   :  { %3377 = vset.pattern.permute.xlu1 %v3632_v1 }
  0x9b   :  { %236 = vperm.xlu1 %3377, %v60_v15  }
  0x9f   :  { %240 = vperm.xlu1 %3377, %v61_v16  }
  0xa3   :  { %3379 = vset.pattern.permute.xlu1 %v3631_v0 }
  0xa4   :  { %340 = vperm.xlu1 %3379, %v61_v16  }
  0xa7   :  { %v289_v21 = vpop.permute.xlu0 %288 }
  0xa8   :  { %3380 = vset.pattern.permute.xlu1 %v6079_v2  ;;  %v189_v20 = vpop.permute.xlu1 %188  ;;  %v355_v41 = vmul.f32 %v3815_v36, %v289_v21 }
  0xa9   :  { %139 = vperm.xlu1 %3380, %v62_v18   ;;  %v255_v40 = vmul.f32 %v3807_v33, %v189_v20 }
  0xab   :  { %v297_v24 = vpop.permute.xlu0 %296 }
  0xac   :  { %v193_v23 = vpop.permute.xlu1 %192  ;;  %v357_v49 = vmul.f32 %v3815_v36, %v297_v24 }
  0xad   :  { %3381 = vset.pattern.permute.xlu1 %v3632_v1  ;;  %v256_v48 = vmul.f32 %v3807_v33, %v193_v23  ;;  %v389_v23 = vsub.s32 4, %v3779_v22 }
  0xae   :  { %244 = vperm.xlu1 %3381, %v62_v18   ;;  %v3386_v18 = vld [vmem:[%s6076_s3] ss:$8 sps:$4 sm:$0xff]  }
  0xaf   :  { %v3788_v27 = vpop.permute.xlu0 %304  ;;  %2240 = vmatpush1.bf16.msra.mxu0 %v3386_v18  ;;  %v6090_v18 = vmov 1326507024  }
  0xb1   :  { %v293_v30 = vpop.permute.xlu1 %292 }
  0xb2   :  { %248 = vperm.xlu1 %3381, %v63_v17   ;;  %v356_v60 = vmul.f32 %v3815_v36, %v293_v30 }
  0xb4   :  { %v70_v35 = vpop.permute.xlu0 %69 }
  0xb5   :  { %v151_v38 = vmul.f32 %v3803_v32, %v70_v35 }
  0xb6   :  { %3383 = vset.pattern.permute.xlu1 %v3631_v0  ;;  %v80_v39 = vpop.permute.xlu1 %79 }
  0xb7   :  { %348 = vperm.xlu1 %3383, %v63_v17   ;;  %v171_v42 = vadd.f32 %v3811_v34, %v151_v38  ;;  %v153_v43 = vmul.f32 %v3803_v32, %v80_v39 }
  0xb8   :  { %v75_v44 = vpop.permute.xlu0 %74 }
  0xb9   :  { %v271_v46 = vadd.f32 %v255_v40, %v171_v42  ;;  %v152_v47 = vmul.f32 %v3803_v32, %v75_v44  ;;  %v173_v52 = vadd.f32 %v3811_v34, %v153_v43  ;;  %v3877_v40 = vrot.slane %v3796_v29, %v389_v23 }
  0xbb   :  { %v197_v50 = vpop.permute.xlu1 %196  ;;  %v3830_v51 = vadd.f32 %v355_v41, %v271_v46  ;;  %v172_v53 = vadd.f32 %v3811_v34, %v152_v47  ;;  %6202 = vst [vmem:[#allocation19_spill] sm:$0xff] %v3877_v40  ;;  %v3881_v41 = vmul.f32 %v3815_v36, %v3788_v27 }
  0xbc   :  { %v257_v54 = vmul.f32 %v3807_v33, %v197_v50  ;;  %v85_v55 = vpop.permute.xlu0 %84 }
  0xbd   :  { %v3837_v56 = vadd.f32 %v3825_v45, %v3830_v51  ;;  %v272_v57 = vadd.f32 %v256_v48, %v172_v53  ;;  %v154_v59 = vmul.f32 %v3803_v32, %v85_v55  ;;  %v6088_v53 = vmov 683565275  }
  0xbe   :  { %v273_v58 = vadd.f32 %v257_v54, %v173_v52  ;;  %v6086_v54 = vmov 2475754826  }
  0xbf   :  { %6199 = vst [vmem:[#allocation16_spill] sm:$0xff] %v3837_v56  ;;  %v201_v61 = vpop.permute.xlu1 %200  ;;  %v430_v62 = vand.u32 2139095040, %v3837_v56  ;;  %v3844_v0 = vadd.f32 %v356_v60, %v272_v57  ;;  %v174_v1 = vadd.f32 %v3811_v34, %v154_v59  ;;  %v6083_v44 = vand.u32 2147483647, %v3837_v56 }
  0xc0   :  { %v3842_v63 = vadd.f32 %v357_v49, %v273_v58  ;;  %v258_v3 = vmul.f32 %v3807_v33, %v201_v61  ;;  %v95_v39 = vpop.permute.xlu0 %94  ;;  %v6084_v58 = vmov 2131351028   ;;  %v6094_v61 = vmov 2102212464  }
  0xc1   :  { %v431_v5 = vshrl.u32 %v430_v62, 23  ;;  %v3854_v7 = vadd.f32 %v3825_v45, %v3844_v0  ;;  %v3887_v50 = vmul.f32 %v3803_v32, %v95_v39 }
  0xc2   :  { %v3850_v4 = vadd.f32 %v3825_v45, %v3842_v63  ;;  %v274_v9 = vadd.f32 %v258_v3, %v174_v1 }
  0xc3   :  { %6200 = vst [vmem:[#allocation17_spill] sm:$0xff] %v3854_v7  ;;  %v3132_v11 = vadd.s32 4294967169, %v431_v5  ;;  %v534_v15 = vand.u32 2139095040, %v3854_v7  ;;  %v6092_v5 = vmov 920167782  }
  0xc4   :  { %v301_v6 = vpop.permute.xlu1 %300  ;;  %v638_v8 = vand.u32 2139095040, %v3850_v4  ;;  %v6081_v16 = vand.u32 2147483647, %v3850_v4 }
  0xc5   :  { %v358_v10 = vmul.f32 %v3815_v36, %v301_v6  ;;  %v437_v20 = vadd.s32 1, %v3132_v11  ;;  %v535_v24 = vshrl.u32 %v534_v15, 23 }
  0xc6   :  { %v639_v12 = vshrl.u32 %v638_v8, 23  ;;  %v642_v30 = vand.u32 8388607, %v6081_v16 }
  0xc7   :  { %v3858_v13 = vadd.f32 %v358_v10, %v274_v9  ;;  %vm438_vm1 = vcmp.gt.s32.totalorder %v437_v20, 0  ;;  %v3136_v42 = vadd.s32 4294967169, %v535_v24 }
  0xc8   :  { %v3140_v17 = vadd.s32 4294967169, %v639_v12  ;;  %v643_v43 = vor.u32 8388608, %v642_v30  ;;  %v3884_v46 = vsel %vm438_vm1, %v437_v20, 0 }
  0xc9   :  { %v3870_v19 = vadd.f32 %v3825_v45, %v3858_v13  ;;  %v90_v49 = vpop.permute.xlu1 %89  ;;  %v541_v1 = vadd.s32 1, %v3136_v42 }
  0xca   :  { %v645_v21 = vadd.s32 1, %v3140_v17  ;;  %v3898_v8 = vshll.u32 %v643_v43, 8 }
  0xcb   :  { %6201 = vst [vmem:[#allocation18_spill] sm:$0xff] %v3870_v19  ;;  %v742_v37 = vand.u32 2139095040, %v3870_v19  ;;  %v6082_v55 = vand.u32 2147483647, %v3870_v19  ;;  %vm542_vm5 = vcmp.gt.s32.totalorder %v541_v1, 0 }
  0xcc   :  { %vm646_vm0 = vcmp.gt.s32.totalorder %v645_v21, 0 }
  0xcd   :  { %v647_v35 = vsel %vm646_vm0, %v645_v21, 0  ;;  %v743_v48 = vshrl.u32 %v742_v37, 23  ;;  %v746_v21 = vand.u32 8388607, %v6082_v55 }
  0xce   :  { %v649_v38 = vand.u32 31, %v647_v35  ;;  %v648_v52 = vshrl.u32 %v647_v35, 5  ;;  %v205_v23 = vpop.permute.xlu1 %204 }
  0xcf   :  { %v3144_v12 = vadd.s32 4294967169, %v743_v48 }
  0xd0   :  { %v650_v47 = vsub.s32 32, %v649_v38  ;;  %v652_v29 = vshll.u32 %v6088_v53, %v649_v38  ;;  %v655_v27 = vshll.u32 %v6086_v54, %v649_v38  ;;  %v658_v60 = vshll.u32 %v6084_v58, %v649_v38 }
  0xd1   :  { %v661_v3 = vshll.u32 %v6094_v61, %v649_v38  ;;  %v664_v17 = vshll.u32 %v6092_v5, %v649_v38  ;;  %vm667_vm2 = vcmp.lt.s32.totalorder %v648_v52, 1  ;;  %vm669_vm3 = vcmp.lt.s32.totalorder %v648_v52, 3 }
  0xd2   :  { %v653_v57 = vshrl.u32 %v6086_v54, %v650_v47  ;;  %v656_v59 = vshrl.u32 %v6084_v58, %v650_v47  ;;  %v659_v62 = vshrl.u32 %v6094_v61, %v650_v47  ;;  %v662_v6 = vshrl.u32 %v6092_v5, %v650_v47 }
  0xd3   :  { %v651_v14 = vshrl.u32 %v6088_v53, %v650_v47  ;;  %v665_v20 = vshrl.u32 %v6090_v18, %v650_v47  ;;  %vm670_vm4 = vcmp.lt.s32.totalorder %v648_v52, 4  ;;  %vm668_vm6 = vcmp.lt.s32.totalorder %v648_v52, 2 }
  0xd4   :  { %v654_v9 = vor.u32 %v653_v57, %v652_v29  ;;  %v657_v10 = vor.u32 %v656_v59, %v655_v27  ;;  %v660_v11 = vor.u32 %v659_v62, %v658_v60  ;;  %v663_v15 = vor.u32 %v662_v6, %v661_v3  ;;  %v3387_v29 = vld [vmem:[%s6076_s3 + $0x14] ss:$8 sps:$4 sm:$0xff]   ;;  %v3389_v62 = vld [vmem:[%s6076_s3 + $0x10] ss:$8 sps:$4 sm:$0xff]  }
  0xd5   :  { %v666_v24 = vor.u32 %v665_v20, %v664_v17  ;;  %v749_v48 = vadd.s32 1, %v3144_v12  ;;  %v747_v60 = vor.u32 8388608, %v746_v21  ;;  %2241 = vmatprep.subr.bf16.mxu0 %v3387_v29  ;;  %v155_v52 = vmul.f32 %v3803_v32, %v90_v49 }
  0xd6   :  { %v671_v30 = vsel %vm667_vm2, %v651_v14, %v654_v9  ;;  %v672_v35 = vsel %vm670_vm4, %v660_v11, 2102212464  ;;  %v675_v37 = vsel %vm667_vm2, %v654_v9, %v657_v10  ;;  %v676_v42 = vsel %vm670_vm4, %v663_v15, 920167782  ;;  %v209_v14 = vpop.permute.xlu1 %208  ;;  %2242 = vmatpush1.bf16.msra.mxu0 %v3389_v62 }
  0xd7   :  { %v673_v39 = vsel %vm669_vm3, %v657_v10, %v672_v35  ;;  %v679_v43 = vsel %vm667_vm2, %v657_v10, %v660_v11  ;;  %v677_v38 = vsel %vm669_vm3, %v660_v11, %v676_v42  ;;  %v680_v47 = vsel %vm670_vm4, %v666_v24, 1326507024  ;;  %v3390_v24 = vld [vmem:[%s6076_s3 + $0x24] ss:$8 sps:$4 sm:$0xff]  }
  0xd8   :  { %v674_v27 = vsel %vm668_vm6, %v671_v30, %v673_v39  ;;  %v678_v57 = vsel %vm668_vm6, %v675_v37, %v677_v38  ;;  %v681_v59 = vsel %vm669_vm3, %v663_v15, %v680_v47  ;;  %vm750_vm7 = vcmp.gt.s32.totalorder %v749_v48, 0  ;;  %2243 = vmatprep.subr.bf16.mxu0 %v3390_v24 }
  0xd9   :  { %v682_v3 = vsel %vm668_vm6, %v679_v43, %v681_v59  ;;  %v3915_v6 = vmul.u32.u64.low %v3898_v8, %v678_v57  ;;  %v3916_v9 = vmul.u32.u64.high %v3898_v8, %v678_v57, %v3915_v6  ;;  %v751_v12 = vsel %vm750_vm7, %v749_v48, 0  ;;  %v3393_v57 = vld [vmem:[%s6076_s3 + $0x34] ss:$8 sps:$4 sm:$0xff]  }
  0xda   :  { %v3920_v10 = vmul.u32.u64.low %v3898_v8, %v682_v3  ;;  %v3921_v11 = vmul.u32.u64.high %v3898_v8, %v682_v3, %v3920_v10  ;;  %v3925_v15 = vand.u32 31, %v3884_v46  ;;  %v3928_v17 = vsel %vm542_vm5, %v541_v1, 0  ;;  %v3392_v1 = vld [vmem:[%s6076_s3 + $0x20] ss:$8 sps:$4 sm:$0xff]  }
  0xdb   :  { %v753_v20 = vand.u32 31, %v751_v12  ;;  %v3932_v21 = vadd.f32 %v3811_v34, %v3887_v50  ;;  %v690_v30 = vmul.u32 %v3898_v8, %v674_v27  ;;  %v752_v49 = vshrl.u32 %v751_v12, 5  ;;  %2244 = vmatpush1.bf16.msra.mxu0 %v3392_v1 }
  0xdc   :  { %6203 = vst [vmem:[#allocation20_spill] sm:$0xff] %v3925_v15  ;;  %v3938_v35 = vshll.u32 %v747_v60, 8  ;;  %v259_v37 = vmul.f32 %v3807_v33, %v205_v23  ;;  %v693_v39 = vadd.s32 1, %v3916_v9  ;;  %v175_v50 = vadd.f32 %v3811_v34, %v155_v52  ;;  %2245 = vmatprep.subr.bf16.mxu0 %v3393_v57 }
  0xdd   :  { %v754_v42 = vsub.s32 32, %v753_v20  ;;  %v260_v43 = vmul.f32 %v3807_v33, %v209_v14  ;;  %vm692_vm8 = vc.u32 %v3921_v11, %v3915_v6  ;;  %v756_v8 = vshll.u32 %v6088_v53, %v753_v20 }
  0xde   :  { %v759_v38 = vshll.u32 %v6086_v54, %v753_v20  ;;  %v762_v23 = vshll.u32 %v6084_v58, %v753_v20  ;;  %v694_v47 = vsel %vm692_vm8, %v693_v39, %v3916_v9  ;;  %v765_v27 = vshll.u32 %v6094_v61, %v753_v20  ;;  %v3395_v9 = vld [vmem:[%s6076_s3 + $0x30] ss:$8 sps:$4 sm:$0xff]  }
  0xdf   :  { %v757_v48 = vshrl.u32 %v6086_v54, %v754_v42  ;;  %v760_v29 = vshrl.u32 %v6084_v58, %v754_v42  ;;  %v695_v59 = vadd.s32 %v694_v47, %v690_v30  ;;  %v755_v60 = vshrl.u32 %v6088_v53, %v754_v42  ;;  %2246 = vmatpush1.bf16.msra.mxu0 %v3395_v9 }
  0xe0   :  { %v763_v62 = vshrl.u32 %v6094_v61, %v754_v42  ;;  %v766_v3 = vshrl.u32 %v6092_v5, %v754_v42  ;;  %v768_v52 = vshll.u32 %v6092_v5, %v753_v20  ;;  %v769_v14 = vshrl.u32 %v6090_v18, %v754_v42 }
  0xe1   :  { %v758_v10 = vor.u32 %v757_v48, %v756_v8  ;;  %v761_v12 = vor.u32 %v760_v29, %v759_v38  ;;  %v696_v24 = vadd.s32 536870912, %v695_v59  ;;  %vm771_vm9 = vcmp.lt.s32.totalorder %v752_v49, 1  ;;  %v105_v38 = vpop.permute.xlu0 %104  ;;  %v309_v48 = vpop.permute.xlu1 %308 }
  0xe2   :  { %v764_v1 = vor.u32 %v763_v62, %v762_v23  ;;  %v767_v30 = vor.u32 %v766_v3, %v765_v27  ;;  %v770_v39 = vor.u32 %v769_v14, %v768_v52  ;;  %vm772_vm10 = vcmp.lt.s32.totalorder %v752_v49, 2 }
  0xe3   :  { %vm773_vm11 = vcmp.lt.s32.totalorder %v752_v49, 3  ;;  %vm774_vm12 = vcmp.lt.s32.totalorder %v752_v49, 4  ;;  %v3967_v47 = vshrl.u32 %v696_v24, 30  ;;  %v779_v16 = vsel %vm771_vm9, %v758_v10, %v761_v12 }
  0xe4   :  { %v776_v2 = vsel %vm774_vm12, %v764_v1, 2102212464  ;;  %v780_v8 = vsel %vm774_vm12, %v767_v30, 920167782  ;;  %v775_v20 = vsel %vm771_vm9, %v755_v60, %v758_v10  ;;  %v783_v42 = vsel %vm771_vm9, %v761_v12, %v764_v1 }
  0xe5   :  { %6204 = vst [vmem:[#allocation21_spill] sm:$0xff] %v3967_v47  ;;  %v781_v29 = vsel %vm773_vm11, %v764_v1, %v780_v8  ;;  %v784_v57 = vsel %vm774_vm12, %v770_v39, 1326507024  ;;  %v698_v23 = vshll.u32 %v3967_v47, 30  ;;  %v777_v27 = vsel %vm773_vm11, %v761_v12, %v776_v2 }
  0xe6   :  { %v782_v62 = vsel %vm772_vm10, %v779_v16, %v781_v29  ;;  %v785_v3 = vsel %vm773_vm11, %v767_v30, %v784_v57  ;;  %v360_v24 = vmul.f32 %v3815_v36, %v309_v48  ;;  %v275_v1 = vadd.f32 %v259_v37, %v175_v50 }
  0xe7   :  { %v786_v9 = vsel %vm772_vm10, %v783_v42, %v785_v3  ;;  %v3973_v52 = vmul.u32.u64.low %v3938_v35, %v782_v62  ;;  %v3974_v14 = vmul.u32.u64.high %v3938_v35, %v782_v62, %v3973_v52  ;;  %v3978_v55 = vsub.s32 %v695_v59, %v698_v23  ;;  %v3995_v59 = vpop.permute.xlu0 %114 }
  0xe8   :  { %v3981_v60 = vmul.u32.u64.low %v3938_v35, %v786_v9  ;;  %v3982_v10 = vmul.u32.u64.high %v3938_v35, %v786_v9, %v3981_v60  ;;  %v3985_v2 = vand.u32 31, %v3928_v17  ;;  %v778_v16 = vsel %vm772_vm10, %v775_v20, %v777_v27 }
  0xe9   :  { %v276_v12 = vadd.f32 %v260_v43, %v3932_v21  ;;  %v3990_v30 = vsub.s32 32, %v3925_v15  ;;  %v3993_v39 = vadd.f32 %v3881_v41, %v275_v1  ;;  %v3999_v8 = vand.u32 8388607, %v6083_v44  ;;  %v100_v21 = vpop.permute.xlu1 %99 }
  0xea   :  { %6205 = vst [vmem:[#allocation22_spill] sm:$0xff] %v3985_v2  ;;  %v701_v37 = vsub.s32 0, %v3978_v55  ;;  %v797_v50 = vadd.s32 1, %v3974_v14  ;;  %v158_v49 = vmul.f32 %v3803_v32, %v105_v38  ;;  %v4008_v43 = vmul.f32 %v3877_v40, %v3842_v63 }
  0xeb   :  { %6206 = vst [vmem:[#allocation23_spill] sm:$0xff] %v3990_v30  ;;  %6207 = vst [vmem:[#allocation24_spill] sm:$0xff] %v3999_v8  ;;  %v4004_v48 = vadd.f32 %v360_v24, %v276_v12  ;;  %v794_v41 = vmul.u32 %v3938_v35, %v778_v16  ;;  %vm796_vm13 = vc.u32 %v3982_v10, %v3973_v52  ;;  %v4018_v29 = vsub.s32 32, %v3985_v2  ;;  %v4052_v16 = vpop.permute.xlu0 %124 }
  0xec   :  { %6208 = vst [vmem:[#allocation25_spill] sm:$0xff] %v4008_v43  ;;  %v4015_v20 = vmul.f32 %v3877_v40, %v3830_v51  ;;  %v798_v38 = vsel %vm796_vm13, %v797_v50, %v3974_v14  ;;  %v4023_v42 = vadd.f32 %v3825_v45, %v3993_v39  ;;  %v454_v35 = vshrl.u32 %v6092_v5, %v3990_v30  ;;  %v3396_v51 = vld [vmem:[%s6076_s3 + $0x44] ss:$8 sps:$4 sm:$0xff]  }
  0xed   :  { %6210 = vst [vmem:[#allocation27_spill] sm:$0xff] %v4018_v29  ;;  %v4027_v63 = vadd.f32 %v3825_v45, %v4004_v48  ;;  %v799_v57 = vadd.s32 %v798_v38, %v794_v41  ;;  %v4036_v23 = vmul.f32 %v3877_v40, %v3844_v0  ;;  %v4040_v62 = vshrl.u32 %v3884_v46, 5  ;;  %2247 = vmatprep.subr.bf16.mxu0 %v3396_v51  ;;  %v3398_v46 = vld [vmem:[%s6076_s3 + $0x40] ss:$8 sps:$4 sm:$0xff]   ;;  %v213_v41 = vpop.permute.xlu1 %212 }
  0xee   :  { %6209 = vst [vmem:[#allocation26_spill] sm:$0xff] %v4015_v20  ;;  %v3141_v3 = vmin.u32 %v701_v37, %v3978_v55  ;;  %v846_v9 = vand.u32 2139095040, %v4023_v42  ;;  %v4045_v14 = vadd.f32 %v3811_v34, %v158_v49  ;;  %v453_v24 = vshll.u32 %v6094_v61, %v3925_v15  ;;  %2248 = vmatpush1.bf16.msra.mxu0 %v3398_v46 }
  0xef   :  { %6211 = vst [vmem:[#allocation28_spill] sm:$0xff] %v4027_v63  ;;  %6212 = vst [vmem:[#allocation29_spill] sm:$0xff] %v4036_v23  ;;  %v457_v60 = vshrl.u32 %v6090_v18, %v3990_v30  ;;  %v800_v0 = vadd.s32 536870912, %v799_v57  ;;  %v950_v1 = vand.u32 2139095040, %v4027_v63  ;;  %v456_v12 = vshll.u32 %v6092_v5, %v3925_v15 }
  0xf0   :  { %6213 = vst [vmem:[#allocation30_spill] sm:$0xff] %v4040_v62  ;;  %v558_v37 = vshrl.u32 %v6092_v5, %v4018_v29  ;;  %v4063_v50 = vmul.f32 %v3877_v40, %v3858_v13  ;;  %v847_v49 = vshrl.u32 %v846_v9, 23  ;;  %v4065_v38 = vor.u32 %v454_v35, %v453_v24  ;;  %v3399_v13 = vld [vmem:[%s6076_s3 + $0x54] ss:$8 sps:$4 sm:$0xff]   ;;  %v3401_v24 = vld [vmem:[%s6076_s3 + $0x50] ss:$8 sps:$4 sm:$0xff]  }
  0xf1   :  { %v4068_v51 = vshrl.u32 %v3928_v17, 5  ;;  %v557_v44 = vshll.u32 %v6094_v61, %v3985_v2  ;;  %v4072_v27 = vshrl.u32 %v800_v0, 30  ;;  %v703_v58 = vclz %v3141_v3  ;;  %2249 = vmatprep.subr.bf16.mxu0 %v3399_v13  ;;  %v217_v13 = vpop.permute.xlu1 %216 }
  0xf2   :  { %6214 = vst [vmem:[#allocation31_spill] sm:$0xff] %v4063_v50  ;;  %6215 = vst [vmem:[#allocation32_spill] sm:$0xff] %v4065_v38  ;;  %v6100_v54 = vand.u32 2147483647, %v4023_v42  ;;  %v3148_v53 = vadd.s32 4294967169, %v847_v49  ;;  %v951_v18 = vshrl.u32 %v950_v1, 23  ;;  %v458_v35 = vor.u32 %v457_v60, %v456_v12  ;;  %2250 = vmatpush1.bf16.msra.mxu0 %v3401_v24 }
  0xf3   :  { %6216 = vst [vmem:[#allocation33_spill] sm:$0xff] %v4068_v51  ;;  %6217 = vst [vmem:[#allocation34_spill] sm:$0xff] %v4072_v27  ;;  %vm462_vm14 = vcmp.lt.s32.totalorder %v4040_v62, 4  ;;  %v802_v17 = vshll.u32 %v4072_v27, 30  ;;  %v157_v9 = vmul.f32 %v3803_v32, %v100_v21  ;;  %v4084_v3 = vor.u32 %v558_v37, %v557_v44  ;;  %v313_v37 = vpop.permute.xlu0 %312 }
  0xf4   :  { %v4088_v0 = vshll.u32 %v6092_v5, %v3985_v2  ;;  %v6219_v1 = vmov 1326507024   ;;  %v853_v60 = vadd.s32 1, %v3148_v53  ;;  %v4097_v21 = vsel %vm462_vm14, %v4065_v38, 920167782 }
  0xf5   :  { %6218 = vst [vmem:[#allocation35_spill] sm:$0xff] %v4084_v3  ;;  %v4092_v46 = vshrl.u32 %v6219_v1, %v4018_v29  ;;  %6220 = vst [vmem:[#allocation36_spill] sm:$0xff] %v4097_v21  ;;  %vm566_vm15 = vcmp.lt.s32.totalorder %v4068_v51, 4  ;;  %v4100_v12 = vsub.s32 %v799_v57, %v802_v17  ;;  %v261_v44 = vmul.f32 %v3807_v33, %v213_v41 }
  0xf6   :  { %v3142_v49 = vadd.s32 4294967294, %v703_v58  ;;  %v850_v5 = vand.u32 8388607, %v6100_v54  ;;  %vm854_vm0 = vcmp.gt.s32.totalorder %v853_v60, 0  ;;  %v3152_v53 = vadd.s32 4294967169, %v951_v18 }
  0xf7   :  { %v4107_v61 = vsel %vm462_vm14, %v458_v35, 1326507024  ;;  %v805_v28 = vsub.s32 0, %v4100_v12  ;;  %v855_v31 = vsel %vm854_vm0, %v853_v60, 0  ;;  %v177_v57 = vadd.f32 %v3811_v34, %v157_v9 }
  0xf8   :  { %6221 = vst [vmem:[#allocation37_spill] sm:$0xff] %v4107_v61  ;;  %v4116_v58 = vsel %vm566_vm15, %v4084_v3, 920167782  ;;  %v857_v17 = vand.u32 31, %v855_v31  ;;  %v361_v18 = vmul.f32 %v3815_v36, %v313_v37  ;;  %v4122_v60 = vmul.f32 %v3807_v33, %v217_v13 }
  0xf9   :  { %6222 = vst [vmem:[#allocation38_spill] sm:$0xff] %v4116_v58  ;;  %v3145_v24 = vmin.u32 %v805_v28, %v4100_v12  ;;  %v277_v54 = vadd.f32 %v261_v44, %v177_v57  ;;  %vm3143_vm1 = vcmp.lt.s32.totalorder %v3142_v49, 0  ;;  %v851_v9 = vor.u32 8388608, %v850_v5 }
  0xfa   :  { %v858_v26 = vsub.s32 32, %v857_v17  ;;  %v957_v41 = vadd.s32 1, %v3152_v53  ;;  %v856_v23 = vshrl.u32 %v855_v31, 5  ;;  %v6223_v20 = vmov 683565275  }
  0xfb   :  { %v807_v25 = vclz %v3145_v24  ;;  %v860_v50 = vshll.u32 %v6223_v20, %v857_v17  ;;  %v6224_v43 = vmov 2475754826   ;;  %v6225_v47 = vmov 2131351028  }
  0xfc   :  { %v863_v27 = vshll.u32 %v6224_v43, %v857_v17  ;;  %v861_v37 = vshrl.u32 %v6224_v43, %v858_v26  ;;  %v864_v28 = vshrl.u32 %v6225_v47, %v858_v26  ;;  %v866_v35 = vshll.u32 %v6225_v47, %v857_v17 }
  0xfd   :  { %v6226_v44 = vmov 2102212464   ;;  %v3146_v13 = vadd.s32 4294967294, %v807_v25  ;;  %v6227_v5 = vmov 920167782   ;;  %v873_v53 = vshrl.u32 %v6219_v1, %v858_v26 }
  0xfe   :  { %v867_v57 = vshrl.u32 %v6226_v44, %v858_v26  ;;  %v869_v22 = vshll.u32 %v6226_v44, %v857_v17  ;;  %v870_v56 = vshrl.u32 %v6227_v5, %v858_v26  ;;  %v862_v31 = vor.u32 %v861_v37, %v860_v50 }
  0xff   :  { %v865_v24 = vor.u32 %v864_v28, %v863_v27  ;;  %v872_v58 = vshll.u32 %v6227_v5, %v857_v17  ;;  %vm3147_vm2 = vcmp.lt.s32.totalorder %v3146_v13, 0  ;;  %v6228_v2 = vand.u32 2147483647, %v4027_v63 }
 0x100   :  { %v868_v3 = vor.u32 %v867_v57, %v866_v35  ;;  %v871_v29 = vor.u32 %v870_v56, %v869_v22  ;;  %v4136_v8 = vadd.f32 %v361_v18, %v277_v54  ;;  %v4139_v25 = vsel %vm3143_vm1, 0, %v3142_v49 }
 0x101   :  { %v954_v7 = vand.u32 8388607, %v6228_v2  ;;  %v4141_v38 = vsel %vm3147_vm2, 0, %v3146_v13  ;;  %v874_v61 = vor.u32 %v873_v53, %v872_v58  ;;  %v891_v21 = vshll.u32 %v851_v9, 8  ;;  %v3402_v13 = vld [vmem:[%s6076_s3 + $0x64] ss:$8 sps:$4 sm:$0xff]  }
 0x102   :  { %v815_v50 = vsub.s32 4294967266, %v4141_v38  ;;  %vm875_vm3 = vcmp.lt.s32.totalorder %v856_v23, 1  ;;  %vm878_vm4 = vcmp.lt.s32.totalorder %v856_v23, 4  ;;  %vm958_vm5 = vcmp.gt.s32.totalorder %v957_v41, 0  ;;  %2251 = vmatprep.subr.bf16.mxu0 %v3402_v13 }
 0x103   :  { %vm877_vm6 = vcmp.lt.s32.totalorder %v856_v23, 3  ;;  %v880_v27 = vsel %vm878_vm4, %v868_v3, 2102212464  ;;  %v883_v22 = vsel %vm875_vm3, %v862_v31, %v865_v24  ;;  %v884_v56 = vsel %vm878_vm4, %v871_v29, 920167782 }
 0x104   :  { %v859_v54 = vshrl.u32 %v6223_v20, %v858_v26  ;;  %vm876_vm7 = vcmp.lt.s32.totalorder %v856_v23, 2  ;;  %v885_v2 = vsel %vm877_vm6, %v868_v3, %v884_v56  ;;  %v955_v49 = vor.u32 8388608, %v954_v7 }
 0x105   :  { %v886_v17 = vsel %vm876_vm7, %v883_v22, %v885_v2  ;;  %v887_v58 = vsel %vm875_vm3, %v865_v24, %v868_v3  ;;  %v888_v18 = vsel %vm878_vm4, %v874_v61, 1326507024  ;;  %v959_v35 = vsel %vm958_vm5, %v957_v41, 0  ;;  %v317_v3 = vpop.permute.xlu1 %316  ;;  %v3404_v61 = vld [vmem:[%s6076_s3 + $0x60] ss:$8 sps:$4 sm:$0xff]  }
 0x106   :  { %v816_v9 = vadd.s32 127, %v815_v50  ;;  %v879_v37 = vsel %vm875_vm3, %v859_v54, %v862_v31  ;;  %v881_v28 = vsel %vm877_vm6, %v865_v24, %v880_v27  ;;  %v889_v57 = vsel %vm877_vm6, %v871_v29, %v888_v18  ;;  %2252 = vmatpush1.bf16.msra.mxu0 %v3404_v61 }
 0x107   :  { %v811_v26 = vsub.s32 32, %v4141_v38  ;;  %v890_v53 = vsel %vm876_vm7, %v887_v58, %v889_v57  ;;  %v4154_v7 = vmul.u32.u64.low %v891_v21, %v886_v17  ;;  %v4155_v56 = vmul.u32.u64.high %v891_v21, %v886_v17, %v4154_v7 }
 0x108   :  { %v795_v29 = vadd.s32 %v3973_v52, %v3982_v10  ;;  %v4163_v41 = vmul.u32.u64.low %v891_v21, %v890_v53  ;;  %v4164_v31 = vmul.u32.u64.high %v891_v21, %v890_v53, %v4163_v41  ;;  %v4168_v24 = vmul.f32 %v3803_v32, %v3995_v59 }
 0x109   :  { %v882_v27 = vsel %vm876_vm7, %v879_v37, %v881_v28  ;;  %v961_v22 = vand.u32 31, %v959_v35  ;;  %v4174_v54 = vadd.f32 %v4122_v60, %v4045_v14  ;;  %v817_v2 = vshll.u32 %v816_v9, 23  ;;  %v3405_v14 = vld [vmem:[%s6076_s3 + $0x74] ss:$8 sps:$4 sm:$0xff]   ;;  %v3407_v60 = vld [vmem:[%s6076_s3 + $0x70] ss:$8 sps:$4 sm:$0xff]  }
 0x10a   :  { %v4176_v52 = vshll.u32 %v955_v49, 8  ;;  %v4180_v10 = vadd.f32 %v3825_v45, %v4136_v8  ;;  %v4183_v59 = vmul.f32 %v3815_v36, %v317_v3  ;;  %v812_v23 = vshll.u32 %v4100_v12, %v4141_v38  ;;  %2253 = vmatprep.subr.bf16.mxu0 %v3405_v14 }
 0x10b   :  { %v813_v17 = vshrl.u32 %v795_v29, %v811_v26  ;;  %v901_v58 = vadd.s32 1, %v4155_v56  ;;  %v962_v18 = vsub.s32 32, %v961_v22  ;;  %v898_v49 = vmul.u32 %v891_v21, %v882_v27  ;;  %2254 = vmatpush1.bf16.msra.mxu0 %v3407_v60 }
 0x10c   :  { %6229 = vst [vmem:[#allocation39_spill] sm:$0xff] %v4180_v10  ;;  %vm900_vm8 = vc.u32 %v4164_v31, %v4154_v7  ;;  %v960_v9 = vshrl.u32 %v959_v35, 5  ;;  %v964_v37 = vshll.u32 %v6223_v20, %v961_v22  ;;  %v967_v28 = vshll.u32 %v6224_v43, %v961_v22 }
 0x10d   :  { %v902_v38 = vsel %vm900_vm8, %v901_v58, %v4155_v56  ;;  %v965_v12 = vshrl.u32 %v6224_v43, %v962_v18  ;;  %v968_v57 = vshrl.u32 %v6225_v47, %v962_v18  ;;  %v4201_v13 = vor.u32 4788187, %v817_v2 }
 0x10e   :  { %v903_v26 = vadd.s32 %v902_v38, %v898_v49  ;;  %v970_v21 = vshll.u32 %v6225_v47, %v961_v22  ;;  %v971_v53 = vshrl.u32 %v6226_v44, %v962_v18  ;;  %v973_v61 = vshll.u32 %v6226_v44, %v961_v22 }
 0x10f   :  { %v966_v35 = vor.u32 %v965_v12, %v964_v37  ;;  %v969_v3 = vor.u32 %v968_v57, %v967_v28  ;;  %v974_v56 = vshrl.u32 %v6227_v5, %v962_v18  ;;  %v976_v27 = vshll.u32 %v6227_v5, %v961_v22 }
 0x110   :  { %v904_v29 = vadd.s32 536870912, %v903_v26  ;;  %v972_v41 = vor.u32 %v971_v53, %v970_v21  ;;  %v977_v58 = vshrl.u32 %v6219_v1, %v962_v18  ;;  %v963_v2 = vshrl.u32 %v6223_v20, %v962_v18 }
 0x111   :  { %v975_v14 = vor.u32 %v974_v56, %v973_v61  ;;  %vm979_vm9 = vcmp.lt.s32.totalorder %v960_v9, 1  ;;  %vm982_vm10 = vcmp.lt.s32.totalorder %v960_v9, 4  ;;  %vm980_vm11 = vcmp.lt.s32.totalorder %v960_v9, 2 }
 0x112   :  { %v4210_v49 = vshrl.u32 %v904_v29, 30  ;;  %v978_v60 = vor.u32 %v977_v58, %v976_v27  ;;  %v984_v37 = vsel %vm982_vm10, %v972_v41, 2102212464  ;;  %v987_v38 = vsel %vm979_vm9, %v966_v35, %v969_v3 }
 0x113   :  { %vm981_vm12 = vcmp.lt.s32.totalorder %v960_v9, 3  ;;  %v988_v12 = vsel %vm982_vm10, %v975_v14, 920167782  ;;  %v991_v28 = vsel %vm979_vm9, %v969_v3, %v972_v41  ;;  %v983_v21 = vsel %vm979_vm9, %v963_v2, %v966_v35 }
 0x114   :  { %6230 = vst [vmem:[#allocation40_spill] sm:$0xff] %v4210_v49  ;;  %v906_v57 = vshll.u32 %v4210_v49, 30  ;;  %v989_v22 = vsel %vm981_vm12, %v972_v41, %v988_v12  ;;  %v992_v53 = vsel %vm982_vm10, %v978_v60, 1326507024  ;;  %v985_v50 = vsel %vm981_vm12, %v969_v3, %v984_v37 }
 0x115   :  { %v990_v18 = vsel %vm980_vm11, %v987_v38, %v989_v22  ;;  %v993_v61 = vsel %vm981_vm12, %v975_v14, %v992_v53  ;;  %v1054_v56 = vand.u32 2139095040, %v4180_v10  ;;  %v814_v15 = vor.u32 %v813_v17, %v812_v23 }
 0x116   :  { %v4215_v29 = vsub.s32 %v903_v26, %v906_v57  ;;  %v994_v27 = vsel %vm980_vm11, %v991_v28, %v993_v61  ;;  %v4219_v58 = vmul.u32.u64.low %v4176_v52, %v990_v18  ;;  %v4220_v62 = vmul.u32.u64.high %v4176_v52, %v990_v18, %v4219_v58  ;;  %v110_v28 = vpop.permute.xlu1 %109 }
 0x117   :  { %v4224_v35 = vmul.u32.u64.low %v4176_v52, %v994_v27  ;;  %v4225_v41 = vmul.u32.u64.high %v4176_v52, %v994_v27, %v4224_v35  ;;  %v1055_v3 = vshrl.u32 %v1054_v56, 23  ;;  %v707_v2 = vsub.s32 32, %v4139_v25 }
 0x118   :  { %v6231_v14 = vsub.s32 4294967266, %v4139_v25  ;;  %v909_v26 = vsub.s32 0, %v4215_v29  ;;  %v986_v37 = vsel %vm980_vm11, %v983_v21, %v985_v50  ;;  %v691_v38 = vadd.s32 %v3915_v6, %v3921_v11 }
 0x119   :  { %v819_v12 = vand.u32 2147483647, %v4201_v13  ;;  %v6125_v23 = vand.u32 2147483647, %v4180_v10  ;;  %v3156_v17 = vadd.s32 4294967169, %v1055_v3  ;;  %v1005_v22 = vadd.s32 1, %v4220_v62 }
 0x11a   :  { %v712_v60 = vadd.s32 127, %v6231_v14  ;;  %v3149_v57 = vmin.u32 %v909_v26, %v4215_v29  ;;  %v162_v53 = vmul.f32 %v3803_v32, %v4052_v16  ;;  %v4242_v9 = vadd.f32 %v4183_v59, %v4174_v54 }
 0x11b   :  { %v821_v50 = vcvt.s32.f32 %v814_v15  ;;  %v1002_v6 = vmul.u32 %v4176_v52, %v986_v37  ;;  %vm1004_vm13 = vc.u32 %v4225_v41, %v4219_v58  ;;  %v1061_v11 = vadd.s32 1, %v3156_v17 }
 0x11c   :  { %v6232_v13 = vor.u32 %v4092_v46, %v4088_v0  ;;  %v709_v18 = vshrl.u32 %v691_v38, %v707_v2  ;;  %v713_v16 = vshll.u32 %v712_v60, 23  ;;  %v1006_v61 = vsel %vm1004_vm13, %v1005_v22, %v4220_v62  ;;  %v221_v2 = vpop.permute.xlu1 %220 }
 0x11d   :  { %v4255_v54 = vmul.f32 %v821_v50, %v819_v12  ;;  %v1007_v15 = vadd.s32 %v1006_v61, %v1002_v6  ;;  %v1058_v52 = vand.u32 8388607, %v6125_v23  ;;  %vm1062_vm0 = vcmp.gt.s32.totalorder %v1061_v11, 0 }
 0x11e   :  { %v4252_v21 = vsel %vm566_vm15, %v6232_v13, 1326507024  ;;  %v708_v59 = vshll.u32 %v3978_v55, %v4139_v25  ;;  %v911_v56 = vclz %v3149_v57  ;;  %v1063_v0 = vsel %vm1062_vm0, %v1061_v11, 0 }
 0x11f   :  { %6233 = vst [vmem:[#allocation41_spill] sm:$0xff] %v4252_v21  ;;  %v4263_v46 = vadd.f32 %v3825_v45, %v4242_v9  ;;  %v1008_v27 = vadd.s32 536870912, %v1007_v15  ;;  %v4267_v62 = vadd.f32 %v3811_v34, %v4168_v24  ;;  %v4270_v35 = vadd.f32 %v3811_v34, %v162_v53 }
 0x120   :  { %v1065_v3 = vand.u32 31, %v1063_v0  ;;  %v4272_v14 = vor.u32 %v709_v18, %v708_v59  ;;  %v4274_v60 = vor.u32 4788187, %v713_v16  ;;  %v4278_v55 = vmul.f32 %v3877_v40, %v3993_v39 }
 0x121   :  { %6234 = vst [vmem:[#allocation42_spill] sm:$0xff] %v4263_v46  ;;  %v4282_v25 = vmul.f32 %v3877_v40, %v4004_v48  ;;  %v4285_v26 = vshrl.u32 %v1008_v27, 30  ;;  %v1059_v37 = vor.u32 8388608, %v1058_v52  ;;  %v3150_v12 = vadd.s32 4294967294, %v911_v56 }
 0x122   :  { %6235 = vst [vmem:[#allocation43_spill] sm:$0xff] %v4278_v55  ;;  %v1066_v38 = vsub.s32 32, %v1065_v3  ;;  %v159_v57 = vmul.f32 %v3803_v32, %v110_v28  ;;  %v263_v22 = vmul.f32 %v3807_v33, %v221_v2  ;;  %v1068_v53 = vshll.u32 %v6223_v20, %v1065_v3 }
 0x123   :  { %6236 = vst [vmem:[#allocation44_spill] sm:$0xff] %v4282_v25  ;;  %6237 = vst [vmem:[#allocation45_spill] sm:$0xff] %v4285_v26  ;;  %v1010_v39 = vshll.u32 %v4285_v26, 30  ;;  %v1071_v6 = vshll.u32 %v6224_v43, %v1065_v3  ;;  %v1074_v11 = vshll.u32 %v6225_v47, %v1065_v3  ;;  %v1158_v18 = vand.u32 2139095040, %v4263_v46  ;;  %v321_v26 = vpop.permute.xlu0 %320 }
 0x124   :  { %v1069_v48 = vshrl.u32 %v6224_v43, %v1066_v38  ;;  %v1072_v50 = vshrl.u32 %v6225_v47, %v1066_v38  ;;  %v1075_v13 = vshrl.u32 %v6226_v44, %v1066_v38  ;;  %v1064_v28 = vshrl.u32 %v1063_v0, 5 }
 0x125   :  { %v4298_v16 = vsub.s32 %v1007_v15, %v1010_v39  ;;  %v4300_v52 = vshll.u32 %v1059_v37, 8  ;;  %v1077_v27 = vshll.u32 %v6226_v44, %v1065_v3  ;;  %v1078_v2 = vshrl.u32 %v6227_v5, %v1066_v38 }
 0x126   :  { %v1070_v61 = vor.u32 %v1069_v48, %v1068_v53  ;;  %v1073_v59 = vor.u32 %v1072_v50, %v1071_v6  ;;  %v1076_v56 = vor.u32 %v1075_v13, %v1074_v11  ;;  %vm3151_vm1 = vcmp.lt.s32.totalorder %v3150_v12, 0 }
 0x127   :  { %v1013_v23 = vsub.s32 0, %v4298_v16  ;;  %v1080_v24 = vshll.u32 %v6227_v5, %v1065_v3  ;;  %v1081_v17 = vshrl.u32 %v6219_v1, %v1066_v38  ;;  %v1079_v25 = vor.u32 %v1078_v2, %v1077_v27 }
 0x128   :  { %v1159_v15 = vshrl.u32 %v1158_v18, 23  ;;  %v6238_v0 = vand.u32 2147483647, %v4263_v46  ;;  %v179_v37 = vadd.f32 %v3811_v34, %v159_v57  ;;  %vm6185_vm2 = vcmp.lt.s32.totalorder %v3870_v19, 0 }
 0x129   :  { %v3153_v53 = vmin.u32 %v1013_v23, %v4298_v16  ;;  %v1082_v48 = vor.u32 %v1081_v17, %v1080_v24  ;;  %vm1083_vm3 = vcmp.lt.s32.totalorder %v1064_v28, 1  ;;  %vm1086_vm4 = vcmp.lt.s32.totalorder %v1064_v28, 4 }
 0x12a   :  { %v4309_v39 = vand.u32 8388607, %v6238_v0  ;;  %v4314_v50 = vsel %vm3151_vm1, 0, %v3150_v12  ;;  %v1067_v3 = vshrl.u32 %v6223_v20, %v1066_v38  ;;  %v1088_v6 = vsel %vm1086_vm4, %v1076_v56, 2102212464 }
 0x12b   :  { %v1091_v11 = vsel %vm1083_vm3, %v1070_v61, %v1073_v59  ;;  %v1015_v13 = vclz %v3153_v53  ;;  %vm1085_vm5 = vcmp.lt.s32.totalorder %v1064_v28, 3  ;;  %v1092_v18 = vsel %vm1086_vm4, %v1079_v25, 920167782 }
 0x12c   :  { %v1095_v27 = vsel %vm1083_vm3, %v1073_v59, %v1076_v56  ;;  %vm1084_vm6 = vcmp.lt.s32.totalorder %v1064_v28, 2  ;;  %v1087_v2 = vsel %vm1083_vm3, %v1067_v3, %v1070_v61  ;;  %v1093_v57 = vsel %vm1085_vm5, %v1076_v56, %v1092_v18 }
 0x12d   :  { %v1096_v0 = vsel %vm1086_vm4, %v1082_v48, 1326507024  ;;  %v6239_v55 = vand.u32 2147483647, %v3870_v19  ;;  %v6240_v23 = vmov 0  ;;  %v3154_v24 = vadd.s32 4294967294, %v1015_v13 }
 0x12e   :  { %v1089_v12 = vsel %vm1085_vm5, %v1073_v59, %v1088_v6  ;;  %v1094_v38 = vsel %vm1084_vm6, %v1091_v11, %v1093_v57  ;;  %v1097_v17 = vsel %vm1085_vm5, %v1079_v25, %v1096_v0  ;;  %v919_v53 = vsub.s32 4294967266, %v4314_v50  ;;  %v225_v59 = vpop.permute.xlu1 %224 }
 0x12f   :  { %vm4319_vm7 = vcmp.le.f32.partialorder %v6239_v55, 0.7853982  ;;  %v1098_v49 = vsel %vm1084_vm6, %v1095_v27, %v1097_v17  ;;  %v4327_v61 = vmul.u32.u64.low %v4300_v52, %v1094_v38  ;;  %v4328_v56 = vmul.u32.u64.high %v4300_v52, %v1094_v38, %v4327_v61 }
 0x130   :  { %v6241_v23 = vsel %vm4319_vm7, 4294967295, %v6240_v23  ;;  %vm3155_vm8 = vcmp.lt.s32.totalorder %v3154_v24, 0  ;;  %v4332_v55 = vmul.u32.u64.low %v4300_v52, %v1098_v49  ;;  %v4333_v48 = vmul.u32.u64.high %v4300_v52, %v1098_v49, %v4332_v55 }
 0x131   :  { %6242 = vst [vmem:[#allocation46_spill] sm:$0xff] %v6241_v23  ;;  %v3160_v3 = vadd.s32 4294967169, %v1159_v15  ;;  %v4337_v25 = vmul.f32 %v3877_v40, %v4136_v8  ;;  %v1090_v6 = vsel %vm1084_vm6, %v1087_v2, %v1089_v12  ;;  %v279_v11 = vadd.f32 %v263_v22, %v179_v37 }
 0x132   :  { %v363_v13 = vmul.f32 %v3815_v36, %v321_v26  ;;  %v715_v18 = vand.u32 2147483647, %v4274_v60  ;;  %v717_v27 = vcvt.s32.f32 %v4272_v14  ;;  %v4343_v57 = vsel %vm3155_vm8, 0, %v3154_v24 }
 0x133   :  { %6243 = vst [vmem:[#allocation47_spill] sm:$0xff] %v4337_v25  ;;  %v1165_v0 = vadd.s32 1, %v3160_v3  ;;  %v6244_v49 = vxor.u32 2147483648, %v4255_v54  ;;  %v1109_v8 = vadd.s32 1, %v4328_v56  ;;  %v1163_v28 = vor.u32 8388608, %v4309_v39 }
 0x134   :  { %v264_v22 = vmul.f32 %v3807_v33, %v225_v59  ;;  %v915_v26 = vsub.s32 32, %v4314_v50  ;;  %v4354_v60 = vadd.s32 127, %v919_v53  ;;  %v1106_v14 = vmul.u32 %v4300_v52, %v1090_v6 }
 0x135   :  { %v824_v15 = vsel %vm6185_vm2, %v6244_v49, %v4255_v54  ;;  %vm1108_vm9 = vc.u32 %v4333_v48, %v4327_v61  ;;  %v1023_v37 = vsub.s32 4294967266, %v4343_v57  ;;  %vm1166_vm10 = vcmp.gt.s32.totalorder %v1165_v0, 0 }
 0x136   :  { %v1110_v2 = vsel %vm1108_vm9, %v1109_v8, %v4328_v56  ;;  %v4361_v54 = vadd.f32 %v363_v13, %v279_v11  ;;  %v4363_v24 = vmul.f32 %v717_v27, %v715_v18  ;;  %v899_v39 = vadd.s32 %v4154_v7, %v4164_v31  ;;  %v325_v8 = vpop.permute.xlu1 %324 }
 0x137   :  { %v1111_v12 = vadd.s32 %v1110_v2, %v1106_v14  ;;  %v1167_v38 = vsel %vm1166_vm10, %v1165_v0, 0  ;;  %v4370_v52 = vsel %vm4319_vm7, %v3870_v19, %v824_v15  ;;  %v1003_v17 = vadd.s32 %v4219_v58, %v4225_v41 }
 0x138   :  { %v1169_v53 = vand.u32 31, %v1167_v38  ;;  %v4375_v56 = vadd.f32 %v264_v22, %v4267_v62  ;;  %v4377_v55 = vshrl.u32 %v899_v39, %v915_v26  ;;  %v4380_v7 = vshll.u32 %v1163_v28, 8 }
 0x139   :  { %v1112_v59 = vadd.s32 536870912, %v1111_v12  ;;  %v1019_v31 = vsub.s32 32, %v4343_v57  ;;  %v1024_v6 = vadd.s32 127, %v1023_v37  ;;  %v4385_v13 = vadd.f32 %v3825_v45, %v4361_v54 }
 0x13a   :  { %v1170_v11 = vsub.s32 32, %v1169_v53  ;;  %v1168_v41 = vshrl.u32 %v1167_v38, 5  ;;  %v1172_v62 = vshll.u32 %v6223_v20, %v1169_v53  ;;  %v1175_v18 = vshll.u32 %v6224_v43, %v1169_v53 }
 0x13b   :  { %6245 = vst [vmem:[#allocation48_spill] sm:$0xff] %v4385_v13  ;;  %v4387_v58 = vshrl.u32 %v1112_v59, 30  ;;  %v1178_v49 = vshll.u32 %v6225_v47, %v1169_v53  ;;  %v1181_v22 = vshll.u32 %v6226_v44, %v1169_v53  ;;  %v1020_v37 = vshll.u32 %v4298_v16, %v4343_v57 }
 0x13c   :  { %v1173_v27 = vshrl.u32 %v6224_v43, %v1170_v11  ;;  %v1176_v0 = vshrl.u32 %v6225_v47, %v1170_v11  ;;  %v1179_v15 = vshrl.u32 %v6226_v44, %v1170_v11  ;;  %v1182_v26 = vshrl.u32 %v6227_v5, %v1170_v11 }
 0x13d   :  { %6246 = vst [vmem:[#allocation49_spill] sm:$0xff] %v4387_v58  ;;  %v1114_v28 = vshll.u32 %v4387_v58, 30  ;;  %v1185_v14 = vshrl.u32 %v6219_v1, %v1170_v11  ;;  %v1184_v38 = vshll.u32 %v6227_v5, %v1169_v53  ;;  %v364_v23 = vmul.f32 %v3815_v36, %v325_v8 }
 0x13e   :  { %v1174_v2 = vor.u32 %v1173_v27, %v1172_v62  ;;  %v1177_v39 = vor.u32 %v1176_v0, %v1175_v18  ;;  %v1180_v3 = vor.u32 %v1179_v15, %v1178_v49  ;;  %v1183_v25 = vor.u32 %v1182_v26, %v1181_v22 }
 0x13f   :  { %v4402_v59 = vsub.s32 %v1111_v12, %v1114_v28  ;;  %v1021_v58 = vshrl.u32 %v1003_v17, %v1019_v31  ;;  %v1025_v19 = vshll.u32 %v1024_v6, 23  ;;  %v1186_v21 = vor.u32 %v1185_v14, %v1184_v38 }
 0x140   :  { %vm1187_vm11 = vcmp.lt.s32.totalorder %v1168_v41, 1  ;;  %vm1190_vm12 = vcmp.lt.s32.totalorder %v1168_v41, 4  ;;  %v6139_v16 = vand.u32 2147483647, %v4385_v13  ;;  %vm1188_vm13 = vcmp.lt.s32.totalorder %v1168_v41, 2 }
 0x141   :  { %v1117_v51 = vsub.s32 0, %v4402_v59  ;;  %v1195_v30 = vsel %vm1187_vm11, %v1174_v2, %v1177_v39  ;;  %vm1189_vm0 = vcmp.lt.s32.totalorder %v1168_v41, 3  ;;  %v1196_v57 = vsel %vm1190_vm12, %v1183_v25, 920167782 }
 0x142   :  { %v1262_v12 = vand.u32 2139095040, %v4385_v13  ;;  %v1192_v62 = vsel %vm1190_vm12, %v1180_v3, 2102212464  ;;  %v1197_v18 = vsel %vm1189_vm0, %v1180_v3, %v1196_v57  ;;  %v1199_v17 = vsel %vm1187_vm11, %v1177_v39, %v1180_v3  ;;  %v120_v3 = vpop.permute.xlu1 %119 }
 0x143   :  { %v3157_v53 = vmin.u32 %v1117_v51, %v4402_v59  ;;  %v1026_v31 = vor.u32 4788187, %v1025_v19  ;;  %v1171_v6 = vshrl.u32 %v6223_v20, %v1170_v11  ;;  %v1198_v27 = vsel %vm1188_vm13, %v1195_v30, %v1197_v18 }
 0x144   :  { %v1200_v0 = vsel %vm1190_vm12, %v1186_v21, 1326507024  ;;  %v4414_v8 = vmul.u32.u64.low %v4380_v7, %v1198_v27  ;;  %v4415_v28 = vmul.u32.u64.high %v4380_v7, %v1198_v27, %v4414_v8  ;;  %v1193_v51 = vsel %vm1189_vm0, %v1177_v39, %v1192_v62 }
 0x145   :  { %v1119_v49 = vclz %v3157_v53  ;;  %v1201_v15 = vsel %vm1189_vm0, %v1183_v25, %v1200_v0  ;;  %v1191_v22 = vsel %vm1187_vm11, %v1171_v6, %v1174_v2  ;;  %v1263_v14 = vshrl.u32 %v1262_v12, 23 }
 0x146   :  { %v1202_v26 = vsel %vm1188_vm13, %v1199_v17, %v1201_v15  ;;  %v1266_v30 = vand.u32 8388607, %v6139_v16  ;;  %v916_v25 = vshll.u32 %v4215_v29, %v4314_v50  ;;  %v4430_v2 = vadd.f32 %v364_v23, %v4375_v56  ;;  %v229_v41 = vpop.permute.xlu1 %228 }
 0x147   :  { %v3158_v19 = vadd.s32 4294967294, %v1119_v49  ;;  %v4421_v11 = vmul.u32.u64.low %v4380_v7, %v1202_v26  ;;  %v4422_v38 = vmul.u32.u64.high %v4380_v7, %v1202_v26, %v4421_v11  ;;  %v3164_v57 = vadd.s32 4294967169, %v1263_v14 }
 0x148   :  { %v1022_v39 = vor.u32 %v1021_v58, %v1020_v37  ;;  %v1194_v12 = vsel %vm1188_vm13, %v1191_v22, %v1193_v51  ;;  %v1213_v53 = vadd.s32 1, %v4415_v28  ;;  %3456 = vcosq.f32 %v4370_v52 }
 0x149   :  { %vm3159_vm1 = vcmp.lt.s32.totalorder %v3158_v19, 0  ;;  %v6247_v62 = vshll.u32 %v4354_v60, 23  ;;  %v1269_v6 = vadd.s32 1, %v3164_v57  ;;  %v4442_v29 = vor.u32 %v4377_v55, %v916_v25 }
 0x14a   :  { %v4439_v17 = vsel %vm3159_vm1, 0, %v3158_v19  ;;  %v1027_v50 = vand.u32 2147483647, %v1026_v31  ;;  %v1267_v56 = vor.u32 8388608, %v1266_v30  ;;  %v1210_v58 = vmul.u32 %v4380_v7, %v1194_v12 }
 0x14b   :  { %v4437_v18 = vor.u32 4788187, %v6247_v62  ;;  %v1127_v23 = vsub.s32 4294967266, %v4439_v17  ;;  %vm1212_vm3 = vc.u32 %v4422_v38, %v4414_v8  ;;  %vm1270_vm4 = vcmp.gt.s32.totalorder %v1269_v6, 0 }
 0x14c   :  { %v4450_v60 = vadd.f32 %v3825_v45, %v4430_v2  ;;  %v1029_v37 = vcvt.s32.f32 %v1022_v39  ;;  %v1214_v55 = vsel %vm1212_vm3, %v1213_v53, %v4415_v28  ;;  %v1271_v0 = vsel %vm1270_vm4, %v1269_v6, 0 }
 0x14d   :  { %v1128_v27 = vadd.s32 127, %v1127_v23  ;;  %v1107_v49 = vadd.s32 %v4327_v61, %v4333_v48  ;;  %v1215_v7 = vadd.s32 %v1214_v55, %v1210_v58  ;;  %v1273_v15 = vand.u32 31, %v1271_v0 }
 0x14e   :  { %v4456_v22 = vmul.f32 %v1029_v37, %v1027_v50  ;;  %v4458_v51 = vshll.u32 %v1267_v56, 8  ;;  %v4461_v26 = vmul.f32 %v3803_v32, %v120_v3  ;;  %v4464_v14 = vmul.f32 %v3807_v33, %v229_v41 }
 0x14f   :  { %v1123_v28 = vsub.s32 32, %v4439_v17  ;;  %v1216_v19 = vadd.s32 536870912, %v1215_v7  ;;  %v1274_v11 = vsub.s32 32, %v1273_v15  ;;  %v1366_v30 = vand.u32 2139095040, %v4450_v60 }
 0x150   :  { %v1129_v25 = vshll.u32 %v1128_v27, 23  ;;  %v1272_v61 = vshrl.u32 %v1271_v0, 5  ;;  %v1276_v48 = vshll.u32 %v6223_v20, %v1273_v15  ;;  %v1279_v57 = vshll.u32 %v6224_v43, %v1273_v15 }
 0x151   :  { %v4470_v39 = vshrl.u32 %v1216_v19, 30  ;;  %v1277_v3 = vshrl.u32 %v6224_v43, %v1274_v11  ;;  %v1280_v12 = vshrl.u32 %v6225_v47, %v1274_v11  ;;  %v1282_v53 = vshll.u32 %v6225_v47, %v1273_v15 }
 0x152   :  { %v1283_v62 = vshrl.u32 %v6226_v44, %v1274_v11  ;;  %v1285_v6 = vshll.u32 %v6226_v44, %v1273_v15  ;;  %v1286_v50 = vshrl.u32 %v6227_v5, %v1274_v11  ;;  %v1288_v23 = vshll.u32 %v6227_v5, %v1273_v15  ;;  %v4479_v56 = vpop.eup %3456 }
 0x153   :  { %6248 = vst [vmem:[#allocation50_spill] sm:$0xff] %v4470_v39  ;;  %6249 = vst [vmem:[#allocation51_spill] sm:$0xff] %v4479_v56  ;;  %v1218_v58 = vshll.u32 %v4470_v39, 30  ;;  %v1278_v41 = vor.u32 %v1277_v3, %v1276_v48  ;;  %v1281_v37 = vor.u32 %v1280_v12, %v1279_v57  ;;  %v1289_v27 = vshrl.u32 %v6219_v1, %v1274_v11 }
 0x154   :  { %v1124_v55 = vshll.u32 %v4402_v59, %v4439_v17  ;;  %v1125_v0 = vshrl.u32 %v1107_v49, %v1123_v28  ;;  %v1284_v19 = vor.u32 %v1283_v62, %v1282_v53  ;;  %v1287_v16 = vor.u32 %v1286_v50, %v1285_v6 }
 0x155   :  { %v4485_v21 = vsub.s32 %v1215_v7, %v1218_v58  ;;  %v1290_v31 = vor.u32 %v1289_v27, %v1288_v23  ;;  %vm1291_vm5 = vcmp.lt.s32.totalorder %v1272_v61, 1  ;;  %v1367_v13 = vshrl.u32 %v1366_v30, 23 }
 0x156   :  { %v1130_v15 = vor.u32 4788187, %v1129_v25  ;;  %v1275_v56 = vshrl.u32 %v6223_v20, %v1274_v11  ;;  %vm1294_vm6 = vcmp.lt.s32.totalorder %v1272_v61, 4  ;;  %v1299_v48 = vsel %vm1291_vm5, %v1278_v41, %v1281_v37 }
 0x157   :  { %v1221_v57 = vsub.s32 0, %v4485_v21  ;;  %vm1293_vm8 = vcmp.lt.s32.totalorder %v1272_v61, 3  ;;  %v1296_v3 = vsel %vm1294_vm6, %v1284_v19, 2102212464  ;;  %v1300_v12 = vsel %vm1294_vm6, %v1287_v16, 920167782 }
 0x158   :  { %vm1292_vm9 = vcmp.lt.s32.totalorder %v1272_v61, 2  ;;  %v1301_v59 = vsel %vm1293_vm8, %v1284_v19, %v1300_v12  ;;  %v1303_v17 = vsel %vm1291_vm5, %v1281_v37, %v1284_v19  ;;  %v1304_v49 = vsel %vm1294_vm6, %v1290_v31, 1326507024  ;;  %v329_v12 = vpop.permute.xlu0 %328 }
 0x159   :  { %vm637_vm10 = vcmp.lt.s32.totalorder %v3850_v4, 0  ;;  %v1126_v7 = vor.u32 %v1125_v0, %v1124_v55  ;;  %v3161_v28 = vmin.u32 %v1221_v57, %v4485_v21  ;;  %v1295_v11 = vsel %vm1291_vm5, %v1275_v56, %v1278_v41 }
 0x15a   :  { %v1302_v30 = vsel %vm1292_vm9, %v1299_v48, %v1301_v59  ;;  %v1297_v25 = vsel %vm1293_vm8, %v1281_v37, %v1296_v3  ;;  %v1305_v53 = vsel %vm1293_vm8, %v1287_v16, %v1304_v49  ;;  %vm6169_vm11 = vcmp.lt.s32.totalorder %v4027_v63, 0 }
 0x15b   :  { %v4496_v62 = vmul.u32.u64.low %v4458_v51, %v1302_v30  ;;  %v4497_v6 = vmul.u32.u64.high %v4458_v51, %v1302_v30, %v4496_v62  ;;  %v1131_v50 = vand.u32 2147483647, %v1130_v15  ;;  %v1223_v31 = vclz %v3161_v28 }
 0x15c   :  { %v1306_v23 = vsel %vm1292_vm9, %v1303_v17, %v1305_v53  ;;  %v6143_v58 = vand.u32 2147483647, %v4450_v60  ;;  %v925_v27 = vcvt.s32.f32 %v4442_v29  ;;  %v3168_v16 = vadd.s32 4294967169, %v1367_v13 }
 0x15d   :  { %v4505_v56 = vmul.u32.u64.low %v4458_v51, %v1306_v23  ;;  %v4506_v41 = vmul.u32.u64.high %v4458_v51, %v1306_v23, %v4505_v56  ;;  %v1133_v37 = vcvt.s32.f32 %v1126_v7  ;;  %v3162_v55 = vadd.s32 4294967294, %v1223_v31 }
 0x15e   :  { %v1298_v0 = vsel %vm1292_vm9, %v1295_v11, %v1297_v25  ;;  %v181_v19 = vadd.f32 %v3811_v34, %v4461_v26  ;;  %v6250_v15 = vand.u32 2147483647, %v4437_v18  ;;  %v1031_v57 = vxor.u32 2147483648, %v4456_v22 }
 0x15f   :  { %v1317_v29 = vadd.s32 1, %v4497_v6  ;;  %v1373_v3 = vadd.s32 1, %v3168_v16  ;;  %v4517_v59 = vmul.f32 %v1133_v37, %v1131_v50  ;;  %vm3163_vm12 = vcmp.lt.s32.totalorder %v3162_v55, 0 }
 0x160   :  { %v4513_v48 = vmul.f32 %v925_v27, %v6250_v15  ;;  %v4521_v13 = vand.u32 8388607, %v6143_v58  ;;  %v281_v61 = vadd.f32 %v4464_v14, %v181_v19  ;;  %v1226_v26 = vsel %vm3163_vm12, 0, %v3162_v55 }
 0x161   :  { %v1314_v18 = vmul.u32 %v4458_v51, %v1298_v0  ;;  %vm1316_vm13 = vc.u32 %v4506_v41, %v4496_v62  ;;  %vm1374_vm0 = vcmp.gt.s32.totalorder %v1373_v3, 0  ;;  %v1227_v17 = vsub.s32 32, %v1226_v26 }
 0x162   :  { %v1231_v49 = vsub.s32 4294967266, %v1226_v26  ;;  %v1318_v7 = vsel %vm1316_vm13, %v1317_v29, %v4497_v6  ;;  %v365_v28 = vmul.f32 %v3815_v36, %v329_v12  ;;  %v6251_v11 = vxor.u32 2147483648, %v4363_v24 }
 0x163   :  { %3458 = vsinq.f32 %v4370_v52  ;;  %v1319_v51 = vadd.s32 %v1318_v7, %v1314_v18  ;;  %v1375_v14 = vsel %vm1374_vm0, %v1373_v3, 0  ;;  %v4539_v25 = vmul.f32 %v3877_v40, %v4242_v9 }
 0x164   :  { %v4534_v30 = vsel %vm637_vm10, %v6251_v11, %v4363_v24  ;;  %v1211_v53 = vadd.s32 %v4414_v8, %v4422_v38  ;;  %v1232_v6 = vadd.s32 127, %v1231_v49  ;;  %v1377_v50 = vand.u32 31, %v1375_v14 }
 0x165   :  { %6252 = vst [vmem:[#allocation52_spill] sm:$0xff] %v4539_v25  ;;  %v927_v31 = vxor.u32 2147483648, %v4513_v48  ;;  %v4547_v24 = vsel %vm6169_vm11, %v1031_v57, %v4456_v22  ;;  %v1135_v52 = vxor.u32 2147483648, %v4517_v59  ;;  %v1320_v23 = vadd.s32 536870912, %v1319_v51 }
 0x166   :  { %v1229_v27 = vshrl.u32 %v1211_v53, %v1227_v17  ;;  %v1371_v56 = vor.u32 8388608, %v4521_v13  ;;  %v1378_v9 = vsub.s32 32, %v1377_v50  ;;  %v4551_v16 = vadd.f32 %v365_v28, %v281_v61 }
 0x167   :  { %v1233_v37 = vshll.u32 %v1232_v6, 23  ;;  %v4553_v8 = vshrl.u32 %v1320_v23, 30  ;;  %v4555_v38 = vshrl.u32 %v1375_v14, 5  ;;  %v1380_v55 = vshll.u32 %v6223_v20, %v1377_v50 }
 0x168   :  { %v1381_v0 = vshrl.u32 %v6224_v43, %v1378_v9  ;;  %v1383_v22 = vshll.u32 %v6224_v43, %v1377_v50  ;;  %v1386_v19 = vshll.u32 %v6225_v47, %v1377_v50  ;;  %v1389_v15 = vshll.u32 %v6226_v44, %v1377_v50 }
 0x169   :  { %6253 = vst [vmem:[#allocation53_spill] sm:$0xff] %v4553_v8  ;;  %v1322_v57 = vshll.u32 %v4553_v8, 30  ;;  %v1384_v29 = vshrl.u32 %v6225_v47, %v1378_v9  ;;  %v1387_v3 = vshrl.u32 %v6226_v44, %v1378_v9  ;;  %v1390_v12 = vshrl.u32 %v6227_v5, %v1378_v9  ;;  %v337_v8 = vpop.permute.xlu0 %336 }
 0x16a   :  { %v1228_v13 = vshll.u32 %v4485_v21, %v1226_v26  ;;  %v1382_v61 = vor.u32 %v1381_v0, %v1380_v55  ;;  %v1392_v18 = vshll.u32 %v6227_v5, %v1377_v50  ;;  %v1393_v17 = vshrl.u32 %v6219_v1, %v1378_v9 }
 0x16b   :  { %v6254_v49 = vand.u32 2147483647, %v4027_v63  ;;  %v6255_v7 = vmov 0  ;;  %vm6168_vm3 = vcmp.lt.s32.totalorder %v4180_v10, 0  ;;  %v4576_v28 = vsub.s32 %v1319_v51, %v1322_v57  ;;  %v233_v51 = vpop.permute.xlu1 %232 }
 0x16c   :  { %v1385_v11 = vor.u32 %v1384_v29, %v1383_v22  ;;  %v1388_v14 = vor.u32 %v1387_v3, %v1386_v19  ;;  %v1391_v53 = vor.u32 %v1390_v12, %v1389_v15  ;;  %v1230_v6 = vor.u32 %v1229_v27, %v1228_v13 }
 0x16d   :  { %vm4571_vm1 = vcmp.le.f32.partialorder %v6254_v49, 0.7853982  ;;  %v1234_v21 = vor.u32 4788187, %v1233_v37  ;;  %v1394_v26 = vor.u32 %v1393_v17, %v1392_v18  ;;  %v4580_v50 = vadd.f32 %v3825_v45, %v4551_v16  ;;  %v4582_v23 = vpop.eup %3458 }
 0x16e   :  { %v6256_v7 = vsel %vm4571_vm1, 4294967295, %v6255_v7  ;;  %v1325_v55 = vsub.s32 0, %v4576_v28  ;;  %v1379_v0 = vshrl.u32 %v6223_v20, %v1378_v9  ;;  %vm1395_vm4 = vcmp.lt.s32.totalorder %v4555_v38, 1 }
 0x16f   :  { %6257 = vst [vmem:[#allocation54_spill] sm:$0xff] %v6256_v7  ;;  %6258 = vst [vmem:[#allocation55_spill] sm:$0xff] %v4580_v50  ;;  %vm1398_vm5 = vcmp.lt.s32.totalorder %v4555_v38, 4  ;;  %vm6184_vm6 = vcmp.lt.s32.totalorder %v4023_v42, 0  ;;  %vm1396_vm8 = vcmp.lt.s32.totalorder %v4555_v38, 2  ;;  %vm1397_vm9 = vcmp.lt.s32.totalorder %v4555_v38, 3 }
 0x170   :  { %v1403_v27 = vsel %vm1395_vm4, %v1382_v61, %v1385_v11  ;;  %v1404_v37 = vsel %vm1398_vm5, %v1391_v53, 920167782  ;;  %v3165_v22 = vmin.u32 %v1325_v55, %v4576_v28  ;;  %v1400_v19 = vsel %vm1398_vm5, %v1388_v14, 2102212464 }
 0x171   :  { %v1405_v9 = vsel %vm1397_vm9, %v1388_v14, %v1404_v37  ;;  %v1407_v15 = vsel %vm1395_vm4, %v1385_v11, %v1388_v14  ;;  %v6259_v57 = vand.u32 2147483647, %v4180_v10  ;;  %v6260_v29 = vmov 0 }
 0x172   :  { %v1406_v3 = vsel %vm1396_vm8, %v1403_v27, %v1405_v9  ;;  %v1408_v12 = vsel %vm1398_vm5, %v1394_v26, 1326507024  ;;  %v1411_v13 = vshll.u32 %v1371_v56, 8  ;;  %v1470_v18 = vand.u32 2139095040, %v4580_v50  ;;  %v333_v9 = vpop.permute.xlu1 %332 }
 0x173   :  { %vm4600_vm12 = vcmp.le.f32.partialorder %v6259_v57, 0.7853982  ;;  %v1235_v17 = vand.u32 2147483647, %v1234_v21  ;;  %v1327_v49 = vclz %v3165_v22  ;;  %v1399_v55 = vsel %vm1395_vm4, %v1379_v0, %v1382_v61 }
 0x174   :  { %v6261_v29 = vsel %vm4600_vm12, 4294967295, %v6260_v29  ;;  %v1409_v14 = vsel %vm1397_vm9, %v1391_v53, %v1408_v12  ;;  %v1401_v37 = vsel %vm1397_vm9, %v1385_v11, %v1400_v19  ;;  %v1237_v56 = vcvt.s32.f32 %v1230_v6 }
 0x175   :  { %6262 = vst [vmem:[#allocation56_spill] sm:$0xff] %v6261_v29  ;;  %v1410_v57 = vsel %vm1396_vm8, %v1407_v15, %v1409_v14  ;;  %v4615_v58 = vmul.u32.u64.low %v1411_v13, %v1406_v3  ;;  %v4616_v27 = vmul.u32.u64.high %v1411_v13, %v1406_v3, %v4615_v58  ;;  %v3166_v26 = vadd.s32 4294967294, %v1327_v49 }
 0x176   :  { %v4619_v21 = vmul.u32.u64.low %v1411_v13, %v1410_v57  ;;  %v4620_v22 = vmul.u32.u64.high %v1411_v13, %v1410_v57, %v4619_v21  ;;  %v1035_v61 = vsel %vm4571_vm1, %v4027_v63, %v4547_v24  ;;  %v1136_v11 = vsel %vm6168_vm3, %v1135_v52, %v4517_v59  ;;  %v6279_v63 = vld [vmem:[#allocation30_spill] sm:$0xff] }
 0x177   :  { %v1471_v53 = vshrl.u32 %v1470_v18, 23  ;;  %v266_v0 = vmul.f32 %v3807_v33, %v233_v51  ;;  %v1238_v6 = vmul.f32 %v1237_v56, %v1235_v17  ;;  %vm3167_vm13 = vcmp.lt.s32.totalorder %v3166_v26, 0 }
 0x178   :  { %v1402_v19 = vsel %vm1396_vm8, %v1399_v55, %v1401_v37  ;;  %v6144_v15 = vand.u32 2147483647, %v4580_v50  ;;  %v1330_v3 = vsel %vm3167_vm13, 0, %v3166_v26  ;;  %v1421_v12 = vadd.s32 1, %v4616_v27 }
 0x179   :  { %v3172_v24 = vadd.s32 4294967169, %v1471_v53  ;;  %v366_v49 = vmul.f32 %v3815_v36, %v333_v9  ;;  %v4642_v59 = vsel %vm6184_vm6, %v927_v31, %v4513_v48  ;;  %3460 = vcosq.f32 %v1035_v61 }
 0x17a   :  { %vm6167_vm0 = vcmp.lt.s32.totalorder %v4263_v46, 0  ;;  %v1335_v52 = vsub.s32 4294967266, %v1330_v3  ;;  %v1418_v38 = vmul.u32 %v1411_v13, %v1402_v19  ;;  %vm1420_vm4 = vc.u32 %v4620_v22, %v4615_v58 }
 0x17b   :  { %v1477_v51 = vadd.s32 1, %v3172_v24  ;;  %v282_v18 = vadd.f32 %v266_v0, %v4270_v35  ;;  %v4651_v17 = vsel %vm4600_vm12, %v4180_v10, %v1136_v11  ;;  %v1239_v55 = vxor.u32 2147483648, %v1238_v6 }
 0x17c   :  { %v1422_v48 = vsel %vm1420_vm4, %v1421_v12, %v4616_v27  ;;  %v1474_v31 = vand.u32 8388607, %v6144_v15  ;;  %v1331_v14 = vsub.s32 32, %v1330_v3  ;;  %3462 = vsinq.f32 %v1035_v61 }
 0x17d   :  { %v1423_v37 = vadd.s32 %v1422_v48, %v1418_v38  ;;  %vm1478_vm5 = vcmp.gt.s32.totalorder %v1477_v51, 0  ;;  %v4656_v13 = vadd.f32 %v366_v49, %v282_v18  ;;  %v4660_v35 = vmul.f32 %v3877_v40, %v4361_v54 }
 0x17e   :  { %v1336_v57 = vadd.s32 127, %v1335_v52  ;;  %v1479_v56 = vsel %vm1478_vm5, %v1477_v51, 0  ;;  %v1315_v26 = vadd.s32 %v4496_v62, %v4506_v41  ;;  %v4666_v27 = vmul.f32 %v3877_v40, %v4430_v2 }
 0x17f   :  { %6263 = vst [vmem:[#allocation57_spill] sm:$0xff] %v4656_v13  ;;  %6264 = vst [vmem:[#allocation58_spill] sm:$0xff] %v4660_v35  ;;  %v1424_v21 = vadd.s32 536870912, %v1423_v37  ;;  %v1481_v9 = vand.u32 31, %v1479_v56  ;;  %3464 = vcosq.f32 %v4651_v17  ;;  %v4671_v61 = vsel %vm6167_vm0, %v1239_v55, %v1238_v6 }
 0x180   :  { %6265 = vst [vmem:[#allocation59_spill] sm:$0xff] %v4666_v27  ;;  %v1332_v54 = vshll.u32 %v4576_v28, %v1330_v3  ;;  %v1475_v11 = vor.u32 8388608, %v1474_v31  ;;  %v1333_v53 = vshrl.u32 %v1315_v26, %v1331_v14  ;;  %v4678_v62 = vadd.f32 %v3825_v45, %v4656_v13 }
 0x181   :  { %v4674_v0 = vshrl.u32 %v1424_v21, 30  ;;  %v1482_v19 = vsub.s32 32, %v1481_v9  ;;  %v1337_v2 = vshll.u32 %v1336_v57, 23  ;;  %v1480_v41 = vshrl.u32 %v1479_v56, 5 }
 0x182   :  { %v1484_v12 = vshll.u32 %v6223_v20, %v1481_v9  ;;  %v1487_v24 = vshll.u32 %v6224_v43, %v1481_v9  ;;  %v1490_v3 = vshll.u32 %v6225_v47, %v1481_v9  ;;  %v1493_v51 = vshll.u32 %v6226_v44, %v1481_v9 }
 0x183   :  { %6266 = vst [vmem:[#allocation60_spill] sm:$0xff] %v4674_v0  ;;  %v1426_v6 = vshll.u32 %v4674_v0, 30  ;;  %v1485_v49 = vshrl.u32 %v6224_v43, %v1482_v19  ;;  %v1488_v28 = vshrl.u32 %v6225_v47, %v1482_v19  ;;  %v4686_v52 = vpop.eup %3460  ;;  %v1491_v38 = vshrl.u32 %v6226_v44, %v1482_v19 }
 0x184   :  { %6267 = vst [vmem:[#allocation61_spill] sm:$0xff] %v4686_v52  ;;  %v1494_v18 = vshrl.u32 %v6227_v5, %v1482_v19  ;;  %v1497_v55 = vshrl.u32 %v6219_v1, %v1482_v19  ;;  %v1496_v57 = vshll.u32 %v6227_v5, %v1481_v9  ;;  %v1334_v56 = vor.u32 %v1333_v53, %v1332_v54 }
 0x185   :  { %v4692_v48 = vsub.s32 %v1423_v37, %v1426_v6  ;;  %v1486_v31 = vor.u32 %v1485_v49, %v1484_v12  ;;  %v1489_v14 = vor.u32 %v1488_v28, %v1487_v24  ;;  %v1492_v26 = vor.u32 %v1491_v38, %v1490_v3 }
 0x186   :  { %v1495_v21 = vor.u32 %v1494_v18, %v1493_v51  ;;  %v1515_v15 = vshll.u32 %v1475_v11, 8  ;;  %v6268_v13 = vand.u32 2147483647, %v4263_v46  ;;  %v6269_v27 = vmov 0  ;;  %v4702_v37 = vpop.eup %3462  ;;  %v130_v51 = vpop.permute.xlu1 %129 }
 0x187   :  { %v1338_v35 = vor.u32 4788187, %v1337_v2  ;;  %v1429_v25 = vsub.s32 0, %v4692_v48  ;;  %v1498_v0 = vor.u32 %v1497_v55, %v1496_v57  ;;  %vm1499_vm9 = vcmp.lt.s32.totalorder %v1480_v41, 1  ;;  %6272 = vst [vmem:[#allocation63_spill] sm:$0xff] %v4702_v37 }
 0x188   :  { %vm4697_vm8 = vcmp.le.f32.partialorder %v6268_v13, 0.7853982  ;;  %v1483_v12 = vshrl.u32 %v6223_v20, %v1482_v19  ;;  %vm1502_vm13 = vcmp.lt.s32.totalorder %v1480_v41, 4  ;;  %v1507_v9 = vsel %vm1499_vm9, %v1486_v31, %v1489_v14 }
 0x189   :  { %v6270_v27 = vsel %vm4697_vm8, 4294967295, %v6269_v27  ;;  %v1574_v54 = vand.u32 2139095040, %v4678_v62  ;;  %v3169_v11 = vmin.u32 %v1429_v25, %v4692_v48  ;;  %vm1501_vm4 = vcmp.lt.s32.totalorder %v1480_v41, 3  ;;  %v4708_v24 = vpop.eup %3464 }
 0x18a   :  { %6271 = vst [vmem:[#allocation62_spill] sm:$0xff] %v6270_v27  ;;  %v1504_v13 = vsel %vm1502_vm13, %v1492_v26, 2102212464  ;;  %v1508_v53 = vsel %vm1502_vm13, %v1495_v21, 920167782  ;;  %6273 = vst [vmem:[#allocation64_spill] sm:$0xff] %v4708_v24  ;;  %v1511_v6 = vsel %vm1499_vm9, %v1489_v14, %v1492_v26  ;;  %v1503_v19 = vsel %vm1499_vm9, %v1483_v12, %v1486_v31 }
 0x18b   :  { %vm1500_vm5 = vcmp.lt.s32.totalorder %v1480_v41, 2  ;;  %v1509_v2 = vsel %vm1501_vm4, %v1492_v26, %v1508_v53  ;;  %v1431_v28 = vclz %v3169_v11  ;;  %v1512_v38 = vsel %vm1502_vm13, %v1498_v0, 1326507024 }
 0x18c   :  { %v1510_v3 = vsel %vm1500_vm5, %v1507_v9, %v1509_v2  ;;  %v1505_v18 = vsel %vm1501_vm4, %v1489_v14, %v1504_v13  ;;  %v1513_v25 = vsel %vm1501_vm4, %v1495_v21, %v1512_v38  ;;  %v1339_v39 = vand.u32 2147483647, %v1338_v35 }
 0x18d   :  { %v4714_v55 = vmul.u32.u64.low %v1515_v15, %v1510_v3  ;;  %v4715_v57 = vmul.u32.u64.high %v1515_v15, %v1510_v3, %v4714_v55  ;;  %v3170_v24 = vadd.s32 4294967294, %v1431_v28  ;;  %v1514_v53 = vsel %vm1500_vm5, %v1511_v6, %v1513_v25 }
 0x18e   :  { %v1575_v26 = vshrl.u32 %v1574_v54, 23  ;;  %3466 = vsinq.f32 %v4651_v17  ;;  %v4719_v11 = vmul.u32.u64.low %v1515_v15, %v1514_v53  ;;  %v4720_v49 = vmul.u32.u64.high %v1515_v15, %v1514_v53, %v4719_v11 }
 0x18f   :  { %v4723_v31 = vmul.f32 %v3803_v32, %v130_v51  ;;  %v1341_v0 = vcvt.s32.f32 %v1334_v56  ;;  %v1506_v14 = vsel %vm1500_vm5, %v1503_v19, %v1505_v18  ;;  %v4727_v12 = vmul.f32 %v3815_v36, %v337_v8  ;;  %v6275_v56 = vld [vmem:[#allocation23_spill] sm:$0xff] }
 0x190   :  { %v3176_v21 = vadd.s32 4294967169, %v1575_v26  ;;  %v4733_v35 = vsel %vm4697_vm8, %v4263_v46, %v4671_v61  ;;  %vm3171_vm9 = vcmp.lt.s32.totalorder %v3170_v24, 0  ;;  %v1525_v17 = vadd.s32 1, %v4715_v57  ;;  %v6276_v61 = vld [vmem:[#allocation20_spill] sm:$0xff] }
 0x191   :  { %v6274_v9 = vand.u32 2147483647, %v4678_v62  ;;  %v4738_v13 = vmul.f32 %v1341_v0, %v1339_v39  ;;  %v4742_v2 = vshrl.u32 %v6223_v20, %v6275_v56  ;;  %v445_v8 = vshrl.u32 %v6224_v43, %v6275_v56 }
 0x192   :  { %v1581_v41 = vadd.s32 1, %v3176_v21  ;;  %v1522_v6 = vmul.u32 %v1515_v15, %v1506_v14  ;;  %vm1524_vm13 = vc.u32 %v4720_v49, %v4714_v55  ;;  %v444_v28 = vshll.u32 %v6223_v20, %v6276_v61 }
 0x193   :  { %v1578_v54 = vand.u32 8388607, %v6274_v9  ;;  %v448_v19 = vshrl.u32 %v6225_v47, %v6275_v56  ;;  %v1419_v39 = vadd.s32 %v4615_v58, %v4620_v22  ;;  %v4753_v3 = vsel %vm3171_vm9, 0, %v3170_v24 }
 0x194   :  { %v1526_v38 = vsel %vm1524_vm13, %v1525_v17, %v4715_v57  ;;  %vm1582_vm4 = vcmp.gt.s32.totalorder %v1581_v41, 0  ;;  %v447_v15 = vshll.u32 %v6224_v43, %v6276_v61  ;;  %v4759_v11 = vor.u32 %v445_v8, %v444_v28 }
 0x195   :  { %v1527_v51 = vadd.s32 %v1526_v38, %v1522_v6  ;;  %v1579_v18 = vor.u32 8388608, %v1578_v54  ;;  %v1583_v25 = vsel %vm1582_vm4, %v1581_v41, 0  ;;  %v450_v0 = vshll.u32 %v6225_v47, %v6276_v61 }
 0x196   :  { %v1585_v26 = vand.u32 31, %v1583_v25  ;;  %v1435_v58 = vsub.s32 32, %v4753_v3  ;;  %v4764_v24 = vor.u32 %v448_v19, %v447_v15  ;;  %v451_v57 = vshrl.u32 %v6226_v44, %v6275_v56 }
 0x197   :  { %v1528_v22 = vadd.s32 536870912, %v1527_v51  ;;  %v1439_v21 = vsub.s32 4294967266, %v4753_v3  ;;  %v4772_v17 = vadd.s32 %v4714_v55, %v4720_v49  ;;  %v1584_v8 = vshrl.u32 %v1583_v25, 5 }
 0x198   :  { %v1586_v9 = vsub.s32 32, %v1585_v26  ;;  %v4774_v54 = vpop.eup %3466  ;;  %v1588_v6 = vshll.u32 %v6223_v20, %v1585_v26  ;;  %v4779_v61 = vshll.u32 %v1579_v18, 8  ;;  %v1591_v28 = vshll.u32 %v6224_v43, %v1585_v26 }
 0x199   :  { %6277 = vst [vmem:[#allocation23_spill] sm:$0xff] %v4774_v54  ;;  %v4776_v41 = vshrl.u32 %v1528_v22, 30  ;;  %v1594_v38 = vshll.u32 %v6225_v47, %v1585_v26  ;;  %v1597_v15 = vshll.u32 %v6226_v44, %v1585_v26  ;;  %v1600_v18 = vshll.u32 %v6227_v5, %v1585_v26 }
 0x19a   :  { %v1589_v56 = vshrl.u32 %v6224_v43, %v1586_v9  ;;  %v1592_v19 = vshrl.u32 %v6225_v47, %v1586_v9  ;;  %v1595_v55 = vshrl.u32 %v6226_v44, %v1586_v9  ;;  %v1598_v25 = vshrl.u32 %v6227_v5, %v1586_v9 }
 0x19b   :  { %6278 = vst [vmem:[#allocation20_spill] sm:$0xff] %v4776_v41  ;;  %v1530_v49 = vshll.u32 %v4776_v41, 30  ;;  %v1601_v53 = vshrl.u32 %v6219_v1, %v1586_v9  ;;  %v452_v29 = vor.u32 %v451_v57, %v450_v0  ;;  %v1437_v10 = vshrl.u32 %v1419_v39, %v1435_v58 }
 0x19c   :  { %v1590_v22 = vor.u32 %v1589_v56, %v1588_v6  ;;  %v1593_v14 = vor.u32 %v1592_v19, %v1591_v28  ;;  %v1596_v46 = vor.u32 %v1595_v55, %v1594_v38  ;;  %v1599_v54 = vor.u32 %v1598_v25, %v1597_v15 }
 0x19d   :  { %v4791_v27 = vsub.s32 %v1527_v51, %v1530_v49  ;;  %v1440_v52 = vadd.s32 127, %v1439_v21  ;;  %v1602_v41 = vor.u32 %v1601_v53, %v1600_v18  ;;  %vm1603_vm5 = vcmp.lt.s32.totalorder %v1584_v8, 1  ;;  %v6280_v49 = vld [vmem:[#allocation48_spill] sm:$0xff] }
 0x19e   :  { %vm1606_vm9 = vcmp.lt.s32.totalorder %v1584_v8, 4  ;;  %v1611_v7 = vsel %vm1603_vm5, %v1590_v22, %v1593_v14  ;;  %vm459_vm13 = vcmp.lt.s32.totalorder %v6279_v63, 1  ;;  %v1587_v6 = vshrl.u32 %v6223_v20, %v1586_v9 }
 0x19f   :  { %v1533_v37 = vsub.s32 0, %v4791_v27  ;;  %vm1605_vm4 = vcmp.lt.s32.totalorder %v1584_v8, 3  ;;  %v1608_v26 = vsel %vm1606_vm9, %v1596_v46, 2102212464  ;;  %v1612_v56 = vsel %vm1606_vm9, %v1599_v54, 920167782 }
 0x1a0   :  { %vm1604_vm0 = vcmp.lt.s32.totalorder %v1584_v8, 2  ;;  %v1613_v28 = vsel %vm1605_vm4, %v1596_v46, %v1612_v56  ;;  %v1615_v0 = vsel %vm1603_vm5, %v1593_v14, %v1596_v46  ;;  %v1607_v39 = vsel %vm1603_vm5, %v1587_v6, %v1590_v22  ;;  %v6282_v22 = vld [vmem:[#allocation37_spill] sm:$0xff]  ;;  %v6283_v8 = vld [vmem:[#allocation32_spill] sm:$0xff] }
 0x1a1   :  { %v3173_v51 = vmin.u32 %v1533_v37, %v4791_v27  ;;  %v1609_v58 = vsel %vm1605_vm4, %v1593_v14, %v1608_v26  ;;  %v1614_v53 = vsel %vm1604_vm0, %v1611_v7, %v1613_v28  ;;  %v1616_v57 = vsel %vm1606_vm9, %v1602_v41, 1326507024  ;;  %v6281_v41 = vld [vmem:[#allocation36_spill] sm:$0xff] }
 0x1a2   :  { %v1441_v21 = vshll.u32 %v1440_v52, 23  ;;  %v1617_v38 = vsel %vm1605_vm4, %v1599_v54, %v1616_v57  ;;  %vm460_vm3 = vcmp.lt.s32.totalorder %v6279_v63, 2  ;;  %vm6170_vm11 = vcmp.lt.s32.totalorder %v6280_v49, 0 }
 0x1a3   :  { %v1535_v19 = vclz %v3173_v51  ;;  %v1618_v9 = vsel %vm1604_vm0, %v1615_v0, %v1617_v38  ;;  %v4802_v55 = vmul.u32.u64.low %v4779_v61, %v1614_v53  ;;  %v4803_v37 = vmul.u32.u64.high %v4779_v61, %v1614_v53, %v4802_v55 }
 0x1a4   :  { %vm461_vm5 = vcmp.lt.s32.totalorder %v6279_v63, 3  ;;  %v1610_v7 = vsel %vm1604_vm0, %v1607_v39, %v1609_v58  ;;  %v4809_v52 = vmul.u32.u64.low %v4779_v61, %v1618_v9  ;;  %v4810_v14 = vmul.u32.u64.high %v4779_v61, %v1618_v9, %v4809_v52  ;;  %v6284_v39 = vld [vmem:[#allocation24_spill] sm:$0xff] }
 0x1a5   :  { %v3174_v46 = vadd.s32 4294967294, %v1535_v19  ;;  %v467_v54 = vsel %vm459_vm13, %v4759_v11, %v4764_v24  ;;  %v469_v15 = vsel %vm461_vm5, %v452_v29, %v6281_v41  ;;  %v471_v25 = vsel %vm459_vm13, %v4764_v24, %v452_v29 }
 0x1a6   :  { %v473_v18 = vsel %vm461_vm5, %v6283_v8, %v6282_v22  ;;  %v463_v6 = vsel %vm459_vm13, %v4742_v2, %v4759_v11  ;;  %v464_v26 = vsel %vm462_vm14, %v452_v29, 2102212464  ;;  %v1442_v51 = vor.u32 4788187, %v1441_v21  ;;  %v6286_v21 = vld [vmem:[#allocation17_spill] sm:$0xff] }
 0x1a7   :  { %vm3175_vm0 = vcmp.lt.s32.totalorder %v3174_v46, 0  ;;  %v474_v56 = vsel %vm460_vm3, %v471_v25, %v473_v18  ;;  %v1629_v0 = vadd.s32 1, %v4803_v37  ;;  %v6285_v58 = vor.u32 8388608, %v6284_v39  ;;  %v6289_v39 = vld [vmem:[#allocation22_spill] sm:$0xff] }
 0x1a8   :  { %v1538_v28 = vsel %vm3175_vm0, 0, %v3174_v46  ;;  %v1626_v38 = vmul.u32 %v4779_v61, %v1610_v7  ;;  %v470_v2 = vsel %vm460_vm3, %v467_v54, %v469_v15  ;;  %vm1628_vm14 = vc.u32 %v4810_v14, %v4802_v55 }
 0x1a9   :  { %v475_v53 = vshll.u32 %v6285_v58, 8  ;;  %v1539_v57 = vsub.s32 32, %v1538_v28  ;;  %v1543_v19 = vsub.s32 4294967266, %v1538_v28  ;;  %v6171_v9 = vand.u32 2147483647, %v6286_v21  ;;  %v6290_v58 = vld [vmem:[#allocation27_spill] sm:$0xff] }
 0x1aa   :  { %v1630_v41 = vsel %vm1628_vm14, %v1629_v0, %v4803_v37  ;;  %v465_v61 = vsel %vm461_vm5, %v4764_v24, %v464_v26  ;;  %v1540_v7 = vshll.u32 %v4791_v27, %v1538_v28  ;;  %v6287_v22 = vxor.u32 2147483648, %v4738_v13 }
 0x1ab   :  { %v4842_v29 = vmul.u32.u64.low %v475_v53, %v474_v56  ;;  %v4843_v11 = vmul.u32.u64.high %v475_v53, %v474_v56, %v4842_v29  ;;  %v1541_v46 = vshrl.u32 %v4772_v17, %v1539_v57  ;;  %v1544_v52 = vadd.s32 127, %v1543_v19 }
 0x1ac   :  { %v1631_v54 = vadd.s32 %v1630_v41, %v1626_v38  ;;  %v4852_v15 = vmul.u32.u64.low %v475_v53, %v470_v2  ;;  %v4853_v25 = vmul.u32.u64.high %v475_v53, %v470_v2, %v4852_v15  ;;  %v1344_v17 = vsel %vm6170_vm11, %v6287_v22, %v4738_v13 }
 0x1ad   :  { %v6288_v37 = vshll.u32 %v4692_v48, %v4753_v3  ;;  %v1443_v18 = vand.u32 2147483647, %v1442_v51  ;;  %v1545_v56 = vshll.u32 %v1544_v52, 23  ;;  %v1542_v24 = vor.u32 %v1541_v46, %v1540_v7 }
 0x1ae   :  { %v1632_v26 = vadd.s32 536870912, %v1631_v54  ;;  %v466_v27 = vsel %vm460_vm3, %v463_v6, %v465_v61  ;;  %v538_v28 = vand.u32 8388607, %v6171_v9  ;;  %vm484_vm9 = vc.u32 %v4843_v11, %v4852_v15 }
 0x1af   :  { %v1438_v8 = vor.u32 %v1437_v10, %v6288_v37  ;;  %v1546_v0 = vor.u32 4788187, %v1545_v56  ;;  %v548_v13 = vshll.u32 %v6223_v20, %v6289_v39  ;;  %v549_v10 = vshrl.u32 %v6224_v43, %v6290_v58 }
 0x1b0   :  { %v6291_v48 = vand.u32 2147483647, %v6280_v49  ;;  %v4880_v63 = vshrl.u32 %v1632_v26, 30  ;;  %v485_v6 = vadd.s32 1, %v4853_v25  ;;  %v551_v51 = vshll.u32 %v6224_v43, %v6289_v39 }
 0x1b1   :  { %v552_v57 = vshrl.u32 %v6225_v47, %v6290_v58  ;;  %v482_v19 = vmul.u32 %v475_v53, %v466_v27  ;;  %v550_v38 = vor.u32 %v549_v10, %v548_v13  ;;  %v554_v2 = vshll.u32 %v6225_v47, %v6289_v39  ;;  %v6295_v27 = vld [vmem:[#allocation33_spill] sm:$0xff] }
 0x1b2   :  { %vm4876_vm13 = vcmp.le.f32.partialorder %v6291_v48, 0.7853982  ;;  %6294 = vst [vmem:[#allocation30_spill] sm:$0xff] %v4880_v63  ;;  %v555_v29 = vshrl.u32 %v6226_v44, %v6290_v58  ;;  %v1547_v46 = vand.u32 2147483647, %v1546_v0  ;;  %v1634_v52 = vshll.u32 %v4880_v63, 30 }
 0x1b3   :  { %v486_v41 = vsel %vm484_vm9, %v485_v6, %v4853_v25  ;;  %v553_v61 = vor.u32 %v552_v57, %v551_v51  ;;  %v1445_v7 = vcvt.s32.f32 %v1438_v8  ;;  %v1549_v22 = vcvt.s32.f32 %v1542_v24  ;;  %v6296_v25 = vld [vmem:[#allocation38_spill] sm:$0xff]  ;;  %v6300_v57 = vld [vmem:[#allocation41_spill] sm:$0xff] }
 0x1b4   :  { %v487_v37 = vadd.s32 %v486_v41, %v482_v19  ;;  %v556_v56 = vor.u32 %v555_v29, %v554_v2  ;;  %vm6183_vm3 = vcmp.lt.s32.totalorder %v4450_v60, 0  ;;  %v4894_v53 = vsub.s32 %v1631_v54, %v1634_v52  ;;  %v6301_v19 = vld [vmem:[#allocation35_spill] sm:$0xff] }
 0x1b5   :  { %v539_v26 = vor.u32 8388608, %v538_v28  ;;  %vm563_vm4 = vcmp.lt.s32.totalorder %v6295_v27, 1  ;;  %vm565_vm5 = vcmp.lt.s32.totalorder %v6295_v27, 3  ;;  %v1446_v39 = vmul.f32 %v1445_v7, %v1443_v18 }
 0x1b6   :  { %v488_v0 = vadd.s32 536870912, %v487_v37  ;;  %v571_v13 = vsel %vm563_vm4, %v550_v38, %v553_v61  ;;  %v573_v8 = vsel %vm565_vm5, %v556_v56, %v6296_v25  ;;  %v1550_v24 = vmul.f32 %v1549_v22, %v1547_v46  ;;  %v6302_v22 = vld [vmem:[#allocation16_spill] sm:$0xff] }
 0x1b7   :  { %v1637_v10 = vsub.s32 0, %v4894_v53  ;;  %v547_v54 = vshrl.u32 %v6223_v20, %v6290_v58  ;;  %v575_v28 = vsel %vm563_vm4, %v553_v61, %v556_v56  ;;  %v6297_v48 = vand.u32 2147483647, %v4450_v60 }
 0x1b8   :  { %v489_v6 = vshrl.u32 %v488_v0, 30  ;;  %vm564_vm14 = vcmp.lt.s32.totalorder %v6295_v27, 2  ;;  %v568_v51 = vsel %vm566_vm15, %v556_v56, 2102212464  ;;  %v577_v58 = vsel %vm565_vm5, %v6301_v19, %v6300_v57 }
 0x1b9   :  { %vm4910_vm0 = vcmp.le.f32.partialorder %v6297_v48, 0.7853982  ;;  %v3177_v2 = vmin.u32 %v1637_v10, %v4894_v53  ;;  %v574_v29 = vsel %vm564_vm14, %v571_v13, %v573_v8  ;;  %v578_v46 = vsel %vm564_vm14, %v575_v28, %v577_v58  ;;  %v237_v8 = vpop.permute.xlu1 %236 }
 0x1ba   :  { %v579_v52 = vshll.u32 %v539_v26, 8  ;;  %3468 = vcosq.f32 %v4733_v35  ;;  %v1347_v41 = vsel %vm4876_vm13, %v6280_v49, %v1344_v17  ;;  %v1447_v7 = vxor.u32 2147483648, %v1446_v39 }
 0x1bb   :  { %vm429_vm15 = vcmp.lt.s32.totalorder %v6302_v22, 0  ;;  %v490_v56 = vshll.u32 %v489_v6, 30  ;;  %v1639_v0 = vclz %v3177_v2  ;;  %v567_v25 = vsel %vm563_vm4, %v547_v54, %v550_v38 }
 0x1bc   :  { %v4933_v10 = vmul.u32.u64.low %v579_v52, %v578_v46  ;;  %v4934_v13 = vmul.u32.u64.high %v579_v52, %v578_v46, %v4933_v10  ;;  %v569_v26 = vsel %vm565_vm5, %v553_v61, %v568_v51  ;;  %3470 = vsinq.f32 %v4733_v35 }
 0x1bd   :  { %v4936_v28 = vsub.s32 %v487_v37, %v490_v56  ;;  %v4940_v48 = vmul.u32.u64.low %v579_v52, %v574_v29  ;;  %v4941_v57 = vmul.u32.u64.high %v579_v52, %v574_v29, %v4940_v48  ;;  %vm6173_vm9 = vcmp.lt.s32.totalorder %v4580_v50, 0 }
 0x1be   :  { %v1551_v17 = vxor.u32 2147483648, %v1550_v24  ;;  %v3178_v19 = vadd.s32 4294967294, %v1639_v0  ;;  %v6303_v38 = vand.u32 2147483647, %v6302_v22  ;;  %v1448_v37 = vsel %vm6183_vm3, %v1447_v7, %v1446_v39 }
 0x1bf   :  { %v183_v61 = vadd.f32 %v3811_v34, %v4723_v31  ;;  %v493_v51 = vsub.s32 0, %v4936_v28  ;;  %v267_v35 = vmul.f32 %v3807_v33, %v237_v8  ;;  %3472 = vcosq.f32 %v1347_v41 }
 0x1c0   :  { %vm4948_vm4 = vcmp.le.f32.partialorder %v6303_v38, 0.7853982  ;;  %vm3179_vm5 = vcmp.lt.s32.totalorder %v3178_v19, 0  ;;  %v513_v58 = vsub.s32 4, %v489_v6  ;;  %v570_v2 = vsel %vm564_vm14, %v567_v25, %v569_v26 }
 0x1c1   :  { %v1642_v29 = vsel %vm3179_vm5, 0, %v3178_v19  ;;  %v3133_v46 = vmin.u32 %v493_v51, %v4936_v28  ;;  %vm588_vm11 = vc.u32 %v4934_v13, %v4940_v48  ;;  %v589_v39 = vadd.s32 1, %v4941_v57 }
 0x1c2   :  { %v1451_v31 = vsel %vm4910_vm0, %v4450_v60, %v1448_v37  ;;  %v1552_v7 = vsel %vm6173_vm9, %v1551_v17, %v1550_v24  ;;  %v1647_v56 = vsub.s32 4294967266, %v1642_v29  ;;  %v283_v0 = vadd.f32 %v267_v35, %v183_v61 }
 0x1c3   :  { %3474 = vsinq.f32 %v1347_v41  ;;  %v6306_v27 = vand.u32 2147483647, %v4580_v50  ;;  %v6307_v25 = vmov 0  ;;  %v495_v10 = vclz %v3133_v46 }
 0x1c4   :  { %v586_v8 = vmul.u32 %v579_v52, %v570_v2  ;;  %v1648_v26 = vadd.s32 127, %v1647_v56  ;;  %v514_v19 = vsel %vm429_vm15, %v513_v58, %v489_v6  ;;  %v590_v38 = vsel %vm588_vm11, %v589_v39, %v4941_v57  ;;  %v4981_v24 = vpop.eup %3468  ;;  %v6312_v56 = vld [vmem:[#allocation11_spill] sm:$0xff] }
 0x1c5   :  { %vm4971_vm14 = vcmp.le.f32.partialorder %v6306_v27, 0.7853982  ;;  %v4979_v37 = vadd.f32 %v4727_v12, %v283_v0  ;;  %3476 = vcosq.f32 %v1451_v31  ;;  %v3134_v17 = vadd.s32 4294967294, %v495_v10 }
 0x1c6   :  { %v6308_v25 = vsel %vm4971_vm14, 4294967295, %v6307_v25  ;;  %v4986_v41 = vsel %vm4971_vm14, %v4580_v50, %v1552_v7  ;;  %v591_v61 = vadd.s32 %v590_v38, %v586_v8  ;;  %3478 = vsinq.f32 %v1451_v31  ;;  %v5000_v58 = vpop.eup %3470 }
 0x1c7   :  { %6309 = vst [vmem:[#allocation48_spill] sm:$0xff] %v6308_v25  ;;  %6310 = vst [vmem:[#allocation36_spill] sm:$0xff] %v4979_v37  ;;  %v4990_v52 = vmul.f32 %v3877_v40, %v4551_v16  ;;  %v1643_v6 = vsub.s32 32, %v1642_v29  ;;  %v4994_v12 = vadd.f32 %v3825_v45, %v4979_v37  ;;  %v1627_v57 = vadd.s32 %v4802_v55, %v4810_v14 }
 0x1c8   :  { %vm3135_vm11 = vcmp.lt.s32.totalorder %v3134_v17, 0  ;;  %v516_v51 = vsel %vm4948_vm4, 0, %v514_v19  ;;  %v592_v35 = vadd.s32 536870912, %v591_v61  ;;  %3480 = vcosq.f32 %v4986_v41  ;;  %v135_v19 = vpop.permute.xlu0 %134 }
 0x1c9   :  { %6311 = vst [vmem:[#allocation37_spill] sm:$0xff] %v4990_v52  ;;  %v1649_v2 = vshll.u32 %v1648_v26, 23  ;;  %v483_v16 = vadd.s32 %v4852_v15, %v4843_v11  ;;  %v498_v46 = vsel %vm3135_vm11, 0, %v3134_v17  ;;  %v2093_v0 = vsub.s32 5, %v6312_v56  ;;  %v5006_v55 = vpop.eup %3472  ;;  %v6313_v56 = vld [vmem:[#allocation21_spill] sm:$0xff] }
 0x1ca   :  { %v499_v39 = vsub.s32 32, %v498_v46  ;;  %v503_v31 = vsub.s32 4294967266, %v498_v46  ;;  %v593_v7 = vshrl.u32 %v592_v35, 30  ;;  %v1645_v14 = vshrl.u32 %v1627_v57, %v1643_v6 }
 0x1cb   :  { %v520_v27 = vadd.s32 3, %v516_v51  ;;  %v1678_v8 = vand.u32 2139095040, %v4994_v12  ;;  %v500_v26 = vshll.u32 %v4936_v28, %v498_v46  ;;  %vm533_vm5 = vcmp.lt.s32.totalorder %v6286_v21, 0 }
 0x1cc   :  { %v501_v38 = vshrl.u32 %v483_v16, %v499_v39  ;;  %v504_v9 = vadd.s32 127, %v503_v31  ;;  %v594_v11 = vshll.u32 %v593_v7, 30  ;;  %v1644_v15 = vshll.u32 %v4894_v53, %v1642_v29 }
 0x1cd   :  { %v1650_v17 = vor.u32 4788187, %v1649_v2  ;;  %v1679_v35 = vshrl.u32 %v1678_v8, 23  ;;  %v721_v37 = vsub.s32 4, %v6313_v56  ;;  %v5014_v6 = vpop.eup %3474  ;;  %v164_v52 = vmul.f32 %v3803_v32, %v135_v19 }
 0x1ce   :  { %v502_v57 = vor.u32 %v501_v38, %v500_v26  ;;  %v505_v51 = vshll.u32 %v504_v9, 23  ;;  %v5016_v10 = vsub.s32 %v591_v61, %v594_v11  ;;  %v1646_v28 = vor.u32 %v1645_v14, %v1644_v15  ;;  %v3552_v9 = vld [vmem:[%s6074_s1] sm:$0xff]  ;;  %v241_v15 = vpop.permute.xlu1 %240  ;;  %s3640_s1 = smov [#allocation7]  }
 0x1cf   :  { %v587_v16 = vadd.s32 %v4940_v48, %v4934_v13  ;;  %v3180_v46 = vadd.s32 4294967169, %v1679_v35  ;;  %v6314_v39 = vand.u32 2147483647, %v4994_v12  ;;  %v5023_v29 = vpop.eup %3476  ;;  %v5025_v31 = vand.u32 3, %v520_v27  ;;  %s3119_s28 = sshll.u32 %s3640_s1, 4  ;;  %s3120_s28 = int_to_ptr.vmem [resolvable:$true] %s3119_s28 }
 0x1d0   :  { %6315 = vst [vmem:[#allocation32_spill] sm:$0xff] %v5023_v29  ;;  %v506_v2 = vor.u32 4788187, %v505_v51  ;;  %v597_v8 = vsub.s32 0, %v5016_v10  ;;  %v5031_v61 = vrot.slane %v3552_v9, %v2093_v0  ;;  %v5033_v14 = vpop.eup %3478  ;;  %v1651_v13 = vand.u32 2147483647, %v1650_v17  ;;  %p3604_p3 = scmp.lt.s32.totalorder %s3120_s28, %s3120_s28 }
 0x1d1   :  { %v1682_v53 = vand.u32 8388607, %v6314_v39  ;;  %v617_v48 = vsub.s32 4, %v593_v7  ;;  %v1685_v19 = vadd.s32 1, %v3180_v46  ;;  %v722_v26 = vsel %vm637_vm10, %v721_v37, %v6313_v56  ;;  %s3599_s29 = scalar_lea.vmem %s3120_s28, 4096 }
 0x1d2   :  { %v507_v38 = vand.u32 2147483647, %v506_v2  ;;  %v509_v27 = vcvt.s32.f32 %v502_v57  ;;  %v3137_v11 = vmin.u32 %v597_v8, %v5016_v10  ;;  %v6316_v35 = vand.u32 2147483647, %v3850_v4  ;;  %v5045_v0 = vpop.eup %3480  ;;  %p3600_p2 = scmp.ne.s32.totalorder %s3120_s28, %s3599_s29  ;;  %p3605_p4 = scmp.lt.s32.totalorder %s3599_s29, %s3599_s29 }
 0x1d3   :  { %6319 = vst [vmem:[#allocation24_spill] sm:$0xff] %v5045_v0  ;;  %v1653_v17 = vcvt.s32.f32 %v1646_v28  ;;  %v1683_v39 = vor.u32 8388608, %v1682_v53  ;;  %vm1686_vm9 = vcmp.gt.s32.totalorder %v1685_v19, 0  ;;  %v5052_v46 = vadd.f32 %v3811_v34, %v164_v52 }
 0x1d4   :  { %vm5041_vm11 = vcmp.le.f32.partialorder %v6316_v35, 0.7853982  ;;  %v510_v56 = vmul.f32 %v509_v27, %v507_v38  ;;  %v599_v57 = vclz %v3137_v11  ;;  %v5060_v28 = vsel %vm533_vm5, %v617_v48, %v593_v7  ;;  %p3606_p5 = por %p3605_p4, %p3604_p3 }
 0x1d5   :  { %v723_v37 = vsel %vm5041_vm11, %v3850_v4, %v4534_v30  ;;  %v724_v2 = vsel %vm5041_vm11, 0, %v722_v26  ;;  %v5056_v8 = vmul.f32 %v1653_v17, %v1651_v13  ;;  %v1687_v53 = vsel %vm1686_vm9, %v1685_v19, 0 }
 0x1d6   :  { %v5063_v9 = vmul.f32 %v3807_v33, %v241_v15  ;;  %v511_v35 = vxor.u32 2147483648, %v510_v56  ;;  %v3138_v30 = vadd.s32 4294967294, %v599_v57  ;;  %v1689_v38 = vand.u32 31, %v1687_v53  ;;  %p3607_p6 = pnand %p3606_p5, %p3600_p2 }
 0x1d7   :  { %3482 = vcosq.f32 %v723_v37  ;;  %v5065_v27 = vshrl.u32 %v1687_v53, 5  ;;  %v5067_v52 = vshll.u32 %v1683_v39, 8  ;;  %v5069_v26 = vadd.s32 3, %v724_v2 }
 0x1d8   :  { %3484 = vsinq.f32 %v723_v37  ;;  %v512_v13 = vsel %vm429_vm15, %v511_v35, %v510_v56  ;;  %vm3139_vm10 = vcmp.lt.s32.totalorder %v3138_v30, 0  ;;  %v1690_v7 = vsub.s32 32, %v1689_v38 }
 0x1d9   :  { %v1692_v48 = vshll.u32 %v6223_v20, %v1689_v38  ;;  %v515_v19 = vsel %vm4948_vm4, %v6302_v22, %v512_v13  ;;  %v602_v11 = vsel %vm3139_vm10, 0, %v3138_v30  ;;  %v1695_v15 = vshll.u32 %v6224_v43, %v1689_v38 }
 0x1da   :  { %v1698_v51 = vshll.u32 %v6225_v47, %v1689_v38  ;;  %3486 = vcosq.f32 %v515_v19  ;;  %v6320_v17 = vand.u32 2147483647, %v6286_v21  ;;  %v603_v37 = vsub.s32 32, %v602_v11 }
 0x1db   :  { %v604_v56 = vshll.u32 %v5016_v10, %v602_v11  ;;  %v607_v57 = vsub.s32 4294967266, %v602_v11  ;;  %3488 = vsinq.f32 %v515_v19  ;;  %v1691_v54 = vshrl.u32 %v6223_v20, %v1690_v7 }
 0x1dc   :  { %vm5081_vm9 = vcmp.le.f32.partialorder %v6320_v17, 0.7853982  ;;  %v1693_v2 = vshrl.u32 %v6224_v43, %v1690_v7  ;;  %v1696_v53 = vshrl.u32 %v6225_v47, %v1690_v7  ;;  %v605_v35 = vshrl.u32 %v587_v16, %v603_v37 }
 0x1dd   :  { %v608_v30 = vadd.s32 127, %v607_v57  ;;  %v1699_v13 = vshrl.u32 %v6226_v44, %v1690_v7  ;;  %v1701_v17 = vshll.u32 %v6226_v44, %v1689_v38  ;;  %v1702_v0 = vshrl.u32 %v6227_v5, %v1690_v7 }
 0x1de   :  { %v1694_v40 = vor.u32 %v1693_v2, %v1692_v48  ;;  %v1697_v63 = vor.u32 %v1696_v53, %v1695_v15  ;;  %v1704_v10 = vshll.u32 %v6227_v5, %v1689_v38  ;;  %vm6186_vm15 = vcmp.lt.s32.totalorder %v4678_v62, 0  ;;  %v5099_v38 = vpop.permute.xlu1 %340 }
 0x1df   :  { %v606_v19 = vor.u32 %v605_v35, %v604_v56  ;;  %v609_v11 = vshll.u32 %v608_v30, 23  ;;  %v1700_v25 = vor.u32 %v1699_v13, %v1698_v51  ;;  %v1705_v50 = vshrl.u32 %v6219_v1, %v1690_v7 }
 0x1e0   :  { %v1703_v29 = vor.u32 %v1702_v0, %v1701_v17  ;;  %vm1707_vm4 = vcmp.lt.s32.totalorder %v5065_v27, 1  ;;  %vm1708_vm11 = vcmp.lt.s32.totalorder %v5065_v27, 2  ;;  %vm1709_vm10 = vcmp.lt.s32.totalorder %v5065_v27, 3 }
 0x1e1   :  { %v3483_v16 = vpop.eup %3482  ;;  %v610_v48 = vor.u32 4788187, %v609_v11  ;;  %v613_v15 = vcvt.s32.f32 %v606_v19  ;;  %v1706_v37 = vor.u32 %v1705_v50, %v1704_v10  ;;  %vm1710_vm3 = vcmp.lt.s32.totalorder %v5065_v27, 4 }
 0x1e2   :  { %v3485_v56 = vpop.eup %3484  ;;  %v1711_v51 = vsel %vm1707_vm4, %v1691_v54, %v1694_v40  ;;  %v1712_v7 = vsel %vm1710_vm3, %v1700_v25, 2102212464  ;;  %v1715_v0 = vsel %vm1707_vm4, %v1694_v40, %v1697_v63  ;;  %v1716_v57 = vsel %vm1710_vm3, %v1703_v29, 920167782 }
 0x1e3   :  { %v611_v2 = vand.u32 2147483647, %v610_v48  ;;  %v1713_v53 = vsel %vm1709_vm10, %v1697_v63, %v1712_v7  ;;  %v1717_v50 = vsel %vm1709_vm10, %v1700_v25, %v1716_v57  ;;  %v1719_v35 = vsel %vm1707_vm4, %v1697_v63, %v1700_v25  ;;  %v6323_v7 = vld [vmem:[#allocation34_spill] sm:$0xff] }
 0x1e4   :  { %v1655_v30 = vxor.u32 2147483648, %v5056_v8  ;;  %vm526_vm6 = vcmp.eq.s32.totalorder %v5025_v31, 2  ;;  %v620_v54 = vsel %vm5081_vm9, 0, %v5060_v28  ;;  %v1718_v40 = vsel %vm1708_vm11, %v1715_v0, %v1717_v50  ;;  %v3487_v17 = vpop.eup %3486  ;;  %v140_v50 = vpop.permute.xlu1 %139 }
 0x1e5   :  { %v1720_v13 = vsel %vm1710_vm3, %v1706_v37, 1326507024  ;;  %vm523_vm2 = vcmp.eq.s32.totalorder %v5025_v31, 0  ;;  %v614_v10 = vmul.f32 %v613_v15, %v611_v2  ;;  %v3489_v11 = vpop.eup %3488  ;;  %v1714_v28 = vsel %vm1708_vm11, %v1711_v51, %v1713_v53 }
 0x1e6   :  { %v1721_v19 = vsel %vm1709_vm10, %v1703_v29, %v1720_v13  ;;  %v5122_v63 = vmul.u32.u64.low %v5067_v52, %v1718_v40  ;;  %v5123_v25 = vmul.u32.u64.high %v5067_v52, %v1718_v40, %v5122_v63  ;;  %v729_v37 = vand.u32 3, %v5069_v26 }
 0x1e7   :  { %v1722_v48 = vsel %vm1708_vm11, %v1719_v35, %v1721_v19  ;;  %v825_v0 = vsub.s32 4, %v6323_v7  ;;  %v615_v15 = vxor.u32 2147483648, %v614_v10  ;;  %v284_v2 = vadd.f32 %v5063_v9, %v5052_v46  ;;  %v5148_v46 = vpop.permute.xlu0 %144 }
 0x1e8   :  { %v5133_v57 = vmul.u32.u64.low %v5067_v52, %v1722_v48  ;;  %v5134_v29 = vmul.u32.u64.high %v5067_v52, %v1722_v48, %v5133_v57  ;;  %v5141_v51 = vsel %vm6186_vm15, %v1655_v30, %v5056_v8  ;;  %vm522_vm3 = vcmp.lt.s32.totalorder %v5025_v31, 2  ;;  %v6324_v30 = vld [vmem:[#allocation18_spill] sm:$0xff] }
 0x1e9   :  { %v527_v27 = vxor.u32 2147483648, %v3487_v17  ;;  %v624_v26 = vadd.s32 3, %v620_v54  ;;  %v732_v53 = vxor.u32 2147483648, %v3485_v56  ;;  %v616_v35 = vsel %vm533_vm5, %v615_v15, %v614_v10  ;;  %v245_v57 = vpop.permute.xlu1 %244 }
 0x1ea   :  { %v1730_v40 = vmul.u32 %v5067_v52, %v1714_v28  ;;  %v1733_v13 = vadd.s32 1, %v5123_v25  ;;  %v735_v19 = vxor.u32 2147483648, %v3483_v16  ;;  %v524_v9 = vxor.u32 2147483648, %v3489_v11 }
 0x1eb   :  { %v619_v8 = vsel %vm5081_vm9, %v6286_v21, %v616_v35  ;;  %vm731_vm4 = vcmp.eq.s32.totalorder %v729_v37, 0  ;;  %vm6325_vm11 = vcmp.lt.s32.totalorder %v6324_v30, 0  ;;  %vm1732_vm5 = vc.u32 %v5134_v29, %v5122_v63 }
 0x1ec   :  { %v826_v54 = vsel %vm6325_vm11, %v825_v0, %v6323_v7  ;;  %3490 = vcosq.f32 %v619_v8  ;;  %v733_v52 = vsel %vm731_vm4, %v3483_v16, %v732_v53  ;;  %vm734_vm10 = vcmp.eq.s32.totalorder %v729_v37, 2 }
 0x1ed   :  { %3492 = vsinq.f32 %v619_v8  ;;  %v5158_v10 = vand.u32 3, %v624_v26  ;;  %v1734_v28 = vsel %vm1732_vm5, %v1733_v13, %v5123_v25  ;;  %v736_v48 = vsel %vm734_vm10, %v735_v19, %v3485_v56  ;;  %v6327_v56 = vld [vmem:[#allocation51_spill] sm:$0xff] }
 0x1ee   :  { %vm519_vm15 = vweird.f32 %v6302_v22  ;;  %v528_v39 = vsel %vm526_vm6, %v527_v27, %v3489_v11  ;;  %v1735_v15 = vadd.s32 %v1734_v28, %v1730_v40  ;;  %vm730_vm9 = vcmp.lt.s32.totalorder %v729_v37, 2  ;;  %v345_v37 = vpop.permute.xlu0 %344  ;;  %v6334_v22 = vld [vmem:[#allocation31_spill] sm:$0xff] }
 0x1ef   :  { %v828_v0 = vsel %vm4319_vm7, 0, %v826_v54  ;;  %v525_v16 = vsel %vm523_vm2, %v3487_v17, %v524_v9  ;;  %v737_v53 = vsel %vm730_vm9, %v733_v52, %v736_v48  ;;  %v836_v35 = vxor.u32 2147483648, %v4582_v23 }
 0x1f0   :  { %v832_v26 = vadd.s32 3, %v828_v0  ;;  %v1736_v25 = vadd.s32 536870912, %v1735_v15  ;;  %v839_v13 = vxor.u32 2147483648, %v6327_v56  ;;  %v368_v19 = vmul.f32 %v3815_v36, %v5099_v38 }
 0x1f1   :  { %v165_v11 = vmul.f32 %v3803_v32, %v140_v50  ;;  %vm727_vm6 = vweird.f32 %v3850_v4  ;;  %vm831_vm7 = vweird.f32 %v6324_v30  ;;  %v269_v17 = vmul.f32 %v3807_v33, %v245_v57 }
 0x1f2   :  { %v833_v27 = vand.u32 3, %v832_v26  ;;  %v529_v40 = vsel %vm522_vm3, %v525_v16, %v528_v39  ;;  %v5178_v9 = vshrl.u32 %v1736_v25, 30  ;;  %v738_v8 = vsel %vm727_vm6, nan, %v737_v53 }
 0x1f3   :  { %v5180_v54 = vadd.f32 %v368_v19, %v284_v2  ;;  %vm623_vm2 = vweird.f32 %v6286_v21  ;;  %v185_v38 = vadd.f32 %v3811_v34, %v165_v11  ;;  %v369_v4 = vmul.f32 %v3815_v36, %v345_v37 }
 0x1f4   :  { %vm835_vm4 = vcmp.eq.s32.totalorder %v833_v27, 0  ;;  %vm838_vm11 = vcmp.eq.s32.totalorder %v833_v27, 2  ;;  %v6329_v50 = vand.u32 2147483647, %v4678_v62  ;;  %v1738_v31 = vshll.u32 %v5178_v9, 30 }
 0x1f5   :  { %6328 = vst [vmem:[#allocation17_spill] sm:$0xff] %v5180_v54  ;;  %vm834_vm3 = vcmp.lt.s32.totalorder %v833_v27, 2  ;;  %v837_v2 = vsel %vm835_vm4, %v6327_v56, %v836_v35  ;;  %v840_v28 = vsel %vm838_vm11, %v839_v13, %v4582_v23  ;;  %v2097_v39 = vmul.f32 %v5031_v61, %v738_v8 }
 0x1f6   :  { %vm5187_vm5 = vcmp.le.f32.partialorder %v6329_v50, 0.7853982  ;;  %v841_v48 = vsel %vm834_vm3, %v837_v2, %v840_v28  ;;  %v5197_v7 = vadd.f32 %v3825_v45, %v5180_v54  ;;  %v285_v0 = vadd.f32 %v269_v17, %v185_v38  ;;  %v3491_v57 = vpop.eup %3490 }
 0x1f7   :  { %vm626_vm10 = vcmp.lt.s32.totalorder %v5158_v10, 2  ;;  %vm630_vm9 = vcmp.eq.s32.totalorder %v5158_v10, 2  ;;  %v5201_v16 = vsub.s32 %v1735_v15, %v1738_v31  ;;  %v842_v53 = vsel %vm831_vm7, nan, %v841_v48  ;;  %v3493_v26 = vpop.eup %3492  ;;  %v6333_v15 = vld [vmem:[#allocation25_spill] sm:$0xff] }
 0x1f8   :  { %v530_v23 = vsel %vm519_vm15, nan, %v529_v40  ;;  %v631_v35 = vxor.u32 2147483648, %v3491_v57  ;;  %v2098_v25 = vmul.f32 %v5031_v61, %v842_v53  ;;  %v6188_v56 = vand.u32 2147483647, %v5197_v7 }
 0x1f9   :  { %v628_v13 = vxor.u32 2147483648, %v3493_v26  ;;  %v1741_v19 = vsub.s32 0, %v5201_v16  ;;  %v1782_v11 = vand.u32 2139095040, %v5197_v7  ;;  %v5211_v37 = vadd.f32 %v369_v4, %v285_v0 }
 0x1fa   :  { %vm627_vm6 = vcmp.eq.s32.totalorder %v5158_v10, 0  ;;  %v632_v30 = vsel %vm630_vm9, %v631_v35, %v3493_v26  ;;  %v5215_v27 = vadd.f32 %v2097_v39, %v6333_v15  ;;  %v5218_v17 = vadd.f32 %v2098_v25, %v6334_v22  ;;  %v6336_v35 = vld [vmem:[#allocation26_spill] sm:$0xff] }
 0x1fb   :  { %6332 = vst [vmem:[#allocation22_spill] sm:$0xff] %v5211_v37  ;;  %v629_v40 = vsel %vm627_vm6, %v3491_v57, %v628_v13  ;;  %v2095_v8 = vmul.f32 %v5031_v61, %v530_v23  ;;  %v3181_v38 = vmin.u32 %v1741_v19, %v5201_v16  ;;  %v1783_v50 = vshrl.u32 %v1782_v11, 23  ;;  %v6335_v57 = vld [vmem:[#allocation40_spill] sm:$0xff]  ;;  %v6337_v11 = vld [vmem:[#allocation29_spill] sm:$0xff] }
 0x1fc   :  { %v633_v31 = vsel %vm626_vm10, %v629_v40, %v632_v30  ;;  %v2128_v4 = vpack.c.bf16 %v5218_v17, %v5215_v27  ;;  %v1786_v2 = vand.u32 8388607, %v6188_v56  ;;  %v5230_v28 = vadd.f32 %v3825_v45, %v5211_v37 }
 0x1fd   :  { %v634_v48 = vsel %vm623_vm2, nan, %v633_v31  ;;  %v1743_v39 = vclz %v3181_v38  ;;  %v3184_v0 = vadd.s32 4294967169, %v1783_v50  ;;  %v929_v53 = vsub.s32 4, %v6335_v57  ;;  %v249_v31 = vpop.permute.xlu1 %248 }
 0x1fe   :  { %3494 = vsinq.f32 %v4986_v41  ;;  %v5240_v10 = vsel %vm5187_vm5, %v4678_v62, %v5141_v51  ;;  %v2096_v26 = vmul.f32 %v5031_v61, %v634_v48  ;;  %v6187_v23 = vand.u32 2147483647, %v5230_v28 }
 0x1ff   :  { %v2111_v25 = vadd.f32 %v2095_v8, %v6336_v35  ;;  %v3182_v21 = vadd.s32 4294967294, %v1743_v39  ;;  %v1789_v13 = vadd.s32 1, %v3184_v0  ;;  %v1886_v19 = vand.u32 2139095040, %v5230_v28 }
 0x200   :  { %v2112_v30 = vadd.f32 %v2096_v26, %v6337_v11  ;;  %v1787_v15 = vor.u32 8388608, %v1786_v2  ;;  %v166_v41 = vmul.f32 %v3803_v32, %v5148_v46  ;;  %v6338_v22 = vand.u32 2147483647, %v4023_v42 }
 0x201   :  { %vm3183_vm7 = vcmp.lt.s32.totalorder %v3182_v21, 0  ;;  %vm1790_vm2 = vcmp.gt.s32.totalorder %v1789_v13, 0  ;;  %v5257_v40 = vand.u32 8388607, %v6187_v23  ;;  %vm6341_vm4 = vcmp.lt.s32.totalorder %v4023_v42, 0 }
 0x202   :  { %vm5251_vm15 = vcmp.le.f32.partialorder %v6338_v22, 0.7853982  ;;  %v5262_v8 = vsel %vm6341_vm4, %v929_v53, %v6335_v57  ;;  %v2127_v38 = vpack.c.bf16 %v2112_v30, %v2111_v25  ;;  %v5264_v50 = vsel %vm3183_vm7, 0, %v3182_v21 }
 0x203   :  { %v1791_v32 = vsel %vm1790_vm2, %v1789_v13, 0  ;;  %v1887_v46 = vshrl.u32 %v1886_v19, 23  ;;  %v1747_v2 = vsub.s32 32, %v5264_v50  ;;  %v1751_v48 = vsub.s32 4294967266, %v5264_v50 }
 0x204   :  { %v1792_v39 = vshrl.u32 %v1791_v32, 5  ;;  %v5272_v0 = vsel %vm5251_vm15, %v4023_v42, %v4642_v59  ;;  %3496 = vcosq.f32 %v5240_v10  ;;  %2272 = vmatmul.mubr.bf16.vlgmr.msra.gmra.mrb[0].mxu0 %v2127_v38  ;;  %v1731_v57 = vadd.s32 %v5122_v63, %v5134_v29 }
 0x205   :  { %v1793_v53 = vand.u32 31, %v1791_v32  ;;  %v186_v26 = vadd.f32 %v3811_v34, %v166_v41  ;;  %v6342_v35 = vmov 0   ;;  %v5279_v25 = vshll.u32 %v1787_v15, 8 }
 0x206   :  { %2281 = vmatprep.mubr.bf16.mxu0 %v6342_v35  ;;  %v1891_v21 = vor.u32 8388608, %v5257_v40  ;;  %v270_v13 = vmul.f32 %v3807_v33, %v249_v31  ;;  %v932_v59 = vsel %vm5251_vm15, 0, %v5262_v8  ;;  %v1749_v19 = vshrl.u32 %v1731_v57, %v1747_v2 }
 0x207   :  { %v1794_v11 = vsub.s32 32, %v1793_v53  ;;  %v3188_v30 = vadd.s32 4294967169, %v1887_v46  ;;  %3498 = vcosq.f32 %v5272_v0  ;;  %v1752_v63 = vadd.s32 127, %v1751_v48 }
 0x208   :  { %v1796_v34 = vshll.u32 %v6223_v20, %v1793_v53  ;;  %v1799_v29 = vshll.u32 %v6224_v43, %v1793_v53  ;;  %vm1811_vm11 = vcmp.lt.s32.totalorder %v1792_v39, 1  ;;  %v5289_v15 = vpop.eup %3494  ;;  %v1802_v22 = vshll.u32 %v6225_v47, %v1793_v53 }
 0x209   :  { %v1797_v41 = vshrl.u32 %v6224_v43, %v1794_v11  ;;  %v1800_v33 = vshrl.u32 %v6225_v47, %v1794_v11  ;;  %v1803_v51 = vshrl.u32 %v6226_v44, %v1794_v11  ;;  %v1805_v40 = vshll.u32 %v6226_v44, %v1793_v53 }
 0x20a   :  { %v1806_v8 = vshrl.u32 %v6227_v5, %v1794_v11  ;;  %v1808_v38 = vshll.u32 %v6227_v5, %v1793_v53  ;;  %v1809_v32 = vshrl.u32 %v6219_v1, %v1794_v11  ;;  %v1795_v46 = vshrl.u32 %v6223_v20, %v1794_v11 }
 0x20b   :  { %v1798_v31 = vor.u32 %v1797_v41, %v1796_v34  ;;  %v1801_v2 = vor.u32 %v1800_v33, %v1799_v29  ;;  %v1804_v48 = vor.u32 %v1803_v51, %v1802_v22  ;;  %vm1813_vm3 = vcmp.lt.s32.totalorder %v1792_v39, 3 }
 0x20c   :  { %v1807_v57 = vor.u32 %v1806_v8, %v1805_v40  ;;  %v1810_v23 = vor.u32 %v1809_v32, %v1808_v38  ;;  %vm1814_vm10 = vcmp.lt.s32.totalorder %v1792_v39, 4  ;;  %2282 = vmatmul.mubr.bf16.gmra.mrb[4].mxu0 %v2128_v4  ;;  %vm1812_vm9 = vcmp.lt.s32.totalorder %v1792_v39, 2 }
 0x20d   :  { %v1815_v56 = vsel %vm1811_vm11, %v1795_v46, %v1798_v31  ;;  %v1816_v37 = vsel %vm1814_vm10, %v1804_v48, 2102212464  ;;  %v1819_v53 = vsel %vm1811_vm11, %v1798_v31, %v1801_v2  ;;  %v1823_v54 = vsel %vm1811_vm11, %v1801_v2, %v1804_v48  ;;  %2291 = vmatprep.mubr.bf16.mxu0 %v6342_v35 }
 0x20e   :  { %v1817_v11 = vsel %vm1813_vm3, %v1801_v2, %v1816_v37  ;;  %v1820_v34 = vsel %vm1814_vm10, %v1807_v57, 920167782  ;;  %v1824_v29 = vsel %vm1814_vm10, %v1810_v23, 1326507024  ;;  %v5307_v41 = vpop.eup %3496  ;;  %v1753_v33 = vshll.u32 %v1752_v63, 23 }
 0x20f   :  { %6343 = vst [vmem:[#allocation27_spill] sm:$0xff] %v5307_v41  ;;  %v1821_v22 = vsel %vm1813_vm3, %v1804_v48, %v1820_v34  ;;  %v1825_v51 = vsel %vm1813_vm3, %v1807_v57, %v1824_v29  ;;  %v1893_v27 = vadd.s32 1, %v3188_v30  ;;  %v1748_v17 = vshll.u32 %v5201_v16, %v5264_v50 }
 0x210   :  { %v1818_v4 = vsel %vm1812_vm9, %v1815_v56, %v1817_v11  ;;  %v1822_v40 = vsel %vm1812_vm9, %v1819_v53, %v1821_v22  ;;  %v1826_v8 = vsel %vm1812_vm9, %v1823_v54, %v1825_v51  ;;  %3500 = vsinq.f32 %v5240_v10 }
 0x211   :  { %v5311_v38 = vpop.eup %3498  ;;  %v5314_v37 = vmul.u32.u64.low %v5279_v25, %v1826_v8  ;;  %v5315_v39 = vmul.u32.u64.high %v5279_v25, %v1826_v8, %v5314_v37  ;;  %v5318_v23 = vmul.u32.u64.low %v5279_v25, %v1822_v40  ;;  %v5319_v32 = vmul.u32.u64.high %v5279_v25, %v1822_v40, %v5318_v23 }
 0x212   :  { %vm1894_vm6 = vcmp.gt.s32.totalorder %v1893_v27, 0  ;;  %v5323_v30 = vshll.u32 %v1891_v21, 8  ;;  %v5325_v16 = vadd.f32 %v270_v13, %v186_v26  ;;  %v5327_v56 = vor.u32 %v1749_v19, %v1748_v17  ;;  %v6344_v21 = vld [vmem:[#allocation45_spill] sm:$0xff] }
 0x213   :  { %v5329_v54 = vor.u32 4788187, %v1753_v33  ;;  %v1895_v50 = vsel %vm1894_vm6, %v1893_v27, 0  ;;  %v936_v63 = vadd.s32 3, %v932_v59  ;;  %v1834_v46 = vmul.u32 %v5279_v25, %v1818_v4 }
 0x214   :  { %v1896_v31 = vshrl.u32 %v1895_v50, 5  ;;  %v1897_v2 = vand.u32 31, %v1895_v50  ;;  %3502 = vsinq.f32 %v5272_v0  ;;  %vm1836_vm15 = vc.u32 %v5315_v39, %v5318_v23 }
 0x215   :  { %v1837_v10 = vadd.s32 1, %v5319_v32  ;;  %v943_v26 = vxor.u32 2147483648, %v5311_v38  ;;  %v1033_v13 = vsub.s32 4, %v6344_v21  ;;  %v5340_v57 = vand.u32 3, %v936_v63 }
 0x216   :  { %v1898_v19 = vsub.s32 32, %v1897_v2  ;;  %v1900_v48 = vshll.u32 %v6223_v20, %v1897_v2  ;;  %v1903_v59 = vshll.u32 %v6224_v43, %v1897_v2  ;;  %v1906_v0 = vshll.u32 %v6225_v47, %v1897_v2 }
 0x217   :  { %v1838_v25 = vsel %vm1836_vm15, %v1837_v10, %v5319_v32  ;;  %v1909_v53 = vshll.u32 %v6226_v44, %v1897_v2  ;;  %v1912_v11 = vshll.u32 %v6227_v5, %v1897_v2  ;;  %vm1915_vm7 = vcmp.lt.s32.totalorder %v1896_v31, 1 }
 0x218   :  { %v1839_v34 = vadd.s32 %v1838_v25, %v1834_v46  ;;  %v1901_v29 = vshrl.u32 %v6224_v43, %v1898_v19  ;;  %v1904_v33 = vshrl.u32 %v6225_v47, %v1898_v19  ;;  %v1899_v22 = vshrl.u32 %v6223_v20, %v1898_v19 }
 0x219   :  { %v1907_v51 = vshrl.u32 %v6226_v44, %v1898_v19  ;;  %v1910_v27 = vshrl.u32 %v6227_v5, %v1898_v19  ;;  %v1913_v17 = vshrl.u32 %v6219_v1, %v1898_v19  ;;  %vm1916_vm2 = vcmp.lt.s32.totalorder %v1896_v31, 2 }
 0x21a   :  { %v1840_v4 = vadd.s32 536870912, %v1839_v34  ;;  %v1902_v40 = vor.u32 %v1901_v29, %v1900_v48  ;;  %v1905_v8 = vor.u32 %v1904_v33, %v1903_v59  ;;  %vm1917_vm4 = vcmp.lt.s32.totalorder %v1896_v31, 3  ;;  %v5352_v63 = vpop.eup %3500 }
 0x21b   :  { %v1908_v37 = vor.u32 %v1907_v51, %v1906_v0  ;;  %v1911_v32 = vor.u32 %v1910_v27, %v1909_v53  ;;  %v1914_v50 = vor.u32 %v1913_v17, %v1912_v11  ;;  %vm1918_vm11 = vcmp.lt.s32.totalorder %v1896_v31, 4  ;;  %v6346_v31 = vld [vmem:[#allocation28_spill] sm:$0xff] }
 0x21c   :  { %v5354_v46 = vshrl.u32 %v1840_v4, 30  ;;  %v1919_v2 = vsel %vm1915_vm7, %v1899_v22, %v1902_v40  ;;  %v1923_v10 = vsel %vm1915_vm7, %v1902_v40, %v1905_v8  ;;  %v1755_v33 = vand.u32 2147483647, %v5329_v54 }
 0x21d   :  { %v1920_v25 = vsel %vm1918_vm11, %v1908_v37, 2102212464  ;;  %v1924_v41 = vsel %vm1918_vm11, %v1911_v32, 920167782  ;;  %v1927_v19 = vsel %vm1915_vm7, %v1905_v8, %v1908_v37  ;;  %v1928_v48 = vsel %vm1918_vm11, %v1914_v50, 1326507024 }
 0x21e   :  { %6345 = vst [vmem:[#allocation33_spill] sm:$0xff] %v5354_v46  ;;  %v3503_v59 = vpop.eup %3502  ;;  %v1842_v0 = vshll.u32 %v5354_v46, 30  ;;  %v1921_v53 = vsel %vm1917_vm4, %v1905_v8, %v1920_v25  ;;  %v1925_v11 = vsel %vm1917_vm4, %v1908_v37, %v1924_v41  ;;  %v1929_v29 = vsel %vm1917_vm4, %v1911_v32, %v1928_v48  ;;  %v349_v46 = vpop.permute.xlu1 %348 }
 0x21f   :  { %v1757_v51 = vcvt.s32.f32 %v5327_v56  ;;  %v1926_v27 = vsel %vm1916_vm2, %v1923_v10, %v1925_v11  ;;  %v1930_v22 = vsel %vm1916_vm2, %v1927_v19, %v1929_v29  ;;  %v1922_v4 = vsel %vm1916_vm2, %v1919_v2, %v1921_v53 }
 0x220   :  { %v5364_v17 = vsub.s32 %v1839_v34, %v1842_v0  ;;  %v5368_v40 = vmul.u32.u64.low %v5323_v30, %v1930_v22  ;;  %v5369_v50 = vmul.u32.u64.high %v5323_v30, %v1930_v22, %v5368_v40  ;;  %v940_v37 = vxor.u32 2147483648, %v3503_v59  ;;  %v6349_v0 = vld [vmem:[#allocation49_spill] sm:$0xff] }
 0x221   :  { %v5372_v41 = vmul.u32.u64.low %v5323_v30, %v1926_v27  ;;  %v5373_v8 = vmul.u32.u64.high %v5323_v30, %v1926_v27, %v5372_v41  ;;  %vm942_vm3 = vcmp.eq.s32.totalorder %v5340_v57, 2  ;;  %vm939_vm10 = vcmp.eq.s32.totalorder %v5340_v57, 0  ;;  %v6352_v40 = vld [vmem:[#allocation39_spill] sm:$0xff] }
 0x222   :  { %v1845_v32 = vsub.s32 0, %v5364_v17  ;;  %v944_v34 = vsel %vm942_vm3, %v943_v26, %v3503_v59  ;;  %vm6347_vm9 = vcmp.lt.s32.totalorder %v6346_v31, 0  ;;  %v941_v10 = vsel %vm939_vm10, %v5311_v38, %v940_v37  ;;  %v6350_v26 = vld [vmem:[#allocation63_spill] sm:$0xff] }
 0x223   :  { %v1034_v2 = vsel %vm6347_vm9, %v1033_v13, %v6344_v21  ;;  %v370_v48 = vmul.f32 %v3815_v36, %v349_v46  ;;  %v1137_v53 = vsub.s32 4, %v6349_v0  ;;  %vm1940_vm6 = vc.u32 %v5369_v50, %v5372_v41  ;;  %v6351_v46 = vld [vmem:[#allocation61_spill] sm:$0xff] }
 0x224   :  { %v1036_v19 = vsel %vm4571_vm1, 0, %v1034_v2  ;;  %v3185_v11 = vmin.u32 %v1845_v32, %v5364_v17  ;;  %vm938_vm15 = vcmp.lt.s32.totalorder %v5340_v57, 2  ;;  %v1044_v59 = vxor.u32 2147483648, %v6350_v26 }
 0x225   :  { %v1941_v21 = vadd.s32 1, %v5373_v8  ;;  %v945_v13 = vsel %vm938_vm15, %v941_v10, %v944_v34  ;;  %v1040_v38 = vadd.s32 3, %v1036_v19  ;;  %v5394_v29 = vadd.f32 %v370_v48, %v5325_v16 }
 0x226   :  { %v1847_v27 = vclz %v3185_v11  ;;  %v1938_v36 = vmul.u32 %v5323_v30, %v1922_v4  ;;  %v1047_v22 = vxor.u32 2147483648, %v6351_v46  ;;  %vm6353_vm1 = vcmp.lt.s32.totalorder %v6352_v40, 0 }
 0x227   :  { %v1138_v37 = vsel %vm6353_vm1, %v1137_v53, %v6349_v0  ;;  %v1942_v57 = vsel %vm1940_vm6, %v1941_v21, %v5373_v8  ;;  %vm935_vm7 = vweird.f32 %v4023_v42  ;;  %vm1039_vm2 = vweird.f32 %v6346_v31  ;;  %v6357_v31 = vld [vmem:[#allocation44_spill] sm:$0xff] }
 0x228   :  { %v1041_v32 = vand.u32 3, %v1040_v38  ;;  %v3186_v34 = vadd.s32 4294967294, %v1847_v27  ;;  %v1943_v2 = vadd.s32 %v1942_v57, %v1938_v36  ;;  %v946_v16 = vsel %vm935_vm7, nan, %v945_v13 }
 0x229   :  { %v5406_v10 = vadd.f32 %v3825_v45, %v5394_v29  ;;  %v1140_v4 = vsel %vm4600_vm12, 0, %v1138_v37  ;;  %v1835_v19 = vadd.s32 %v5318_v23, %v5315_v39  ;;  %v2099_v45 = vmul.f32 %v5031_v61, %v946_v16 }
 0x22a   :  { %vm1042_vm4 = vcmp.lt.s32.totalorder %v1041_v32, 2  ;;  %vm1043_vm11 = vcmp.eq.s32.totalorder %v1041_v32, 0  ;;  %vm1046_vm3 = vcmp.eq.s32.totalorder %v1041_v32, 2  ;;  %vm3187_vm10 = vcmp.lt.s32.totalorder %v3186_v34, 0 }
 0x22b   :  { %v1944_v8 = vadd.s32 536870912, %v1943_v2  ;;  %v1045_v42 = vsel %vm1043_vm11, %v6351_v46, %v1044_v59  ;;  %v1048_v25 = vsel %vm1046_vm3, %v1047_v22, %v6350_v26  ;;  %v1850_v48 = vsel %vm3187_vm10, 0, %v3186_v34  ;;  %v6355_v22 = vld [vmem:[#allocation43_spill] sm:$0xff] }
 0x22c   :  { %v1049_v0 = vsel %vm1042_vm4, %v1045_v42, %v1048_v25  ;;  %v1851_v53 = vsub.s32 32, %v1850_v48  ;;  %v1855_v11 = vsub.s32 4294967266, %v1850_v48  ;;  %v1987_v13 = vand.u32 2147483647, %v5406_v10  ;;  %v6356_v34 = vld [vmem:[#allocation23_spill] sm:$0xff] }
 0x22d   :  { %v5415_v21 = vshrl.u32 %v1944_v8, 30  ;;  %v1852_v38 = vshll.u32 %v5364_v17, %v1850_v48  ;;  %v1050_v59 = vsel %vm1039_vm2, nan, %v1049_v0  ;;  %v1990_v26 = vand.u32 2139095040, %v5406_v10 }
 0x22e   :  { %v1144_v27 = vadd.s32 3, %v1140_v4  ;;  %v1853_v36 = vshrl.u32 %v1835_v19, %v1851_v53  ;;  %v1856_v39 = vadd.s32 127, %v1855_v11  ;;  %v2100_v46 = vmul.f32 %v5031_v61, %v1050_v59  ;;  %v6358_v11 = vld [vmem:[#allocation64_spill] sm:$0xff] }
 0x22f   :  { %v1946_v23 = vshll.u32 %v5415_v21, 30  ;;  %v2115_v37 = vadd.f32 %v2099_v45, %v6355_v22  ;;  %v1991_v57 = vshrl.u32 %v1990_v26, 23  ;;  %v1148_v16 = vxor.u32 2147483648, %v6356_v34 }
 0x230   :  { %v1145_v32 = vand.u32 3, %v1144_v27  ;;  %v1854_v30 = vor.u32 %v1853_v36, %v1852_v38  ;;  %v1857_v17 = vshll.u32 %v1856_v39, 23  ;;  %v2116_v42 = vadd.f32 %v2100_v46, %v6357_v31 }
 0x231   :  { %v5426_v8 = vsub.s32 %v1943_v2, %v1946_v23  ;;  %v5433_v4 = vmul.f32 %v1757_v51, %v1755_v33  ;;  %v3192_v25 = vadd.s32 4294967169, %v1991_v57  ;;  %v1994_v19 = vand.u32 8388607, %v1987_v13  ;;  %v6359_v51 = vld [vmem:[#allocation50_spill] sm:$0xff] }
 0x232   :  { %vm1143_vm12 = vweird.f32 %v6352_v40  ;;  %v1858_v48 = vor.u32 4788187, %v1857_v17  ;;  %v2129_v45 = vpack.c.bf16 %v2116_v42, %v2115_v37  ;;  %vm1147_vm9 = vcmp.eq.s32.totalorder %v1145_v32, 0  ;;  %v6360_v57 = vld [vmem:[#allocation42_spill] sm:$0xff] }
 0x233   :  { %v1949_v0 = vsub.s32 0, %v5426_v8  ;;  %v1861_v2 = vcvt.s32.f32 %v1854_v30  ;;  %v1997_v53 = vadd.s32 1, %v3192_v25  ;;  %v1149_v38 = vsel %vm1147_vm9, %v6358_v11, %v1148_v16 }
 0x234   :  { %v1151_v54 = vxor.u32 2147483648, %v6358_v11  ;;  %v1859_v56 = vand.u32 2147483647, %v1858_v48  ;;  %2292 = vmatmul.mubr.bf16.gmra.mrb[8].mxu0 %v2129_v45  ;;  %vm1150_vm6 = vcmp.eq.s32.totalorder %v1145_v32, 2  ;;  %v1241_v59 = vsub.s32 4, %v6359_v51 }
 0x235   :  { %v3189_v33 = vmin.u32 %v1949_v0, %v5426_v8  ;;  %v1995_v26 = vor.u32 8388608, %v1994_v19  ;;  %vm1998_vm15 = vcmp.gt.s32.totalorder %v1997_v53, 0  ;;  %2301 = vmatprep.mubr.bf16.mxu0 %v6342_v35  ;;  %vm1146_vm1 = vcmp.lt.s32.totalorder %v1145_v32, 2 }
 0x236   :  { %v1152_v27 = vsel %vm1150_vm6, %v1151_v54, %v6356_v34  ;;  %v1862_v36 = vmul.f32 %v1861_v2, %v1859_v56  ;;  %v1999_v23 = vsel %vm1998_vm15, %v1997_v53, 0  ;;  %vm1781_vm7 = vcmp.lt.s32.totalorder %v5197_v7, 0 }
 0x237   :  { %v1951_v39 = vclz %v3189_v33  ;;  %v1153_v46 = vsel %vm1146_vm1, %v1149_v38, %v1152_v27  ;;  %v2001_v22 = vand.u32 31, %v1999_v23  ;;  %vm6361_vm2 = vcmp.lt.s32.totalorder %v6360_v57, 0 }
 0x238   :  { %v1154_v37 = vsel %vm1143_vm12, nan, %v1153_v46  ;;  %v1242_v16 = vsel %vm6361_vm2, %v1241_v59, %v6359_v51  ;;  %v1759_v30 = vxor.u32 2147483648, %v5433_v4  ;;  %v1863_v17 = vxor.u32 2147483648, %v1862_v36 }
 0x239   :  { %v1939_v32 = vadd.s32 %v5372_v41, %v5369_v50  ;;  %v3190_v34 = vadd.s32 4294967294, %v1951_v39  ;;  %v2000_v31 = vshrl.u32 %v1999_v23, 5  ;;  %v2002_v42 = vsub.s32 32, %v2001_v22 }
 0x23a   :  { %v5454_v25 = vshll.u32 %v1995_v26, 8  ;;  %v1244_v48 = vsel %vm4697_vm8, 0, %v1242_v16  ;;  %v2004_v40 = vshll.u32 %v6223_v20, %v2001_v22  ;;  %v2007_v0 = vshll.u32 %v6224_v43, %v2001_v22 }
 0x23b   :  { %vm3191_vm4 = vcmp.lt.s32.totalorder %v3190_v34, 0  ;;  %v5461_v45 = vmul.f32 %v5031_v61, %v1154_v37  ;;  %v6363_v2 = vand.u32 2147483647, %v5197_v7  ;;  %v1864_v41 = vsel %vm1781_vm7, %v1863_v17, %v1862_v36 }
 0x23c   :  { %v1954_v53 = vsel %vm3191_vm4, 0, %v3190_v34  ;;  %v2005_v11 = vshrl.u32 %v6224_v43, %v2002_v42  ;;  %v2010_v38 = vshll.u32 %v6225_v47, %v2001_v22  ;;  %v2013_v33 = vshll.u32 %v6226_v44, %v2001_v22 }
 0x23d   :  { %vm5465_vm11 = vcmp.le.f32.partialorder %v6363_v2, 0.7853982  ;;  %v1955_v54 = vsub.s32 32, %v1954_v53  ;;  %v1959_v56 = vsub.s32 4294967266, %v1954_v53  ;;  %v2016_v51 = vshll.u32 %v6227_v5, %v2001_v22 }
 0x23e   :  { %v2003_v59 = vshrl.u32 %v6223_v20, %v2002_v42  ;;  %v2006_v26 = vor.u32 %v2005_v11, %v2004_v40  ;;  %v2008_v27 = vshrl.u32 %v6225_v47, %v2002_v42  ;;  %v2011_v39 = vshrl.u32 %v6226_v44, %v2002_v42 }
 0x23f   :  { %vm1677_vm8 = vcmp.lt.s32.totalorder %v4994_v12, 0  ;;  %v1957_v36 = vshrl.u32 %v1939_v32, %v1955_v54  ;;  %v1960_v23 = vadd.s32 127, %v1959_v56  ;;  %v2014_v43 = vshrl.u32 %v6227_v5, %v2002_v42 }
 0x240   :  { %v2017_v46 = vshrl.u32 %v6219_v1, %v2002_v42  ;;  %v1956_v37 = vshll.u32 %v5426_v8, %v1954_v53  ;;  %v2009_v16 = vor.u32 %v2008_v27, %v2007_v0  ;;  %v2012_v17 = vor.u32 %v2011_v39, %v2010_v38 }
 0x241   :  { %vm2019_vm3 = vcmp.lt.s32.totalorder %v2000_v31, 1  ;;  %v1961_v22 = vshll.u32 %v1960_v23, 23  ;;  %v2015_v20 = vor.u32 %v2014_v43, %v2013_v33  ;;  %vm2020_vm10 = vcmp.lt.s32.totalorder %v2000_v31, 2  ;;  %v6366_v23 = vld [vmem:[#allocation53_spill] sm:$0xff] }
 0x242   :  { %v2018_v34 = vor.u32 %v2017_v46, %v2016_v51  ;;  %v1958_v47 = vor.u32 %v1957_v36, %v1956_v37  ;;  %vm2021_vm12 = vcmp.lt.s32.totalorder %v2000_v31, 3  ;;  %vm2022_vm9 = vcmp.lt.s32.totalorder %v2000_v31, 4 }
 0x243   :  { %v2027_v44 = vsel %vm2019_vm3, %v2006_v26, %v2009_v16  ;;  %v1962_v19 = vor.u32 4788187, %v1961_v22  ;;  %v2023_v32 = vsel %vm2019_vm3, %v2003_v59, %v2006_v26  ;;  %v2024_v40 = vsel %vm2022_vm9, %v2012_v17, 2102212464 }
 0x244   :  { %v2028_v2 = vsel %vm2022_vm9, %v2015_v20, 920167782  ;;  %v2025_v5 = vsel %vm2021_vm12, %v2009_v16, %v2024_v40  ;;  %v2031_v1 = vsel %vm2019_vm3, %v2009_v16, %v2012_v17  ;;  %v2032_v42 = vsel %vm2022_vm9, %v2018_v34, 1326507024 }
 0x245   :  { %v2029_v11 = vsel %vm2021_vm12, %v2012_v17, %v2028_v2  ;;  %v1867_v8 = vsel %vm5465_vm11, %v5197_v7, %v1864_v41  ;;  %v1963_v0 = vand.u32 2147483647, %v1962_v19  ;;  %v2033_v38 = vsel %vm2021_vm12, %v2015_v20, %v2032_v42  ;;  %v6368_v17 = vld [vmem:[#allocation47_spill] sm:$0xff] }
 0x246   :  { %v2030_v53 = vsel %vm2020_vm10, %v2027_v44, %v2029_v11  ;;  %v1965_v54 = vcvt.s32.f32 %v1958_v47  ;;  %v2034_v56 = vsel %vm2020_vm10, %v2031_v1, %v2033_v38  ;;  %v2026_v59 = vsel %vm2020_vm10, %v2023_v32, %v2025_v5 }
 0x247   :  { %v5488_v33 = vmul.u32.u64.low %v5454_v25, %v2030_v53  ;;  %v5489_v51 = vmul.u32.u64.high %v5454_v25, %v2030_v53, %v5488_v33  ;;  %v5494_v26 = vmul.u32.u64.low %v5454_v25, %v2034_v56  ;;  %v5495_v27 = vmul.u32.u64.high %v5454_v25, %v2034_v56, %v5494_v26  ;;  %v6372_v56 = vld [vmem:[#allocation52_spill] sm:$0xff] }
 0x248   :  { %v1248_v39 = vadd.s32 3, %v1244_v48  ;;  %v5500_v41 = vsel %vm1677_vm8, %v1759_v30, %v5433_v4  ;;  %vm1885_vm6 = vcmp.lt.s32.totalorder %v5230_v28, 0  ;;  %v1966_v36 = vmul.f32 %v1965_v54, %v1963_v0  ;;  %v6367_v4 = vld [vmem:[#allocation60_spill] sm:$0xff] }
 0x249   :  { %vm1247_vm15 = vweird.f32 %v6360_v57  ;;  %v1345_v43 = vsub.s32 4, %v6366_v23  ;;  %3504 = vcosq.f32 %v1867_v8  ;;  %v1252_v46 = vxor.u32 2147483648, %v5000_v58 }
 0x24a   :  { %v1249_v31 = vand.u32 3, %v1248_v39  ;;  %v1255_v37 = vxor.u32 2147483648, %v4981_v24  ;;  %3506 = vsinq.f32 %v1867_v8  ;;  %v2042_v48 = vmul.u32 %v5454_v25, %v2026_v59  ;;  %v6371_v8 = vld [vmem:[#allocation20_spill] sm:$0xff]  ;;  %v6374_v39 = vld [vmem:[#allocation55_spill] sm:$0xff] }
 0x24b   :  { %v2045_v16 = vadd.s32 1, %v5489_v51  ;;  %v1449_v30 = vsub.s32 4, %v6367_v4  ;;  %vm2044_vm1 = vc.u32 %v5495_v27, %v5488_v33  ;;  %v2117_v22 = vadd.f32 %v5461_v45, %v6368_v17  ;;  %v6373_v59 = vld [vmem:[#allocation32_spill] sm:$0xff] }
 0x24c   :  { %vm6369_vm2 = vcmp.lt.s32.totalorder %v6280_v49, 0  ;;  %v1356_v34 = vxor.u32 2147483648, %v5014_v6  ;;  %v1967_v47 = vxor.u32 2147483648, %v1966_v36  ;;  %vm1251_vm4 = vcmp.eq.s32.totalorder %v1249_v31, 0 }
 0x24d   :  { %v1346_v20 = vsel %vm6369_vm2, %v1345_v43, %v6366_v23  ;;  %v2046_v44 = vsel %vm2044_vm1, %v2045_v16, %v5489_v51  ;;  %vm1254_vm3 = vcmp.eq.s32.totalorder %v1249_v31, 2  ;;  %vm1250_vm10 = vcmp.lt.s32.totalorder %v1249_v31, 2 }
 0x24e   :  { %v2047_v25 = vadd.s32 %v2046_v44, %v2042_v48  ;;  %v1253_v19 = vsel %vm1251_vm4, %v4981_v24, %v1252_v46  ;;  %v1256_v32 = vsel %vm1254_vm3, %v1255_v37, %v5000_v58  ;;  %vm1351_vm12 = vweird.f32 %v6280_v49 }
 0x24f   :  { %v1257_v45 = vsel %vm1250_vm10, %v1253_v19, %v1256_v32  ;;  %v1348_v40 = vsel %vm4876_vm13, 0, %v1346_v20  ;;  %v1359_v2 = vxor.u32 2147483648, %v5006_v55  ;;  %vm6370_vm9 = vcmp.lt.s32.totalorder %v4450_v60, 0  ;;  %v6380_v32 = vld [vmem:[#allocation24_spill] sm:$0xff] }
 0x250   :  { %v1450_v5 = vsel %vm6370_vm9, %v1449_v30, %v6367_v4  ;;  %v2048_v11 = vadd.s32 536870912, %v2047_v25  ;;  %v1258_v1 = vsel %vm1247_vm15, nan, %v1257_v45  ;;  %v1352_v42 = vadd.s32 3, %v1348_v40  ;;  %v6381_v40 = vld [vmem:[#allocation30_spill] sm:$0xff] }
 0x251   :  { %v1452_v24 = vsel %vm4910_vm0, 0, %v1450_v5  ;;  %v2102_v58 = vmul.f32 %v5031_v61, %v1258_v1  ;;  %vm1455_vm1 = vweird.f32 %v4450_v60  ;;  %v1553_v0 = vsub.s32 4, %v6371_v8 }
 0x252   :  { %v1456_v3 = vadd.s32 3, %v1452_v24  ;;  %v5537_v53 = vsel %vm1885_vm6, %v1967_v47, %v1966_v36  ;;  %v5539_v38 = vshrl.u32 %v2048_v11, 30  ;;  %v1353_v54 = vand.u32 3, %v1352_v42  ;;  %v6382_v24 = vld [vmem:[#allocation58_spill] sm:$0xff] }
 0x253   :  { %v1460_v57 = vxor.u32 2147483648, %v5033_v14  ;;  %v2118_v51 = vadd.f32 %v2102_v58, %v6372_v56  ;;  %v1463_v26 = vxor.u32 2147483648, %v6373_v59  ;;  %vm6375_vm13 = vcmp.lt.s32.totalorder %v6374_v39, 0  ;;  %v5547_v43 = vpop.eup %3504 }
 0x254   :  { %v1457_v18 = vand.u32 3, %v1456_v3  ;;  %v1554_v23 = vsel %vm6375_vm13, %v1553_v0, %v6371_v8  ;;  %v2050_v31 = vshll.u32 %v5539_v38, 30  ;;  %vm1354_vm0 = vcmp.lt.s32.totalorder %v1353_v54, 2  ;;  %v5550_v36 = vpop.eup %3506 }
 0x255   :  { %vm1355_vm15 = vcmp.eq.s32.totalorder %v1353_v54, 0  ;;  %vm1358_vm2 = vcmp.eq.s32.totalorder %v1353_v54, 2  ;;  %v2130_v46 = vpack.c.bf16 %v2118_v51, %v2117_v22  ;;  %v1556_v22 = vsel %vm4971_vm14, 0, %v1554_v23 }
 0x256   :  { %v1357_v37 = vsel %vm1355_vm15, %v5006_v55, %v1356_v34  ;;  %v1360_v48 = vsel %vm1358_vm2, %v1359_v2, %v5014_v6  ;;  %vm1458_vm4 = vcmp.lt.s32.totalorder %v1457_v18, 2  ;;  %v5554_v16 = vsub.s32 %v2047_v25, %v2050_v31 }
 0x257   :  { %v1361_v4 = vsel %vm1354_vm0, %v1357_v37, %v1360_v48  ;;  %vm1459_vm3 = vcmp.eq.s32.totalorder %v1457_v18, 0  ;;  %vm1462_vm10 = vcmp.eq.s32.totalorder %v1457_v18, 2  ;;  %2302 = vmatmul.mubr.bf16.gmra.mrb[12].mxu0 %v2130_v46  ;;  %vm1559_vm9 = vweird.f32 %v6374_v39  ;;  %v6388_v48 = vld [vmem:[#allocation27_spill] sm:$0xff] }
 0x258   :  { %v1362_v30 = vsel %vm1351_vm12, nan, %v1361_v4  ;;  %v1461_v17 = vsel %vm1459_vm3, %v6373_v59, %v1460_v57  ;;  %v1464_v20 = vsel %vm1462_vm10, %v1463_v26, %v5033_v14  ;;  %v2053_v55 = vsub.s32 0, %v5554_v16  ;;  %2311 = vmatprep.mubr.bf16.mxu0 %v6342_v35  ;;  %v6387_v57 = vld [vmem:[#allocation59_spill] sm:$0xff] }
 0x259   :  { %v1465_v6 = vsel %vm1458_vm4, %v1461_v17, %v1464_v20  ;;  %v2103_v34 = vmul.f32 %v5031_v61, %v1362_v30  ;;  %v1560_v44 = vadd.s32 3, %v1556_v22  ;;  %v6377_v49 = vand.u32 2147483647, %v5230_v28 }
 0x25a   :  { %v1466_v14 = vsel %vm1455_vm1, nan, %v1465_v6  ;;  %v1564_v19 = vxor.u32 2147483648, %v5289_v15  ;;  %v1567_v45 = vxor.u32 2147483648, %v6380_v32  ;;  %v1657_v2 = vsub.s32 4, %v6381_v40 }
 0x25b   :  { %vm5568_vm12 = vcmp.le.f32.partialorder %v6377_v49, 0.7853982  ;;  %v3193_v5 = vmin.u32 %v2053_v55, %v5554_v16  ;;  %v2104_v11 = vmul.f32 %v5031_v61, %v1466_v14  ;;  %v1561_v1 = vand.u32 3, %v1560_v44 }
 0x25c   :  { %v1668_v42 = vxor.u32 2147483648, %v5352_v63  ;;  %v2119_v58 = vadd.f32 %v2103_v34, %v6382_v24  ;;  %vm6383_vm14 = vcmp.lt.s32.totalorder %v4678_v62, 0  ;;  %v6384_v3 = vand.u32 2147483647, %v4994_v12 }
 0x25d   :  { %v1658_v60 = vsel %vm6383_vm14, %v1657_v2, %v6381_v40  ;;  %v1761_v0 = vsub.s32 4, %v5178_v9  ;;  %v2055_v54 = vclz %v3193_v5  ;;  %v2120_v56 = vadd.f32 %v2104_v11, %v6387_v57  ;;  %v6391_v2 = vld [vmem:[#allocation19_spill] sm:$0xff] }
 0x25e   :  { %vm5586_vm1 = vcmp.le.f32.partialorder %v6384_v3, 0.7853982  ;;  %vm1562_vm13 = vcmp.lt.s32.totalorder %v1561_v1, 2  ;;  %vm1563_vm0 = vcmp.eq.s32.totalorder %v1561_v1, 0  ;;  %vm1566_vm15 = vcmp.eq.s32.totalorder %v1561_v1, 2  ;;  %v6394_v1 = vld [vmem:[#allocation37_spill] sm:$0xff] }
 0x25f   :  { %v1565_v51 = vsel %vm1563_vm0, %v6380_v32, %v1564_v19  ;;  %v1660_v18 = vsel %vm5187_vm5, 0, %v1658_v60  ;;  %v1762_v59 = vsel %vm1677_vm8, %v1761_v0, %v5178_v9  ;;  %v3194_v26 = vadd.s32 4294967294, %v2055_v54 }
 0x260   :  { %v2131_v23 = vpack.c.bf16 %v2120_v56, %v2119_v58  ;;  %v1568_v31 = vsel %vm1566_vm15, %v1567_v45, %v5289_v15  ;;  %v1664_v46 = vadd.s32 3, %v1660_v18  ;;  %v1671_v4 = vxor.u32 2147483648, %v6388_v48  ;;  %v6389_v45 = vld [vmem:[#allocation33_spill] sm:$0xff] }
 0x261   :  { %v1569_v37 = vsel %vm1562_vm13, %v1565_v51, %v1568_v31  ;;  %v1763_v30 = vsel %vm5586_vm1, %v4994_v12, %v5500_v41  ;;  %v1764_v52 = vsel %vm5586_vm1, 0, %v1762_v59  ;;  %vm3195_vm5 = vcmp.lt.s32.totalorder %v3194_v26, 0 }
 0x262   :  { %2312 = vmatmul.mubr.bf16.gmra.mrb[16].mxu0 %v2131_v23  ;;  %v1570_v9 = vsel %vm1559_vm9, nan, %v1569_v37  ;;  %v1665_v17 = vand.u32 3, %v1664_v46  ;;  %3508 = vcosq.f32 %v1763_v30  ;;  %v2043_v15 = vadd.s32 %v5488_v33, %v5495_v27 }
 0x263   :  { %v2058_v20 = vsel %vm3195_vm5, 0, %v3194_v26  ;;  %2321 = vmatprep.mubr.bf16.mxu0 %v6342_v35  ;;  %3510 = vsinq.f32 %v1763_v30  ;;  %v1768_v47 = vadd.s32 3, %v1764_v52  ;;  %v1971_v41 = vsel %vm5568_vm12, %v5230_v28, %v5537_v53 }
 0x264   :  { %v2059_v22 = vsub.s32 32, %v2058_v20  ;;  %v2063_v55 = vsub.s32 4294967266, %v2058_v20  ;;  %v2105_v39 = vmul.f32 %v5031_v61, %v1570_v9  ;;  %v2060_v6 = vshll.u32 %v5554_v16, %v2058_v20  ;;  %v6390_v16 = vld [vmem:[#allocation57_spill] sm:$0xff] }
 0x265   :  { %vm1666_vm8 = vcmp.lt.s32.totalorder %v1665_v17, 2  ;;  %vm1667_vm2 = vcmp.eq.s32.totalorder %v1665_v17, 0  ;;  %vm1670_vm4 = vcmp.eq.s32.totalorder %v1665_v17, 2  ;;  %3512 = vcosq.f32 %v1971_v41 }
 0x266   :  { %v2061_v33 = vshrl.u32 %v2043_v15, %v2059_v22  ;;  %v2064_v27 = vadd.s32 127, %v2063_v55  ;;  %v1669_v34 = vsel %vm1667_vm2, %v6388_v48, %v1668_v42  ;;  %v1672_v44 = vsel %vm1670_vm4, %v1671_v4, %v5352_v63  ;;  %v6395_v55 = vld [vmem:[#allocation36_spill] sm:$0xff] }
 0x267   :  { %vm1663_vm3 = vweird.f32 %v4678_v62  ;;  %v1673_v49 = vsel %vm1666_vm8, %v1669_v34, %v1672_v44  ;;  %v1769_v53 = vand.u32 3, %v1768_v47  ;;  %v1865_v40 = vsub.s32 4, %v6389_v45 }
 0x268   :  { %v2062_v14 = vor.u32 %v2061_v33, %v2060_v6  ;;  %v2065_v19 = vshll.u32 %v2064_v27, 23  ;;  %v1674_v32 = vsel %vm1663_vm3, nan, %v1673_v49  ;;  %v402_v5 = vmul.f32 %v6391_v2, %v6390_v16 }
 0x269   :  { %3514 = vsinq.f32 %v1971_v41  ;;  %vm1989_vm10 = vcmp.lt.s32.totalorder %v5406_v10, 0  ;;  %v2106_v11 = vmul.f32 %v5031_v61, %v1674_v32  ;;  %vm5627_vm9 = vcmp.le.f32.partialorder %v1987_v13, 0.7853982 }
 0x26a   :  { %v2066_v62 = vor.u32 4788187, %v2065_v19  ;;  %v2121_v42 = vadd.f32 %v2105_v39, %v6394_v1  ;;  %v1866_v24 = vsel %vm1781_vm7, %v1865_v40, %v6389_v45  ;;  %v1969_v58 = vsub.s32 4, %v5415_v21  ;;  %v6396_v39 = vld [vmem:[#allocation17_spill] sm:$0xff] }
 0x26b   :  { %v2122_v60 = vadd.f32 %v2106_v11, %v402_v5  ;;  %vm1774_vm14 = vcmp.eq.s32.totalorder %v1769_v53, 2  ;;  %v1868_v3 = vsel %vm5465_vm11, 0, %v1866_v24  ;;  %v1876_v8 = vxor.u32 2147483648, %v5550_v36 }
 0x26c   :  { %v3509_v13 = vpop.eup %3508  ;;  %v2067_v0 = vand.u32 2147483647, %v2066_v62  ;;  %v2069_v54 = vcvt.s32.f32 %v2062_v14  ;;  %v1872_v57 = vadd.s32 3, %v1868_v3  ;;  %v1970_v56 = vsel %vm1885_vm6, %v1969_v58, %v5415_v21  ;;  %v6397_v3 = vld [vmem:[#allocation22_spill] sm:$0xff] }
 0x26d   :  { %v3511_v51 = vpop.eup %3510  ;;  %v2132_v18 = vpack.c.bf16 %v2122_v60, %v2121_v42  ;;  %v1775_v59 = vxor.u32 2147483648, %v3509_v13  ;;  %v1972_v26 = vsel %vm5568_vm12, 0, %v1970_v56  ;;  %v2073_v23 = vsub.s32 4, %v5539_v38  ;;  %v5677_v56 = vld [vmem:[#allocation2] sm:$0xff] }
 0x26e   :  { %v2070_v50 = vmul.f32 %v2069_v54, %v2067_v0  ;;  %v1772_v31 = vxor.u32 2147483648, %v3511_v51  ;;  %v1873_v46 = vand.u32 3, %v1872_v57  ;;  %v1879_v37 = vxor.u32 2147483648, %v5547_v43 }
 0x26f   :  { %2322 = vmatmul.mubr.bf16.gmra.mrb[20].mxu0 %v2132_v18  ;;  %vm1767_vm7 = vweird.f32 %v4994_v12  ;;  %vm1770_vm11 = vcmp.lt.s32.totalorder %v1769_v53, 2  ;;  %vm1771_vm1 = vcmp.eq.s32.totalorder %v1769_v53, 0  ;;  %v1776_v21 = vsel %vm1774_vm14, %v1775_v59, %v3511_v51  ;;  %v3513_v30 = vpop.eup %3512  ;;  %v5679_v51 = vld [vmem:[#allocation2 + $0x8] sm:$0xff] }
 0x270   :  { %v2071_v48 = vxor.u32 2147483648, %v2070_v50  ;;  %2331 = vmatprep.mubr.bf16.mxu0 %v6342_v35  ;;  %v1773_v4 = vsel %vm1771_vm1, %v3509_v13, %v1772_v31  ;;  %vm1875_vm6 = vcmp.eq.s32.totalorder %v1873_v46, 0  ;;  %v1976_v25 = vadd.s32 3, %v1972_v26  ;;  %v3408_v26 = vld [vmem:[#allocation5] ss:$8 sps:$4 sm:$0xff]  }
 0x271   :  { %v1777_v52 = vsel %vm1770_vm11, %v1773_v4, %v1776_v21  ;;  %v1877_v9 = vsel %vm1875_vm6, %v5547_v43, %v1876_v8  ;;  %vm1878_vm12 = vcmp.eq.s32.totalorder %v1873_v46, 2  ;;  %v2074_v17 = vsel %vm1989_vm10, %v2073_v23, %v5539_v38 }
 0x272   :  { %v2072_v12 = vsel %vm1989_vm10, %v2071_v48, %v2070_v50  ;;  %v1778_v15 = vsel %vm1767_vm7, nan, %v1777_v52  ;;  %vm1874_vm13 = vcmp.lt.s32.totalorder %v1873_v46, 2  ;;  %v1880_v20 = vsel %vm1878_vm12, %v1879_v37, %v5550_v36  ;;  %v3413_v52 = vld [vmem:[#allocation5 + $0x14] ss:$8 sps:$4 sm:$0xff]  }
 0x273   :  { %v3515_v47 = vpop.eup %3514  ;;  %v2075_v41 = vsel %vm5627_vm9, %v5406_v10, %v2072_v12  ;;  %vm1871_vm0 = vweird.f32 %v5197_v7  ;;  %v1881_v43 = vsel %vm1874_vm13, %v1877_v9, %v1880_v20  ;;  %v2107_v22 = vmul.f32 %v5031_v61, %v1778_v15  ;;  %v3416_v15 = vld [vmem:[#allocation5 + $0x24] ss:$8 sps:$4 sm:$0xff]   ;;  %v3414_v20 = vld [vmem:[#allocation5 + $0x20] ss:$8 sps:$4 sm:$0xff]  }
 0x274   :  { %v403_v38 = vmul.f32 %v6391_v2, %v6395_v55  ;;  %v404_v6 = vmul.f32 %v6391_v2, %v6396_v39  ;;  %3516 = vcosq.f32 %v2075_v41  ;;  %v1882_v33 = vsel %vm1871_vm0, nan, %v1881_v43 }
 0x275   :  { %3518 = vsinq.f32 %v2075_v41  ;;  %v2108_v36 = vmul.f32 %v5031_v61, %v1882_v33  ;;  %v1977_v27 = vand.u32 3, %v1976_v25  ;;  %v2076_v34 = vsel %vm5627_vm9, 0, %v2074_v17 }
 0x276   :  { %v1980_v44 = vxor.u32 2147483648, %v3515_v47  ;;  %v1983_v7 = vxor.u32 2147483648, %v3513_v30  ;;  %v2123_v49 = vadd.f32 %v2107_v22, %v403_v38  ;;  %v2080_v14 = vadd.s32 3, %v2076_v34  ;;  %v3417_v34 = vld [vmem:[#allocation5 + $0x30] ss:$8 sps:$4 sm:$0xff]  }
 0x277   :  { %v2124_v53 = vadd.f32 %v2108_v36, %v404_v6  ;;  %vm1979_vm15 = vcmp.eq.s32.totalorder %v1977_v27, 0  ;;  %vm1982_vm5 = vcmp.eq.s32.totalorder %v1977_v27, 2  ;;  %vm1978_vm8 = vcmp.lt.s32.totalorder %v1977_v27, 2  ;;  %v3419_v6 = vld [vmem:[#allocation5 + $0x34] ss:$8 sps:$4 sm:$0xff]  }
 0x278   :  { %v1981_v32 = vsel %vm1979_vm15, %v3513_v30, %v1980_v44  ;;  %v1984_v45 = vsel %vm1982_vm5, %v1983_v7, %v3515_v47  ;;  %v2081_v40 = vand.u32 3, %v2080_v14  ;;  %vm1975_vm2 = vweird.f32 %v5230_v28  ;;  %v3411_v30 = vld [vmem:[#allocation5 + $0x10] ss:$8 sps:$4 sm:$0xff]  }
 0x279   :  { %v2133_v19 = vpack.c.bf16 %v2124_v53, %v2123_v49  ;;  %v1985_v16 = vsel %vm1978_vm8, %v1981_v32, %v1984_v45  ;;  %vm2079_vm9 = vweird.f32 %v5406_v10  ;;  %v405_v8 = vmul.f32 %v6391_v2, %v6397_v3  ;;  %v6398_v10 = vld [vmem:[#allocation12_spill] sm:$0xff] }
 0x27a   :  { %v1986_v62 = vsel %vm1975_vm2, nan, %v1985_v16  ;;  %vm2086_vm4 = vcmp.eq.s32.totalorder %v2081_v40, 2  ;;  %vm2083_vm3 = vcmp.eq.s32.totalorder %v2081_v40, 0  ;;  %vm2082_vm10 = vcmp.lt.s32.totalorder %v2081_v40, 2  ;;  %v3422_v32 = vld [vmem:[#allocation5 + $0x44] ss:$8 sps:$4 sm:$0xff]  }
 0x27b   :  { %2332 = vmatmul.mubr.bf16.gmra.mrb[24].mxu0 %v2133_v19  ;;  %v406_v28 = vmul.f32 %v6391_v2, %v5394_v29  ;;  %v5683_v18 = vrot.slane %v5677_v56, %v6398_v10  ;;  %v5687_v59 = vrot.slane %v5679_v51, %v6398_v10  ;;  %v3410_v29 = vld [vmem:[#allocation5 + $0x4] ss:$8 sps:$4 sm:$0xff]   ;;  %v3420_v45 = vld [vmem:[#allocation5 + $0x40] ss:$8 sps:$4 sm:$0xff]   ;;  %v3425_v16 = vld [vmem:[#allocation5 + $0x54] ss:$8 sps:$4 sm:$0xff]  }
 0x27c   :  { %2341 = vmatprep.mubr.bf16.mxu0 %v6342_v35  ;;  %v2109_v35 = vmul.f32 %v5031_v61, %v1986_v62  ;;  %2969 = vmatprep.subr.bf16.mxu0 %v3410_v29  ;;  %v3426_v62 = vld [vmem:[#allocation5 + $0x60] ss:$8 sps:$4 sm:$0xff]   ;;  %v3440_v3 = vld [vmem:[#allocation5 + $0xa4] ss:$8 sps:$4 sm:$0xff]  }
 0x27d   :  { %3244 = vmatprep.subr.bf16.mxu1 %v3410_v29  ;;  %2970 = vmatpush1.bf16.msra.mxu0 %v3408_v26 }
 0x27e   :  { %v3517_v5 = vpop.eup %3516  ;;  %v2125_v0 = vadd.f32 %v2109_v35, %v405_v8  ;;  %3260 = vmatpush1.bf16.msra.mxu1 %v3408_v26  ;;  %2971 = vmatprep.subr.bf16.mxu0 %v3413_v52  ;;  %v3435_v35 = vld [vmem:[#allocation5 + $0x90] ss:$8 sps:$4 sm:$0xff]   ;;  %v3438_v8 = vld [vmem:[#allocation5 + $0xa0] ss:$8 sps:$4 sm:$0xff]  }
 0x27f   :  { %v3519_v11 = vpop.eup %3518  ;;  %v2087_v63 = vxor.u32 2147483648, %v3517_v5  ;;  %3245 = vmatprep.subr.bf16.mxu1 %v3413_v52 }
 0x280   :  { %v2084_v1 = vxor.u32 2147483648, %v3519_v11 }
 0x281   :  { %v2088_v42 = vsel %vm2086_vm4, %v2087_v63, %v3519_v11  ;;  %2972 = vmatpush1.bf16.msra.mxu0 %v3411_v30  ;;  %v3423_v11 = vld [vmem:[#allocation5 + $0x50] ss:$8 sps:$4 sm:$0xff]   ;;  %v3428_v63 = vld [vmem:[#allocation5 + $0x64] ss:$8 sps:$4 sm:$0xff]  }
 0x282   :  { %v2085_v24 = vsel %vm2083_vm3, %v3517_v5, %v2084_v1  ;;  %2973 = vmatprep.subr.bf16.mxu0 %v3416_v15  ;;  %3261 = vmatpush1.bf16.msra.mxu1 %v3411_v30  ;;  %v3431_v1 = vld [vmem:[#allocation5 + $0x74] ss:$8 sps:$4 sm:$0xff]  }
 0x283   :  { %v2089_v58 = vsel %vm2082_vm10, %v2085_v24, %v2088_v42  ;;  %3246 = vmatprep.subr.bf16.mxu1 %v3416_v15  ;;  %v3429_v42 = vld [vmem:[#allocation5 + $0x70] ss:$8 sps:$4 sm:$0xff]   ;;  %v3434_v24 = vld [vmem:[#allocation5 + $0x84] ss:$8 sps:$4 sm:$0xff]  }
 0x284   :  { %v2090_v60 = vsel %vm2079_vm9, nan, %v2089_v58  ;;  %v3432_v58 = vld [vmem:[#allocation5 + $0x80] ss:$8 sps:$4 sm:$0xff]  }
 0x285   :  { %v2110_v13 = vmul.f32 %v5031_v61, %v2090_v60  ;;  %2974 = vmatpush1.bf16.msra.mxu0 %v3414_v20  ;;  %v3437_v60 = vld [vmem:[#allocation5 + $0x94] ss:$8 sps:$4 sm:$0xff]  }
 0x286   :  { %2975 = vmatprep.subr.bf16.mxu0 %v3419_v6  ;;  %3262 = vmatpush1.bf16.msra.mxu1 %v3414_v20  ;;  %v3447_v20 = vld [vmem:[#allocation5 + $0xd0] ss:$8 sps:$4 sm:$0xff]  }
 0x287   :  { %v2126_v54 = vadd.f32 %v2110_v13, %v406_v28  ;;  %3247 = vmatprep.subr.bf16.mxu1 %v3419_v6  ;;  %v3443_v13 = vld [vmem:[#allocation5 + $0xb4] ss:$8 sps:$4 sm:$0xff]  }
 0x289   :  { %v2134_v57 = vpack.c.bf16 %v2126_v54, %v2125_v0  ;;  %2976 = vmatpush1.bf16.msra.mxu0 %v3417_v34 }
 0x28a   :  { %2977 = vmatprep.subr.bf16.mxu0 %v3422_v32  ;;  %3263 = vmatpush1.bf16.msra.mxu1 %v3417_v34 }
 0x28b   :  { %2342 = vmatmul.mubr.bf16.gmra.mrb[28].mxu0 %v2134_v57  ;;  %3248 = vmatprep.subr.bf16.mxu1 %v3422_v32 }
 0x28d   :  { %2978 = vmatpush1.bf16.msra.mxu0 %v3420_v45 }
 0x28e   :  { %2979 = vmatprep.subr.bf16.mxu0 %v3425_v16  ;;  %3264 = vmatpush1.bf16.msra.mxu1 %v3420_v45 }
 0x28f   :  { %3249 = vmatprep.subr.bf16.mxu1 %v3425_v16 }
 0x291   :  { %2980 = vmatpush1.bf16.msra.mxu0 %v3423_v11 }
 0x292   :  { %2981 = vmatprep.subr.bf16.mxu0 %v3428_v63  ;;  %3265 = vmatpush1.bf16.msra.mxu1 %v3423_v11 }
 0x293   :  { %3250 = vmatprep.subr.bf16.mxu1 %v3428_v63 }
 0x295   :  { %2982 = vmatpush1.bf16.msra.mxu0 %v3426_v62 }
 0x296   :  { %2983 = vmatprep.subr.bf16.mxu0 %v3431_v1  ;;  %3266 = vmatpush1.bf16.msra.mxu1 %v3426_v62 }
 0x297   :  { %3251 = vmatprep.subr.bf16.mxu1 %v3431_v1 }
 0x299   :  { %2984 = vmatpush1.bf16.msra.mxu0 %v3429_v42 }
 0x29a   :  { %2985 = vmatprep.subr.bf16.mxu0 %v3434_v24  ;;  %3267 = vmatpush1.bf16.msra.mxu1 %v3429_v42 }
 0x29b   :  { %3252 = vmatprep.subr.bf16.mxu1 %v3434_v24 }
 0x29d   :  { %2986 = vmatpush1.bf16.msra.mxu0 %v3432_v58 }
 0x29e   :  { %3268 = vmatpush1.bf16.msra.mxu1 %v3432_v58  ;;  %2987 = vmatprep.subr.bf16.mxu0 %v3437_v60 }
 0x29f   :  { %3253 = vmatprep.subr.bf16.mxu1 %v3437_v60 }
 0x2a1   :  { %2988 = vmatpush1.bf16.msra.mxu0 %v3435_v35 }
 0x2a2   :  { %3269 = vmatpush1.bf16.msra.mxu1 %v3435_v35  ;;  %2989 = vmatprep.subr.bf16.mxu0 %v3440_v3 }
 0x2a3   :  { %3254 = vmatprep.subr.bf16.mxu1 %v3440_v3 }
 0x2a5   :  { %2990 = vmatpush1.bf16.msra.mxu0 %v3438_v8 }
 0x2a6   :  { %3270 = vmatpush1.bf16.msra.mxu1 %v3438_v8  ;;  %2991 = vmatprep.subr.bf16.mxu0 %v3443_v13 }
 0x2a7   :  { %3255 = vmatprep.subr.bf16.mxu1 %v3443_v13 }
 0x2d7   :  { %v2273_v2 = vpop.f32.mrb[0].mxu0 }
 0x2d8   :  { %v5690_v61 = vadd.f32 %v2273_v2, %v5683_v18  ;;  %v2275_v23 = vpop.f32.mrb[1].mxu0  ;;  %v3441_v2 = vld [vmem:[#allocation5 + $0xb0] ss:$8 sps:$4 sm:$0xff]  }
 0x2d9   :  { %v5693_v50 = vadd.f32 %v2275_v23, %v5687_v59  ;;  %v2277_v31 = vpop.f32.mrb[2].mxu0  ;;  %2992 = vmatpush1.bf16.msra.mxu0 %v3441_v2  ;;  %3271 = vmatpush1.bf16.msra.mxu1 %v3441_v2 }
 0x2da   :  { %v5696_v46 = vadd.f32 %v2277_v31, %v5683_v18  ;;  %v2279_v37 = vpop.f32.mrb[3].mxu0  ;;  %v2417_v4 = vmul.f32 %v5690_v61, %v5690_v61 }
 0x2db   :  { %v5699_v21 = vadd.f32 %v2279_v37, %v5687_v59  ;;  %v2352_v48 = vadd.f32 %v5693_v50, %v5690_v61  ;;  %v2418_v25 = vmul.f32 %v5693_v50, %v5693_v50  ;;  %v3446_v37 = vld [vmem:[#allocation5 + $0xc4] ss:$8 sps:$4 sm:$0xff]  }
 0x2dc   :  { %v2419_v17 = vmul.f32 %v5696_v46, %v5696_v46  ;;  %2993 = vmatprep.subr.bf16.mxu0 %v3446_v37  ;;  %3256 = vmatprep.subr.bf16.mxu1 %v3446_v37 }
 0x2dd   :  { %2353 = vadd.xlane.f32.xlu0 %v2352_v48  ;;  %v2355_v9 = vadd.f32 %v5699_v21, %v5696_v46  ;;  %v2420_v12 = vmul.f32 %v5699_v21, %v5699_v21  ;;  %v2449_v41 = vadd.f32 %v2418_v25, %v2417_v4 }
 0x2df   :  { %2356 = vadd.xlane.f32.xlu1 %v2355_v9  ;;  %v2283_v47 = vpop.f32.mrb[4].mxu0  ;;  %v2452_v39 = vadd.f32 %v2420_v12, %v2419_v17  ;;  %v3444_v9 = vld [vmem:[#allocation5 + $0xc0] ss:$8 sps:$4 sm:$0xff]   ;;  %v3449_v12 = vld [vmem:[#allocation5 + $0xd4] ss:$8 sps:$4 sm:$0xff]  }
 0x2e0   :  { %v5714_v43 = vadd.f32 %v2283_v47, %v5683_v18  ;;  %v2285_v22 = vpop.f32.mrb[5].mxu0  ;;  %2994 = vmatpush1.bf16.msra.mxu0 %v3444_v9  ;;  %3272 = vmatpush1.bf16.msra.mxu1 %v3444_v9  ;;  %v3450_v47 = vld [vmem:[#allocation5 + $0xe0] ss:$8 sps:$4 sm:$0xff]  }
 0x2e1   :  { %v5717_v55 = vadd.f32 %v2285_v22, %v5687_v59  ;;  %2450 = vadd.xlane.f32.xlu0 %v2449_v41  ;;  %v2287_v38 = vpop.f32.mrb[6].mxu0  ;;  %2995 = vmatprep.subr.bf16.mxu0 %v3449_v12  ;;  %v3452_v41 = vld [vmem:[#allocation5 + $0xe4] ss:$8 sps:$4 sm:$0xff]   ;;  %v3453_v22 = vld [vmem:[#allocation5 + $0xf0] ss:$8 sps:$4 sm:$0xff]  }
 0x2e2   :  { %v5720_v33 = vadd.f32 %v2287_v38, %v5683_v18  ;;  %v2289_v36 = vpop.f32.mrb[7].mxu0  ;;  %v2421_v27 = vmul.f32 %v5714_v43, %v5714_v43  ;;  %3257 = vmatprep.subr.bf16.mxu1 %v3449_v12  ;;  %v3455_v38 = vld [vmem:[#allocation5 + $0xf4] ss:$8 sps:$4 sm:$0xff]  }
 0x2e3   :  { %v5725_v44 = vadd.f32 %v2289_v36, %v5687_v59  ;;  %2453 = vadd.xlane.f32.xlu1 %v2452_v39  ;;  %v2358_v7 = vadd.f32 %v5717_v55, %v5714_v43  ;;  %v2422_v49 = vmul.f32 %v5717_v55, %v5717_v55 }
 0x2e4   :  { %v2423_v14 = vmul.f32 %v5720_v33, %v5720_v33  ;;  %2996 = vmatpush1.bf16.msra.mxu0 %v3447_v20  ;;  %3273 = vmatpush1.bf16.msra.mxu1 %v3447_v20 }
 0x2e5   :  { %2359 = vadd.xlane.f32.xlu0 %v2358_v7  ;;  %v2361_v53 = vadd.f32 %v5725_v44, %v5720_v33  ;;  %v2424_v19 = vmul.f32 %v5725_v44, %v5725_v44  ;;  %v2455_v40 = vadd.f32 %v2422_v49, %v2421_v27  ;;  %2997 = vmatprep.subr.bf16.mxu0 %v3452_v41 }
 0x2e6   :  { %3258 = vmatprep.subr.bf16.mxu1 %v3452_v41 }
 0x2e7   :  { %2362 = vadd.xlane.f32.xlu1 %v2361_v53  ;;  %v2458_v5 = vadd.f32 %v2424_v19, %v2423_v14 }
 0x2e8   :  { %2998 = vmatpush1.bf16.msra.mxu0 %v3450_v47  ;;  %3274 = vmatpush1.bf16.msra.mxu1 %v3450_v47 }
 0x2e9   :  { %2456 = vadd.xlane.f32.xlu0 %v2455_v40  ;;  %2999 = vmatprep.subr.bf16.mxu0 %v3455_v38 }
 0x2ea   :  { %3259 = vmatprep.subr.bf16.mxu1 %v3455_v38 }
 0x2eb   :  { %2459 = vadd.xlane.f32.xlu1 %v2458_v5 }
 0x2ec   :  { %3000 = vmatpush1.bf16.msra.mxu0 %v3453_v22  ;;  %3275 = vmatpush1.bf16.msra.mxu1 %v3453_v22 }
 0x307   :  { %v2293_v28 = vpop.f32.mrb[8].mxu0 }
 0x308   :  { %v5738_v0 = vadd.f32 %v2293_v28, %v5683_v18  ;;  %v2295_v54 = vpop.f32.mrb[9].mxu0 }
 0x309   :  { %v5741_v57 = vadd.f32 %v2295_v54, %v5687_v59  ;;  %v2297_v10 = vpop.f32.mrb[10].mxu0 }
 0x30a   :  { %v5744_v26 = vadd.f32 %v2297_v10, %v5683_v18  ;;  %v2299_v29 = vpop.f32.mrb[11].mxu0  ;;  %v2425_v30 = vmul.f32 %v5738_v0, %v5738_v0 }
 0x30b   :  { %v5747_v23 = vadd.f32 %v2299_v29, %v5687_v59  ;;  %v2364_v31 = vadd.f32 %v5741_v57, %v5738_v0  ;;  %v2426_v52 = vmul.f32 %v5741_v57, %v5741_v57 }
 0x30c   :  { %v2427_v48 = vmul.f32 %v5744_v26, %v5744_v26 }
 0x30d   :  { %2365 = vadd.xlane.f32.xlu1 %v2364_v31  ;;  %v2367_v4 = vadd.f32 %v5747_v23, %v5744_v26  ;;  %v2428_v25 = vmul.f32 %v5747_v23, %v5747_v23  ;;  %v2461_v15 = vadd.f32 %v2426_v52, %v2425_v30 }
 0x30f   :  { %2368 = vadd.xlane.f32.xlu0 %v2367_v4  ;;  %v2464_v17 = vadd.f32 %v2428_v25, %v2427_v48 }
 0x311   :  { %2465 = vadd.xlane.f32.xlu1 %v2464_v17 }
 0x313   :  { %2462 = vadd.xlane.f32.xlu0 %v2461_v15 }
 0x32a   :  { %v2303_v39 = vpop.f32.mrb[12].mxu0 }
 0x32b   :  { %v5762_v6 = vadd.f32 %v2303_v39, %v5683_v18  ;;  %v2305_v36 = vpop.f32.mrb[13].mxu0 }
 0x32c   :  { %v5765_v27 = vadd.f32 %v2305_v36, %v5687_v59  ;;  %v2307_v34 = vpop.f32.mrb[14].mxu0 }
 0x32d   :  { %v5768_v7 = vadd.f32 %v2307_v34, %v5683_v18  ;;  %v2309_v49 = vpop.f32.mrb[15].mxu0  ;;  %v2429_v19 = vmul.f32 %v5762_v6, %v5762_v6 }
 0x32e   :  { %v5771_v53 = vadd.f32 %v2309_v49, %v5687_v59  ;;  %v2370_v14 = vadd.f32 %v5765_v27, %v5762_v6  ;;  %v2430_v32 = vmul.f32 %v5765_v27, %v5765_v27 }
 0x32f   :  { %v2431_v40 = vmul.f32 %v5768_v7, %v5768_v7 }
 0x330   :  { %2371 = vadd.xlane.f32.xlu0 %v2370_v14  ;;  %v2373_v45 = vadd.f32 %v5771_v53, %v5768_v7  ;;  %v2432_v16 = vmul.f32 %v5771_v53, %v5771_v53  ;;  %v2467_v5 = vadd.f32 %v2430_v32, %v2429_v19 }
 0x332   :  { %2374 = vadd.xlane.f32.xlu1 %v2373_v45  ;;  %v2470_v63 = vadd.f32 %v2432_v16, %v2431_v40 }
 0x334   :  { %2468 = vadd.xlane.f32.xlu0 %v2467_v5 }
 0x335   :  { %v2313_v11 = vpop.f32.mrb[16].mxu0 }
 0x336   :  { %v5786_v62 = vadd.f32 %v2313_v11, %v5683_v18  ;;  %v2315_v1 = vpop.f32.mrb[17].mxu0  ;;  %2471 = vadd.xlane.f32.xlu1 %v2470_v63 }
 0x337   :  { %v5789_v42 = vadd.f32 %v2315_v1, %v5687_v59  ;;  %v2317_v24 = vpop.f32.mrb[18].mxu0 }
 0x338   :  { %v5792_v58 = vadd.f32 %v2317_v24, %v5683_v18  ;;  %v2319_v35 = vpop.f32.mrb[19].mxu0  ;;  %v2433_v8 = vmul.f32 %v5786_v62, %v5786_v62 }
 0x339   :  { %v5795_v60 = vadd.f32 %v2319_v35, %v5687_v59  ;;  %v2376_v3 = vadd.f32 %v5789_v42, %v5786_v62  ;;  %v2434_v28 = vmul.f32 %v5789_v42, %v5789_v42 }
 0x33a   :  { %v2435_v54 = vmul.f32 %v5792_v58, %v5792_v58 }
 0x33b   :  { %2377 = vadd.xlane.f32.xlu0 %v2376_v3  ;;  %v2379_v13 = vadd.f32 %v5795_v60, %v5792_v58  ;;  %v2436_v10 = vmul.f32 %v5795_v60, %v5795_v60  ;;  %v2473_v29 = vadd.f32 %v2434_v28, %v2433_v8 }
 0x33d   :  { %2380 = vadd.xlane.f32.xlu1 %v2379_v13  ;;  %v2476_v2 = vadd.f32 %v2436_v10, %v2435_v54 }
 0x33f   :  { %2474 = vadd.xlane.f32.xlu0 %v2473_v29 }
 0x341   :  { %2477 = vadd.xlane.f32.xlu1 %v2476_v2 }
 0x342   :  { %v2323_v31 = vpop.f32.mrb[20].mxu0 }
 0x343   :  { %v5810_v37 = vadd.f32 %v2323_v31, %v5683_v18  ;;  %v2325_v48 = vpop.f32.mrb[21].mxu0 }
 0x344   :  { %v5813_v4 = vadd.f32 %v2325_v48, %v5687_v59  ;;  %v2327_v25 = vpop.f32.mrb[22].mxu0 }
 0x345   :  { %v5816_v30 = vadd.f32 %v2327_v25, %v5683_v18  ;;  %v2329_v52 = vpop.f32.mrb[23].mxu0  ;;  %v2437_v12 = vmul.f32 %v5810_v37, %v5810_v37 }
 0x346   :  { %v5819_v9 = vadd.f32 %v2329_v52, %v5687_v59  ;;  %v2382_v17 = vadd.f32 %v5813_v4, %v5810_v37  ;;  %v2438_v15 = vmul.f32 %v5813_v4, %v5813_v4 }
 0x347   :  { %v2439_v47 = vmul.f32 %v5816_v30, %v5816_v30 }
 0x348   :  { %2383 = vadd.xlane.f32.xlu0 %v2382_v17  ;;  %v2385_v20 = vadd.f32 %v5819_v9, %v5816_v30  ;;  %v2440_v41 = vmul.f32 %v5819_v9, %v5819_v9  ;;  %v2479_v22 = vadd.f32 %v2438_v15, %v2437_v12 }
 0x34a   :  { %2386 = vadd.xlane.f32.xlu1 %v2385_v20  ;;  %v2482_v38 = vadd.f32 %v2440_v41, %v2439_v47 }
 0x34c   :  { %2480 = vadd.xlane.f32.xlu0 %v2479_v22 }
 0x34e   :  { %2483 = vadd.xlane.f32.xlu1 %v2482_v38  ;;  %v2333_v39 = vpop.f32.mrb[24].mxu0 }
 0x34f   :  { %v5834_v36 = vadd.f32 %v2333_v39, %v5683_v18  ;;  %v2335_v34 = vpop.f32.mrb[25].mxu0 }
 0x350   :  { %v5837_v49 = vadd.f32 %v2335_v34, %v5687_v59  ;;  %v2337_v14 = vpop.f32.mrb[26].mxu0 }
 0x351   :  { %v5840_v19 = vadd.f32 %v2337_v14, %v5683_v18  ;;  %v2339_v32 = vpop.f32.mrb[27].mxu0  ;;  %v2441_v16 = vmul.f32 %v5834_v36, %v5834_v36 }
 0x352   :  { %v5843_v45 = vadd.f32 %v2339_v32, %v5687_v59  ;;  %v2388_v40 = vadd.f32 %v5837_v49, %v5834_v36  ;;  %v2442_v5 = vmul.f32 %v5837_v49, %v5837_v49 }
 0x353   :  { %v2443_v63 = vmul.f32 %v5840_v19, %v5840_v19 }
 0x354   :  { %2389 = vadd.xlane.f32.xlu0 %v2388_v40  ;;  %v2391_v11 = vadd.f32 %v5843_v45, %v5840_v19  ;;  %v2444_v1 = vmul.f32 %v5843_v45, %v5843_v45  ;;  %v2485_v24 = vadd.f32 %v2442_v5, %v2441_v16 }
 0x356   :  { %2392 = vadd.xlane.f32.xlu1 %v2391_v11  ;;  %v2488_v35 = vadd.f32 %v2444_v1, %v2443_v63 }
 0x358   :  { %2486 = vadd.xlane.f32.xlu0 %v2485_v24 }
 0x35a   :  { %2489 = vadd.xlane.f32.xlu1 %v2488_v35 }
 0x35e   :  { %v2343_v3 = vpop.f32.mrb[28].mxu0 }
 0x35f   :  { %v5858_v8 = vadd.f32 %v2343_v3, %v5683_v18  ;;  %v2345_v28 = vpop.f32.mrb[29].mxu0 }
 0x360   :  { %v5861_v13 = vadd.f32 %v2345_v28, %v5687_v59  ;;  %v2347_v54 = vpop.f32.mrb[30].mxu0 }
 0x361   :  { %v5864_v10 = vadd.f32 %v2347_v54, %v5683_v18  ;;  %v2349_v29 = vpop.f32.mrb[31].mxu0  ;;  %v2445_v48 = vmul.f32 %v5858_v8, %v5858_v8 }
 0x362   :  { %v5867_v2 = vadd.f32 %v2349_v29, %v5687_v59  ;;  %v2394_v31 = vadd.f32 %v5861_v13, %v5858_v8  ;;  %v2446_v25 = vmul.f32 %v5861_v13, %v5861_v13 }
 0x363   :  { %v2447_v18 = vmul.f32 %v5864_v10, %v5864_v10 }
 0x364   :  { %2395 = vadd.xlane.f32.xlu0 %v2394_v31  ;;  %v2397_v52 = vadd.f32 %v5867_v2, %v5864_v10  ;;  %v2448_v59 = vmul.f32 %v5867_v2, %v5867_v2  ;;  %v2491_v17 = vadd.f32 %v2446_v25, %v2445_v48 }
 0x366   :  { %2398 = vadd.xlane.f32.xlu1 %v2397_v52  ;;  %v2494_v12 = vadd.f32 %v2448_v59, %v2447_v18 }
 0x368   :  { %2492 = vadd.xlane.f32.xlu0 %v2491_v17  ;;  %v6399_v17 = vld [vmem:[#allocation13_spill] sm:$0xff] }
 0x36a   :  { %2495 = vadd.xlane.f32.xlu1 %v2494_v12  ;;  %v2354_v15 = vpop.xlane.xlu0 %2353  ;;  %v5883_v12 = vrot.slane %v5677_v56, %v6399_v17 }
 0x36b   :  { %v2401_v20 = vmul.f32 0.00390625, %v2354_v15 }
 0x36c   :  { %v2357_v47 = vpop.xlane.xlu1 %2356 }
 0x36d   :  { %v2402_v41 = vmul.f32 0.00390625, %v2357_v47  ;;  %v2513_v38 = vmul.f32 %v2401_v20, %v2401_v20  ;;  %v2545_v15 = vsub.f32 %v5690_v61, %v2401_v20  ;;  %v2546_v47 = vsub.f32 %v5693_v50, %v2401_v20 }
 0x36e   :  { %v2451_v22 = vpop.xlane.xlu0 %2450 }
 0x36f   :  { %v2497_v39 = vmul.f32 0.00390625, %v2451_v22  ;;  %v2514_v32 = vmul.f32 %v2402_v41, %v2402_v41  ;;  %v5889_v22 = vrot.slane %v5679_v51, %v6399_v17  ;;  %v2548_v61 = vsub.f32 %v5699_v21, %v2402_v41 }
 0x370   :  { %v2454_v34 = vpop.xlane.xlu1 %2453 }
 0x371   :  { %v2529_v14 = vsub.f32 %v2497_v39, %v2513_v38  ;;  %v2498_v40 = vmul.f32 0.00390625, %v2454_v34  ;;  %v6400_v39 = vld [vmem:[#allocation15_spill] sm:$0xff] }
 0x372   :  { %v2360_v16 = vpop.xlane.xlu0 %2359  ;;  %v5893_v34 = vrot.slane %v5677_v56, %v6400_v39 }
 0x373   :  { %v2577_v5 = vadd.f32 1e-05, %v2529_v14  ;;  %v2530_v11 = vsub.f32 %v2498_v40, %v2514_v32  ;;  %v2403_v63 = vmul.f32 0.00390625, %v2360_v16  ;;  %v5897_v14 = vrot.slane %v5679_v51, %v6400_v39 }
 0x374   :  { %v2363_v1 = vpop.xlane.xlu1 %2362  ;;  %v2547_v32 = vsub.f32 %v5696_v46, %v2402_v41 }
 0x375   :  { %3520 = vrsqrt.f32 %v2577_v5  ;;  %v2578_v24 = vadd.f32 1e-05, %v2530_v11  ;;  %v2404_v35 = vmul.f32 0.00390625, %v2363_v1  ;;  %v2515_v28 = vmul.f32 %v2403_v63, %v2403_v63 }
 0x376   :  { %v2457_v3 = vpop.xlane.xlu0 %2456  ;;  %v2549_v46 = vsub.f32 %v5714_v43, %v2403_v63  ;;  %v2550_v21 = vsub.f32 %v5717_v55, %v2403_v63 }
 0x377   :  { %3522 = vrsqrt.f32 %v2578_v24  ;;  %v2499_v54 = vmul.f32 0.00390625, %v2457_v3  ;;  %v2516_v48 = vmul.f32 %v2404_v35, %v2404_v35 }
 0x378   :  { %v2460_v29 = vpop.xlane.xlu1 %2459 }
 0x379   :  { %v2531_v31 = vsub.f32 %v2499_v54, %v2515_v28  ;;  %v2500_v25 = vmul.f32 0.00390625, %v2460_v29  ;;  %v2552_v29 = vsub.f32 %v5725_v44, %v2404_v35 }
 0x37b   :  { %v2579_v52 = vadd.f32 1e-05, %v2531_v31  ;;  %v2532_v18 = vsub.f32 %v2500_v25, %v2516_v48 }
 0x37d   :  { %3524 = vrsqrt.f32 %v2579_v52  ;;  %v2580_v59 = vadd.f32 1e-05, %v2532_v18 }
 0x37f   :  { %v3521_v38 = vpop.eup %3520  ;;  %3526 = vrsqrt.f32 %v2580_v59 }
 0x380   :  { %v2609_v40 = vmul.f32 %v3521_v38, %v2545_v15  ;;  %v2610_v50 = vmul.f32 %v3521_v38, %v2546_v47  ;;  %v2551_v15 = vsub.f32 %v5720_v33, %v2404_v35 }
 0x381   :  { %v3523_v20 = vpop.eup %3522 }
 0x382   :  { %v2611_v16 = vmul.f32 %v3523_v20, %v2547_v32  ;;  %v2612_v5 = vmul.f32 %v3523_v20, %v2548_v61  ;;  %v2650_v11 = vmul.f32 %v5889_v22, %v2610_v50  ;;  %v2649_v1 = vmul.f32 %v5883_v12, %v2609_v40 }
 0x384   :  { %v2652_v56 = vmul.f32 %v5889_v22, %v2612_v5  ;;  %v2690_v24 = vadd.f32 %v5897_v14, %v2650_v11  ;;  %v2651_v51 = vmul.f32 %v5883_v12, %v2611_v16  ;;  %v2689_v3 = vadd.f32 %v5893_v34, %v2649_v1 }
 0x386   :  { %v2692_v41 = vadd.f32 %v5897_v14, %v2652_v56  ;;  %v2691_v28 = vadd.f32 %v5893_v34, %v2651_v51  ;;  %v2722_v31 = vmax.f32 %v2690_v24, 0.0  ;;  %v2721_v48 = vmax.f32 %v2689_v3, 0.0 }
 0x387   :  { %v3525_v54 = vpop.eup %3524 }
 0x388   :  { %v2724_v25 = vmax.f32 %v2692_v41, 0.0  ;;  %v2723_v52 = vmax.f32 %v2691_v28, 0.0  ;;  %v2614_v18 = vmul.f32 %v3525_v54, %v2550_v21  ;;  %v2613_v59 = vmul.f32 %v3525_v54, %v2549_v46 }
 0x389   :  { %v3527_v17 = vpop.eup %3526 }
 0x38a   :  { %v2754_v47 = vpack.c.bf16 %v2724_v25, %v2722_v31  ;;  %v2753_v43 = vpack.c.bf16 %v2723_v52, %v2721_v48  ;;  %v2616_v38 = vmul.f32 %v3527_v17, %v2552_v29  ;;  %v2654_v55 = vmul.f32 %v5889_v22, %v2614_v18 }
 0x38b   :  { %v2615_v63 = vmul.f32 %v3527_v17, %v2551_v15  ;;  %v2653_v39 = vmul.f32 %v5883_v12, %v2613_v59 }
 0x38c   :  { %3001 = vmatprep.mubr.bf16.mxu0 %v2754_v47  ;;  %v2656_v44 = vmul.f32 %v5889_v22, %v2616_v38  ;;  %v2694_v32 = vadd.f32 %v5897_v14, %v2654_v55 }
 0x38d   :  { %3002 = vmatmul.mubr.bf16.vlgmr.msra.gmra.mrb[32].mxu0 %v2753_v43  ;;  %v2655_v61 = vmul.f32 %v5883_v12, %v2615_v63  ;;  %v2693_v40 = vadd.f32 %v5893_v34, %v2653_v39 }
 0x38e   :  { %v2696_v33 = vadd.f32 %v5897_v14, %v2656_v44  ;;  %v2726_v50 = vmax.f32 %v2694_v32, 0.0 }
 0x38f   :  { %v2695_v35 = vadd.f32 %v5893_v34, %v2655_v61  ;;  %v2725_v16 = vmax.f32 %v2693_v40, 0.0 }
 0x390   :  { %v2728_v20 = vmax.f32 %v2696_v33, 0.0 }
 0x391   :  { %v2727_v5 = vmax.f32 %v2695_v35, 0.0 }
 0x392   :  { %v2756_v11 = vpack.c.bf16 %v2728_v20, %v2726_v50 }
 0x393   :  { %v2755_v1 = vpack.c.bf16 %v2727_v5, %v2725_v16 }
 0x394   :  { %3011 = vmatprep.mubr.bf16.mxu0 %v2756_v11 }
 0x395   :  { %3012 = vmatmul.mubr.bf16.gmra.mrb[36].mxu0 %v2755_v1 }
 0x39a   :  { %v2366_v56 = vpop.xlane.xlu1 %2365 }
 0x39b   :  { %v2405_v51 = vmul.f32 0.00390625, %v2366_v56 }
 0x39c   :  { %v2369_v24 = vpop.xlane.xlu0 %2368 }
 0x39d   :  { %v2406_v3 = vmul.f32 0.00390625, %v2369_v24  ;;  %v2517_v31 = vmul.f32 %v2405_v51, %v2405_v51  ;;  %v2553_v15 = vsub.f32 %v5738_v0, %v2405_v51  ;;  %v2554_v47 = vsub.f32 %v5741_v57, %v2405_v51 }
 0x39e   :  { %v2466_v46 = vpop.xlane.xlu1 %2465 }
 0x39f   :  { %v2518_v21 = vmul.f32 %v2406_v3, %v2406_v3  ;;  %v2502_v41 = vmul.f32 0.00390625, %v2466_v46  ;;  %v2555_v18 = vsub.f32 %v5744_v26, %v2406_v3  ;;  %v2556_v59 = vsub.f32 %v5747_v23, %v2406_v3 }
 0x3a0   :  { %v2463_v28 = vpop.xlane.xlu0 %2462 }
 0x3a1   :  { %v2534_v54 = vsub.f32 %v2502_v41, %v2518_v21  ;;  %v2501_v29 = vmul.f32 0.00390625, %v2463_v28 }
 0x3a3   :  { %v2582_v48 = vadd.f32 1e-05, %v2534_v54  ;;  %v2533_v25 = vsub.f32 %v2501_v29, %v2517_v31 }
 0x3a5   :  { %3528 = vrsqrt.f32 %v2582_v48  ;;  %v2581_v52 = vadd.f32 1e-05, %v2533_v25 }
 0x3a7   :  { %3530 = vrsqrt.f32 %v2581_v52 }
 0x3af   :  { %v3529_v17 = vpop.eup %3528 }
 0x3b0   :  { %v2620_v43 = vmul.f32 %v3529_v17, %v2556_v59  ;;  %v2619_v38 = vmul.f32 %v3529_v17, %v2555_v18 }
 0x3b1   :  { %v3531_v55 = vpop.eup %3530 }
 0x3b2   :  { %v2618_v63 = vmul.f32 %v3531_v55, %v2554_v47  ;;  %v2660_v39 = vmul.f32 %v5889_v22, %v2620_v43  ;;  %v2617_v44 = vmul.f32 %v3531_v55, %v2553_v15  ;;  %v2659_v32 = vmul.f32 %v5883_v12, %v2619_v38 }
 0x3b4   :  { %v2658_v61 = vmul.f32 %v5889_v22, %v2618_v63  ;;  %v2700_v26 = vadd.f32 %v5897_v14, %v2660_v39  ;;  %v2657_v23 = vmul.f32 %v5883_v12, %v2617_v44  ;;  %v2699_v40 = vadd.f32 %v5893_v34, %v2659_v32 }
 0x3b6   :  { %v2698_v0 = vadd.f32 %v5897_v14, %v2658_v61  ;;  %v2697_v57 = vadd.f32 %v5893_v34, %v2657_v23  ;;  %v2732_v35 = vmax.f32 %v2700_v26, 0.0  ;;  %v2731_v20 = vmax.f32 %v2699_v40, 0.0 }
 0x3b8   :  { %v2730_v33 = vmax.f32 %v2698_v0, 0.0  ;;  %v2729_v50 = vmax.f32 %v2697_v57, 0.0 }
 0x3ba   :  { %v2758_v16 = vpack.c.bf16 %v2732_v35, %v2730_v33  ;;  %v2757_v5 = vpack.c.bf16 %v2731_v20, %v2729_v50 }
 0x3bc   :  { %3021 = vmatprep.mubr.bf16.mxu1 %v2758_v16 }
 0x3bd   :  { %v2372_v11 = vpop.xlane.xlu0 %2371  ;;  %3022 = vmatmul.mubr.bf16.vlgmr.msra.gmra.mrb[0].mxu1 %v2757_v5 }
 0x3be   :  { %v2407_v1 = vmul.f32 0.00390625, %v2372_v11 }
 0x3bf   :  { %v2375_v56 = vpop.xlane.xlu1 %2374 }
 0x3c0   :  { %v2408_v24 = vmul.f32 0.00390625, %v2375_v56  ;;  %v2519_v3 = vmul.f32 %v2407_v1, %v2407_v1  ;;  %v2557_v32 = vsub.f32 %v5762_v6, %v2407_v1  ;;  %v2558_v61 = vsub.f32 %v5765_v27, %v2407_v1 }
 0x3c1   :  { %v2469_v51 = vpop.xlane.xlu0 %2468 }
 0x3c2   :  { %v2503_v46 = vmul.f32 0.00390625, %v2469_v51  ;;  %v2520_v28 = vmul.f32 %v2408_v24, %v2408_v24  ;;  %v2559_v40 = vsub.f32 %v5768_v7, %v2408_v24  ;;  %v2560_v0 = vsub.f32 %v5771_v53, %v2408_v24 }
 0x3c3   :  { %v2472_v21 = vpop.xlane.xlu1 %2471 }
 0x3c4   :  { %v2535_v41 = vsub.f32 %v2503_v46, %v2519_v3  ;;  %v2504_v54 = vmul.f32 0.00390625, %v2472_v21 }
 0x3c6   :  { %v2583_v29 = vadd.f32 1e-05, %v2535_v41  ;;  %v2536_v31 = vsub.f32 %v2504_v54, %v2520_v28 }
 0x3c8   :  { %v2378_v48 = vpop.xlane.xlu0 %2377  ;;  %3532 = vrsqrt.f32 %v2583_v29  ;;  %v2584_v52 = vadd.f32 1e-05, %v2536_v31 }
 0x3c9   :  { %v2409_v25 = vmul.f32 0.00390625, %v2378_v48 }
 0x3ca   :  { %v2381_v18 = vpop.xlane.xlu1 %2380  ;;  %3534 = vrsqrt.f32 %v2584_v52 }
 0x3cb   :  { %v5933_v59 = vmul.f32 0.00390625, %v2381_v18  ;;  %v2521_v15 = vmul.f32 %v2409_v25, %v2409_v25  ;;  %v2561_v21 = vsub.f32 %v5786_v62, %v2409_v25  ;;  %v2562_v41 = vsub.f32 %v5789_v42, %v2409_v25 }
 0x3cc   :  { %v2475_v17 = vpop.xlane.xlu0 %2474 }
 0x3cd   :  { %v2505_v47 = vmul.f32 0.00390625, %v2475_v17  ;;  %v2522_v55 = vmul.f32 %v5933_v59, %v5933_v59  ;;  %v2564_v31 = vsub.f32 %v5795_v60, %v5933_v59 }
 0x3ce   :  { %v2478_v43 = vpop.xlane.xlu1 %2477 }
 0x3cf   :  { %v2537_v38 = vsub.f32 %v2505_v47, %v2521_v15  ;;  %v2506_v63 = vmul.f32 0.00390625, %v2478_v43 }
 0x3d1   :  { %v2585_v39 = vadd.f32 1e-05, %v2537_v38  ;;  %v2538_v44 = vsub.f32 %v2506_v63, %v2522_v55 }
 0x3d2   :  { %v3533_v23 = vpop.eup %3532 }
 0x3d3   :  { %3536 = vrsqrt.f32 %v2585_v39  ;;  %v2586_v26 = vadd.f32 1e-05, %v2538_v44  ;;  %v2622_v57 = vmul.f32 %v3533_v23, %v2558_v61  ;;  %v2621_v33 = vmul.f32 %v3533_v23, %v2557_v32 }
 0x3d4   :  { %v3535_v50 = vpop.eup %3534  ;;  %v2563_v39 = vsub.f32 %v5792_v58, %v5933_v59 }
 0x3d5   :  { %3538 = vrsqrt.f32 %v2586_v26  ;;  %v2384_v35 = vpop.xlane.xlu0 %2383  ;;  %v2624_v16 = vmul.f32 %v3535_v50, %v2560_v0  ;;  %v2662_v5 = vmul.f32 %v5889_v22, %v2622_v57  ;;  %v2623_v6 = vmul.f32 %v3535_v50, %v2559_v40 }
 0x3d6   :  { %v5941_v20 = vmul.f32 0.00390625, %v2384_v35  ;;  %v2661_v27 = vmul.f32 %v5883_v12, %v2621_v33 }
 0x3d7   :  { %v2387_v11 = vpop.xlane.xlu1 %2386  ;;  %v2664_v7 = vmul.f32 %v5889_v22, %v2624_v16  ;;  %v2702_v53 = vadd.f32 %v5897_v14, %v2662_v5  ;;  %v2663_v56 = vmul.f32 %v5883_v12, %v2623_v6 }
 0x3d8   :  { %v5945_v1 = vmul.f32 0.00390625, %v2387_v11  ;;  %v2701_v24 = vadd.f32 %v5893_v34, %v2661_v27  ;;  %v2523_v3 = vmul.f32 %v5941_v20, %v5941_v20 }
 0x3d9   :  { %v2481_v51 = vpop.xlane.xlu0 %2480  ;;  %v2704_v28 = vadd.f32 %v5897_v14, %v2664_v7  ;;  %v2703_v54 = vadd.f32 %v5893_v34, %v2663_v56  ;;  %v2734_v15 = vmax.f32 %v2702_v53, 0.0 }
 0x3da   :  { %v2507_v46 = vmul.f32 0.00390625, %v2481_v51  ;;  %v2524_v52 = vmul.f32 %v5945_v1, %v5945_v1  ;;  %v2733_v43 = vmax.f32 %v2701_v24, 0.0 }
 0x3db   :  { %v2484_v29 = vpop.xlane.xlu1 %2483  ;;  %v2736_v47 = vmax.f32 %v2704_v28, 0.0  ;;  %v2735_v62 = vmax.f32 %v2703_v54, 0.0  ;;  %v2565_v54 = vsub.f32 %v5810_v37, %v5941_v20 }
 0x3dc   :  { %v2539_v48 = vsub.f32 %v2507_v46, %v2523_v3  ;;  %v2508_v18 = vmul.f32 0.00390625, %v2484_v29  ;;  %v2566_v29 = vsub.f32 %v5813_v4, %v5941_v20 }
 0x3dd   :  { %v3537_v17 = vpop.eup %3536  ;;  %v2760_v44 = vpack.c.bf16 %v2736_v47, %v2734_v15  ;;  %v2759_v60 = vpack.c.bf16 %v2735_v62, %v2733_v43  ;;  %v2568_v15 = vsub.f32 %v5819_v9, %v5945_v1 }
 0x3de   :  { %v2587_v38 = vadd.f32 1e-05, %v2539_v48  ;;  %v2540_v42 = vsub.f32 %v2508_v18, %v2524_v52  ;;  %v2626_v25 = vmul.f32 %v3537_v17, %v2562_v41  ;;  %v2625_v55 = vmul.f32 %v3537_v17, %v2561_v21 }
 0x3df   :  { %v3539_v63 = vpop.eup %3538  ;;  %3031 = vmatprep.mubr.bf16.mxu1 %v2760_v44  ;;  %v2567_v17 = vsub.f32 %v5816_v30, %v5945_v1 }
 0x3e0   :  { %3540 = vrsqrt.f32 %v2587_v38  ;;  %v2588_v32 = vadd.f32 1e-05, %v2540_v42  ;;  %v2628_v61 = vmul.f32 %v3539_v63, %v2564_v31  ;;  %v2666_v26 = vmul.f32 %v5889_v22, %v2626_v25  ;;  %3032 = vmatmul.mubr.bf16.gmra.mrb[4].mxu1 %v2759_v60 }
 0x3e1   :  { %v2627_v23 = vmul.f32 %v3539_v63, %v2563_v39  ;;  %v2665_v40 = vmul.f32 %v5883_v12, %v2625_v55  ;;  %v2390_v0 = vpop.xlane.xlu0 %2389 }
 0x3e2   :  { %3542 = vrsqrt.f32 %v2588_v32  ;;  %v2668_v57 = vmul.f32 %v5889_v22, %v2628_v61  ;;  %v2706_v33 = vadd.f32 %v5897_v14, %v2666_v26  ;;  %v5967_v35 = vmul.f32 0.00390625, %v2390_v0 }
 0x3e3   :  { %v2667_v58 = vmul.f32 %v5883_v12, %v2627_v23  ;;  %v2705_v59 = vadd.f32 %v5893_v34, %v2665_v40  ;;  %v2393_v50 = vpop.xlane.xlu1 %2392 }
 0x3e4   :  { %v2708_v16 = vadd.f32 %v5897_v14, %v2668_v57  ;;  %v5973_v6 = vmul.f32 0.00390625, %v2393_v50  ;;  %v2738_v11 = vmax.f32 %v2706_v33, 0.0  ;;  %v2525_v53 = vmul.f32 %v5967_v35, %v5967_v35 }
 0x3e5   :  { %v2707_v5 = vadd.f32 %v5893_v34, %v2667_v58  ;;  %v2487_v27 = vpop.xlane.xlu0 %2486  ;;  %v2737_v24 = vmax.f32 %v2705_v59, 0.0  ;;  %v2569_v0 = vsub.f32 %v5834_v36, %v5967_v35  ;;  %v2570_v57 = vsub.f32 %v5837_v49, %v5967_v35 }
 0x3e6   :  { %v2740_v7 = vmax.f32 %v2708_v16, 0.0  ;;  %v2509_v56 = vmul.f32 0.00390625, %v2487_v27  ;;  %v2526_v41 = vmul.f32 %v5973_v6, %v5973_v6  ;;  %v2571_v27 = vsub.f32 %v5840_v19, %v5973_v6 }
 0x3e7   :  { %v2739_v51 = vmax.f32 %v2707_v5, 0.0  ;;  %v2490_v3 = vpop.xlane.xlu1 %2489 }
 0x3e8   :  { %v2762_v46 = vpack.c.bf16 %v2740_v7, %v2738_v11  ;;  %v2541_v21 = vsub.f32 %v2509_v56, %v2525_v53  ;;  %v2510_v28 = vmul.f32 0.00390625, %v2490_v3  ;;  %v2572_v11 = vsub.f32 %v5843_v45, %v5973_v6 }
 0x3e9   :  { %v2761_v31 = vpack.c.bf16 %v2739_v51, %v2737_v24 }
 0x3ea   :  { %v3541_v48 = vpop.eup %3540  ;;  %3041 = vmatprep.mubr.bf16.mxu1 %v2762_v46  ;;  %v2589_v52 = vadd.f32 1e-05, %v2541_v21  ;;  %v2542_v18 = vsub.f32 %v2510_v28, %v2526_v41 }
 0x3eb   :  { %3042 = vmatmul.mubr.bf16.gmra.mrb[8].mxu1 %v2761_v31  ;;  %v2630_v47 = vmul.f32 %v3541_v48, %v2566_v29  ;;  %v2629_v43 = vmul.f32 %v3541_v48, %v2565_v54 }
 0x3ec   :  { %v3543_v62 = vpop.eup %3542  ;;  %3544 = vrsqrt.f32 %v2589_v52  ;;  %v2590_v37 = vadd.f32 1e-05, %v2542_v18 }
 0x3ed   :  { %v2632_v38 = vmul.f32 %v3543_v62, %v2568_v15  ;;  %v2670_v4 = vmul.f32 %v5889_v22, %v2630_v47  ;;  %v2631_v20 = vmul.f32 %v3543_v62, %v2567_v17  ;;  %v2669_v42 = vmul.f32 %v5883_v12, %v2629_v43 }
 0x3ee   :  { %3546 = vrsqrt.f32 %v2590_v37 }
 0x3ef   :  { %v2672_v25 = vmul.f32 %v5889_v22, %v2632_v38  ;;  %v2710_v30 = vadd.f32 %v5897_v14, %v2670_v4  ;;  %v2671_v55 = vmul.f32 %v5883_v12, %v2631_v20  ;;  %v2709_v9 = vadd.f32 %v5893_v34, %v2669_v42 }
 0x3f1   :  { %v2712_v1 = vadd.f32 %v5897_v14, %v2672_v25  ;;  %v2711_v63 = vadd.f32 %v5893_v34, %v2671_v55  ;;  %v2396_v39 = vpop.xlane.xlu0 %2395  ;;  %v2742_v60 = vmax.f32 %v2710_v30, 0.0  ;;  %v2741_v61 = vmax.f32 %v2709_v9, 0.0 }
 0x3f2   :  { %v2415_v44 = vmul.f32 0.00390625, %v2396_v39 }
 0x3f3   :  { %v2744_v32 = vmax.f32 %v2712_v1, 0.0  ;;  %v2743_v26 = vmax.f32 %v2711_v63, 0.0  ;;  %v2399_v23 = vpop.xlane.xlu1 %2398 }
 0x3f4   :  { %v2416_v40 = vmul.f32 0.00390625, %v2399_v23  ;;  %v2527_v16 = vmul.f32 %v2415_v44, %v2415_v44  ;;  %v2573_v62 = vsub.f32 %v5858_v8, %v2415_v44  ;;  %v2574_v37 = vsub.f32 %v5861_v13, %v2415_v44 }
 0x3f5   :  { %v2764_v33 = vpack.c.bf16 %v2744_v32, %v2742_v60  ;;  %v2763_v58 = vpack.c.bf16 %v2743_v26, %v2741_v61  ;;  %v2493_v59 = vpop.xlane.xlu0 %2492 }
 0x3f6   :  { %v3545_v50 = vpop.eup %3544  ;;  %v2511_v5 = vmul.f32 0.00390625, %v2493_v59  ;;  %v2528_v49 = vmul.f32 %v2416_v40, %v2416_v40  ;;  %v2575_v4 = vsub.f32 %v5864_v10, %v2416_v40  ;;  %v2576_v20 = vsub.f32 %v5867_v2, %v2416_v40 }
 0x3f7   :  { %3051 = vmatprep.mubr.bf16.mxu1 %v2764_v33  ;;  %v2496_v7 = vpop.xlane.xlu1 %2495  ;;  %v2634_v53 = vmul.f32 %v3545_v50, %v2570_v57  ;;  %v2633_v56 = vmul.f32 %v3545_v50, %v2569_v0  ;;  %v3553_v0 = vld [vmem:[#allocation2] sm:$0xff]  ;;  %v3554_v33 = vld [vmem:[#allocation2 + $0x8] sm:$0xff] }
 0x3f8   :  { %v3547_v36 = vpop.eup %3546  ;;  %3052 = vmatmul.mubr.bf16.gmra.mrb[12].mxu1 %v2763_v58  ;;  %v2543_v24 = vsub.f32 %v2511_v5, %v2527_v16  ;;  %v2512_v35 = vmul.f32 0.00390625, %v2496_v7 }
 0x3f9   :  { %v2636_v51 = vmul.f32 %v3547_v36, %v2572_v11  ;;  %v2674_v3 = vmul.f32 %v5889_v22, %v2634_v53  ;;  %v2635_v46 = vmul.f32 %v3547_v36, %v2571_v27  ;;  %v2673_v21 = vmul.f32 %v5883_v12, %v2633_v56 }
 0x3fa   :  { %v2591_v41 = vadd.f32 1e-05, %v2543_v24  ;;  %v2544_v19 = vsub.f32 %v2512_v35, %v2528_v49 }
 0x3fb   :  { %v2676_v28 = vmul.f32 %v5889_v22, %v2636_v51  ;;  %v2714_v45 = vadd.f32 %v5897_v14, %v2674_v3  ;;  %v2675_v6 = vmul.f32 %v5883_v12, %v2635_v46  ;;  %v2713_v54 = vadd.f32 %v5893_v34, %v2673_v21 }
 0x3fc   :  { %3548 = vrsqrt.f32 %v2591_v41  ;;  %v2592_v29 = vadd.f32 1e-05, %v2544_v19 }
 0x3fd   :  { %v2716_v31 = vadd.f32 %v5897_v14, %v2676_v28  ;;  %v2715_v48 = vadd.f32 %v5893_v34, %v2675_v6  ;;  %v2746_v52 = vmax.f32 %v2714_v45, 0.0  ;;  %v2745_v17 = vmax.f32 %v2713_v54, 0.0 }
 0x3fe   :  { %3550 = vrsqrt.f32 %v2592_v29 }
 0x3ff   :  { %v2748_v18 = vmax.f32 %v2716_v31, 0.0  ;;  %v2747_v15 = vmax.f32 %v2715_v48, 0.0 }
 0x401   :  { %v2766_v47 = vpack.c.bf16 %v2748_v18, %v2746_v52  ;;  %v2765_v43 = vpack.c.bf16 %v2747_v15, %v2745_v17 }
 0x403   :  { %3061 = vmatprep.mubr.bf16.mxu1 %v2766_v47 }
 0x404   :  { %3062 = vmatmul.mubr.bf16.gmra.mrb[16].mxu1 %v2765_v43 }
 0x406   :  { %v3549_v38 = vpop.eup %3548 }
 0x407   :  { %v2638_v42 = vmul.f32 %v3549_v38, %v2574_v37  ;;  %v2637_v25 = vmul.f32 %v3549_v38, %v2573_v62 }
 0x408   :  { %v3551_v30 = vpop.eup %3550 }
 0x409   :  { %v2640_v55 = vmul.f32 %v3551_v30, %v2576_v20  ;;  %v2678_v9 = vmul.f32 %v5889_v22, %v2638_v42  ;;  %v2639_v1 = vmul.f32 %v3551_v30, %v2575_v4  ;;  %v2677_v63 = vmul.f32 %v5883_v12, %v2637_v25 }
 0x40b   :  { %v2680_v39 = vmul.f32 %v5889_v22, %v2640_v55  ;;  %v2718_v8 = vadd.f32 %v5897_v14, %v2678_v9  ;;  %v2679_v13 = vmul.f32 %v5883_v12, %v2639_v1  ;;  %v2717_v44 = vadd.f32 %v5893_v34, %v2677_v63  ;;  %v6401_v22 = vld [vmem:[#allocation14_spill] sm:$0xff] }
 0x40c   :  { %v6024_v57 = vrot.slane %v3553_v0, %v6401_v22  ;;  %v6027_v12 = vrot.slane %v3554_v33, %v6401_v22 }
 0x40d   :  { %v2720_v10 = vadd.f32 %v5897_v14, %v2680_v39  ;;  %v2719_v2 = vadd.f32 %v5893_v34, %v2679_v13  ;;  %v2750_v60 = vmax.f32 %v2718_v8, 0.0  ;;  %v2749_v61 = vmax.f32 %v2717_v44, 0.0 }
 0x40f   :  { %v2752_v32 = vmax.f32 %v2720_v10, 0.0  ;;  %v2751_v26 = vmax.f32 %v2719_v2, 0.0 }
 0x411   :  { %v2768_v23 = vpack.c.bf16 %v2752_v32, %v2750_v60  ;;  %v2767_v40 = vpack.c.bf16 %v2751_v26, %v2749_v61 }
 0x413   :  { %3071 = vmatprep.mubr.bf16.mxu1 %v2768_v23 }
 0x414   :  { %3072 = vmatmul.mubr.bf16.gmra.mrb[20].mxu1 %v2767_v40 }
 0x460   :  { %v3003_v58 = vpop.f32.mrb[32].mxu0 }
 0x461   :  { %v3004_v14 = vadd.f32 %v3003_v58, %v6024_v57  ;;  %v3005_v34 = vpop.f32.mrb[33].mxu0 }
 0x462   :  { %v3006_v59 = vadd.f32 %v3005_v34, %v6027_v12  ;;  %v3007_v50 = vpop.f32.mrb[34].mxu0 }
 0x463   :  { %3082 = vst [vmem:[#allocation7] sm:$0xff] %v3004_v14  ;;  %v3008_v16 = vadd.f32 %v3007_v50, %v6024_v57  ;;  %v3009_v5 = vpop.f32.mrb[35].mxu0 }
 0x464   :  { %3083 = vst [vmem:[#allocation7 + $0x8] sm:$0xff] %v3006_v59  ;;  %v3010_v27 = vadd.f32 %v3009_v5, %v6027_v12 }
 0x465   :  { %3084 = vst [vmem:[#allocation7 + $0x10] sm:$0xff] %v3008_v16 }
 0x466   :  { %3085 = vst [vmem:[#allocation7 + $0x18] sm:$0xff] %v3010_v27 }
 0x468   :  { %v3013_v11 = vpop.f32.mrb[36].mxu0 }
 0x469   :  { %v3014_v7 = vadd.f32 %v3013_v11, %v6024_v57  ;;  %v3015_v53 = vpop.f32.mrb[37].mxu0 }
 0x46a   :  { %v3016_v56 = vadd.f32 %v3015_v53, %v6027_v12  ;;  %v3017_v36 = vpop.f32.mrb[38].mxu0 }
 0x46b   :  { %3086 = vst [vmem:[#allocation7 + $0x20] sm:$0xff] %v3014_v7  ;;  %v3018_v24 = vadd.f32 %v3017_v36, %v6024_v57  ;;  %v3019_v49 = vpop.f32.mrb[39].mxu0 }
 0x46c   :  { %3087 = vst [vmem:[#allocation7 + $0x28] sm:$0xff] %v3016_v56  ;;  %v3020_v35 = vadd.f32 %v3019_v49, %v6027_v12 }
 0x46d   :  { %3088 = vst [vmem:[#allocation7 + $0x30] sm:$0xff] %v3018_v24 }
 0x46e   :  { %3089 = vst [vmem:[#allocation7 + $0x38] sm:$0xff] %v3020_v35 }
 0x490   :  { %v3023_v51 = vpop.f32.mrb[0].mxu1 }
 0x491   :  { %v3024_v3 = vadd.f32 %v3023_v51, %v6024_v57  ;;  %v3025_v46 = vpop.f32.mrb[1].mxu1 }
 0x492   :  { %v3026_v21 = vadd.f32 %v3025_v46, %v6027_v12  ;;  %v3027_v41 = vpop.f32.mrb[2].mxu1 }
 0x493   :  { %3090 = vst [vmem:[#allocation7 + $0x40] sm:$0xff] %v3024_v3  ;;  %v3028_v19 = vadd.f32 %v3027_v41, %v6024_v57  ;;  %v3029_v28 = vpop.f32.mrb[3].mxu1 }
 0x494   :  { %3091 = vst [vmem:[#allocation7 + $0x48] sm:$0xff] %v3026_v21  ;;  %v3030_v45 = vadd.f32 %v3029_v28, %v6027_v12 }
 0x495   :  { %3092 = vst [vmem:[#allocation7 + $0x50] sm:$0xff] %v3028_v19 }
 0x496   :  { %3093 = vst [vmem:[#allocation7 + $0x58] sm:$0xff] %v3030_v45 }
 0x4b3   :  { %v3033_v6 = vpop.f32.mrb[4].mxu1 }
 0x4b4   :  { %v3034_v54 = vadd.f32 %v3033_v6, %v6024_v57  ;;  %v3035_v29 = vpop.f32.mrb[5].mxu1 }
 0x4b5   :  { %v3036_v31 = vadd.f32 %v3035_v29, %v6027_v12  ;;  %v3037_v48 = vpop.f32.mrb[6].mxu1 }
 0x4b6   :  { %3094 = vst [vmem:[#allocation7 + $0x60] sm:$0xff] %v3034_v54  ;;  %v3038_v52 = vadd.f32 %v3037_v48, %v6024_v57  ;;  %v3039_v18 = vpop.f32.mrb[7].mxu1 }
 0x4b7   :  { %3095 = vst [vmem:[#allocation7 + $0x68] sm:$0xff] %v3036_v31  ;;  %v3040_v17 = vadd.f32 %v3039_v18, %v6027_v12 }
 0x4b8   :  { %3096 = vst [vmem:[#allocation7 + $0x70] sm:$0xff] %v3038_v52 }
 0x4b9   :  { %3097 = vst [vmem:[#allocation7 + $0x78] sm:$0xff] %v3040_v17 }
 0x4be   :  { %v3043_v15 = vpop.f32.mrb[8].mxu1 }
 0x4bf   :  { %v3044_v47 = vadd.f32 %v3043_v15, %v6024_v57  ;;  %v3045_v43 = vpop.f32.mrb[9].mxu1 }
 0x4c0   :  { %v3046_v62 = vadd.f32 %v3045_v43, %v6027_v12  ;;  %v3047_v37 = vpop.f32.mrb[10].mxu1 }
 0x4c1   :  { %3098 = vst [vmem:[#allocation7 + $0x80] sm:$0xff] %v3044_v47  ;;  %v3048_v38 = vadd.f32 %v3047_v37, %v6024_v57  ;;  %v3049_v4 = vpop.f32.mrb[11].mxu1 }
 0x4c2   :  { %3099 = vst [vmem:[#allocation7 + $0x88] sm:$0xff] %v3046_v62  ;;  %v3050_v20 = vadd.f32 %v3049_v4, %v6027_v12 }
 0x4c3   :  { %3100 = vst [vmem:[#allocation7 + $0x90] sm:$0xff] %v3048_v38 }
 0x4c4   :  { %3101 = vst [vmem:[#allocation7 + $0x98] sm:$0xff] %v3050_v20 }
 0x4cb   :  { %v3053_v42 = vpop.f32.mrb[12].mxu1 }
 0x4cc   :  { %v3054_v25 = vadd.f32 %v3053_v42, %v6024_v57  ;;  %v3055_v30 = vpop.f32.mrb[13].mxu1 }
 0x4cd   :  { %v3056_v55 = vadd.f32 %v3055_v30, %v6027_v12  ;;  %v3057_v9 = vpop.f32.mrb[14].mxu1 }
 0x4ce   :  { %3102 = vst [vmem:[#allocation7 + $0xa0] sm:$0xff] %v3054_v25  ;;  %v3058_v1 = vadd.f32 %v3057_v9, %v6024_v57  ;;  %v3059_v63 = vpop.f32.mrb[15].mxu1 }
 0x4cf   :  { %3103 = vst [vmem:[#allocation7 + $0xa8] sm:$0xff] %v3056_v55  ;;  %v3060_v39 = vadd.f32 %v3059_v63, %v6027_v12 }
 0x4d0   :  { %3104 = vst [vmem:[#allocation7 + $0xb0] sm:$0xff] %v3058_v1 }
 0x4d1   :  { %3105 = vst [vmem:[#allocation7 + $0xb8] sm:$0xff] %v3060_v39 }
 0x4d7   :  { %v3063_v8 = vpop.f32.mrb[16].mxu1 }
 0x4d8   :  { %v3064_v13 = vadd.f32 %v3063_v8, %v6024_v57  ;;  %v3065_v44 = vpop.f32.mrb[17].mxu1 }
 0x4d9   :  { %v3066_v10 = vadd.f32 %v3065_v44, %v6027_v12  ;;  %v3067_v2 = vpop.f32.mrb[18].mxu1 }
 0x4da   :  { %3106 = vst [vmem:[#allocation7 + $0xc0] sm:$0xff] %v3064_v13  ;;  %v3068_v60 = vadd.f32 %v3067_v2, %v6024_v57  ;;  %v3069_v32 = vpop.f32.mrb[19].mxu1 }
 0x4db   :  { %3107 = vst [vmem:[#allocation7 + $0xc8] sm:$0xff] %v3066_v10  ;;  %v3070_v61 = vadd.f32 %v3069_v32, %v6027_v12 }
 0x4dc   :  { %3108 = vst [vmem:[#allocation7 + $0xd0] sm:$0xff] %v3068_v60 }
 0x4dd   :  { %3109 = vst [vmem:[#allocation7 + $0xd8] sm:$0xff] %v3070_v61 }
 0x4e7   :  { %v3073_v26 = vpop.f32.mrb[20].mxu1 }
 0x4e8   :  { %v3074_v23 = vadd.f32 %v3073_v26, %v6024_v57  ;;  %v3075_v40 = vpop.f32.mrb[21].mxu1 }
 0x4e9   :  { %v3076_v0 = vadd.f32 %v3075_v40, %v6027_v12  ;;  %v3077_v22 = vpop.f32.mrb[22].mxu1 }
 0x4ea   :  { %3110 = vst [vmem:[#allocation7 + $0xe0] sm:$0xff] %v3074_v23  ;;  %v3078_v33 = vadd.f32 %v3077_v22, %v6024_v57  ;;  %v3079_v58 = vpop.f32.mrb[23].mxu1 }
 0x4eb   :  { %3111 = vst [vmem:[#allocation7 + $0xe8] sm:$0xff] %v3076_v0  ;;  %v3080_v14 = vadd.f32 %v3079_v58, %v6027_v12 }
 0x4ec   :  { %3112 = vst [vmem:[#allocation7 + $0xf0] sm:$0xff] %v3078_v33 }
 0x4ed   :  { %3113 = vst [vmem:[#allocation7 + $0xf8] sm:$0xff] %v3080_v14 }
 0x4ee   :  { %3610 = shalt.err (!%p3607_p6)
}
 0x4ef   :  { %s3611_s7 = scalar_lea.hbm %s6078_s5, 4096 }
 0x4f0   :  { %p3612_p7 = scmp.ne.s32.totalorder %s6078_s5, %s3611_s7  ;;  %p3615_p8 = scmp.lt.u32.totalorder %s3611_s7, %s6078_s5 }
 0x4f2   :  { %p3617_p9 = pnand %p3615_p8, %p3612_p7 }
 0x4f4   :  { %3620 = shalt.err (!%p3617_p9)
}
 0x4f5   :  { %s3641_s12 = smov 256   ;;  %s3642_s13 = smov 16  }
 0x4f6   :  { %3125 = dma.vmem_to_hbm [thread:$0]  %s3120_s28, 4096, %s6078_s5, [#allocation4], %s3641_s12, %s3641_s12, %s3642_s13  }
 0x4f7   :  { %3625 = dma.done.wait [#allocation4], 4096  }
 0x4f8   :  { %3626 = vsyncadd [#allocation4], 4294963200 }
 0x4f9   :  { %3129 = vsyncpa [#allocation3], 1 }
 0x4fa   :  { %3130 = vsyncpa [#allocation6], 1 }
 0x4fb   :  { %3131 = vsyncpa [#allocation4], 1 }

</bundles_post_ra>
